<compile_context>
chip_gen: v5e
topology: v5e:2x2
jax: 0.10.0
libtpu: 0.0.40
codegen_flags: <defaults>
</compile_context>

<pallas_src>
import math
from functools import partial

import jax
import jax.numpy as jnp
from jax import lax
from jax.experimental import pallas as pl
from jax.experimental.pallas import tpu as pltpu


# ----------------------------- small helpers ---------------------------------
def _round_up(x, m):
    return ((x + m - 1) // m) * m


def _pick_row_tile(n, cap):
    """Largest t <= cap that divides n and is sublane-aligned (mult of 8) or equals n."""
    cap = min(n, cap)
    for t in range(cap, 0, -1):
        if n % t == 0 and (t % 8 == 0 or t == n):
            return t
    return n


def _pick_seg_tile(num_seg, seg_len, row_cap):
    """Segments per grid step so rows <= row_cap (or 1 segment) and rows are aligned/full."""
    # TODO(synk): for seg_len > row_cap this degenerates to one whole segment per step;
    #             a key-tiled online-softmax (flash-style) inner loop is still needed for
    #             LongNet-scale segment lengths so the [seg_len, seg_len] score fits VMEM.
    for t in range(num_seg, 0, -1):
        if num_seg % t:
            continue
        r = t * seg_len
        if (r <= row_cap or t == 1) and (r % 8 == 0 or t == num_seg):
            return t
    return num_seg


def _default_row_cap():
    # v6e / v7x MXUs are 256x256 -> 256-row tiles; v5e's is 128-wide, keep 128 there.
    try:
        kind = jax.devices()[0].device_kind.lower()
        if "v5 lite" in kind or "v5e" in kind or "v5lite" in kind:
            return 128
    except Exception:
        pass
    return 256


def _const_spec(shape):
    """BlockSpec for a grid-invariant operand; single-buffered where supported."""
    nd = len(shape)
    idx = lambda i: (0,) * nd
    try:
        return pl.BlockSpec(shape, idx, pipeline_mode=pl.Buffered(1))
    except Exception:                       # older jax: no pipeline_mode / Buffered
        return pl.BlockSpec(shape, idx)


def _vmem_limit(nbytes):
    # sized from the real buffers, 50% headroom, floored above v5e's 16 MiB default
    # scoped limit, capped at v7x's 64 MiB physical VMEM.
    return int(min(max(int(nbytes * 1.5) + (2 << 20), 32 << 20), 64 << 20))


# --------- Fused layer_norm_a + all-head dilated/segmented attention ----------
def _attn_kernel(x_ref, lng_ref, lnb_ref, wq_ref, wk_ref, wv_ref, atts_ref, s_ref, *,
                 n_heads, d_k, d_v, seg_len, s_lanes):
    x = x_ref[...]                                   # [R, E] f32 raw rows (segment-contiguous)
    R = x.shape[0]
    L = seg_len
    S = R // L

    # --- fused layer_norm_a (per row, exact on gathered/dilated rows) ---
    mean = jnp.mean(x, axis=-1, keepdims=True)
    var = jnp.mean(jnp.square(x - mean), axis=-1, keepdims=True)
    xn = (x - mean) * lax.rsqrt(var + 1e-5) * lng_ref[...] + lnb_ref[...]
    xb = xn.astype(jnp.bfloat16)

    # --- all-head QKV projection: native [R,E]@[E,H*d] contraction (MXU, f32 accum) ---
    # norm_fact (1/sqrt(d_k)) is pre-folded into Wq host-side.
    q = jnp.dot(xb, wq_ref[...], preferred_element_type=jnp.float32)   # [R, H*d_k]
    k = jnp.dot(xb, wk_ref[...], preferred_element_type=jnp.float32)   # [R, H*d_k]
    v = jnp.dot(xb, wv_ref[...], preferred_element_type=jnp.float32)   # [R, H*d_v]
    qb = q.astype(jnp.bfloat16)                      # cast once, before the head loop
    kb = k.astype(jnp.bfloat16)
    vb = v.astype(jnp.bfloat16)

    # Intra-segment causal mask in [query, key] orientation: torch uses tril[key, query],
    # i.e. allowed iff query <= key (dilation preserves the tril pattern).
    qi = lax.broadcasted_iota(jnp.int32, (L, L), 0)
    ki = lax.broadcasted_iota(jnp.int32, (L, L), 1)
    allowed = qi <= ki                               # [L, L], broadcast over segments

    att_parts = []
    s_parts = []
    for h in range(n_heads):                         # static, fully unrolled
        qh = qb[:, h * d_k:(h + 1) * d_k].reshape(S, L, d_k)
        kh = kb[:, h * d_k:(h + 1) * d_k].reshape(S, L, d_k)
        vh = vb[:, h * d_v:(h + 1) * d_v].reshape(S, L, d_v)

        # per-segment scores only (no cross-segment block-diagonal waste)
        t = jnp.einsum('sqd,skd->sqk', qh, kh,
                       preferred_element_type=jnp.float32)              # [S, Lq, Lk]
        t = jnp.where(allowed, t, -jnp.inf)

        # torch softmax runs over the QUERY axis (per key column), keep the denominator
        m = jnp.max(t, axis=1, keepdims=True)        # [S, 1, Lk]
        e = jnp.exp(t - m)                           # masked entries -> 0
        ssum = jnp.sum(e, axis=1, keepdims=True)     # [S, 1, Lk]  (sm_norm, key-indexed)
        p = e * pl.reciprocal(ssum, approx=True)     # smKQ^T, [S, Lq, Lk]

        # att[q, :] = sum_k smKQ[k, q] * V[k, :]  -> native [Lq,Lk]@[Lk,d_v] contraction
        att = jnp.einsum('sqk,skd->sqd', p.astype(jnp.bfloat16), vh,
                         preferred_element_type=jnp.float32)             # [S, Lq, d_v]

        # torch pairs the query-indexed att rows with the key-indexed sm_norm at the SAME
        # flat position; relayout ssum to the row (sublane) axis once per head.
        ssum_col = jnp.swapaxes(ssum, 1, 2)          # [S, Lk, 1]
        att_parts.append((att * ssum_col).reshape(R, d_v))
        s_parts.append(ssum_col.reshape(R, 1))

    # single lane-dense store per output (no per-head masked partial stores)
    atts_ref[...] = jnp.concatenate(att_parts, axis=-1)                  # [R, H*d_v]
    s_all = jnp.concatenate(s_parts, axis=-1)                            # [R, H]
    if s_lanes > n_heads:
        s_all = jnp.concatenate(
            [s_all, jnp.zeros((R, s_lanes - n_heads), jnp.float32)], axis=-1)
    s_ref[...] = s_all


def dilated_attention_entry(x_rows, wq_t, wk_t, wv_t, ln_g, ln_b, *,
                            n_heads, d_k, d_v, seg_len, row_cap):
    """x_rows: [R_total, E] dilated rows (segment-contiguous). Returns (att*s, sm_norm)."""
    R_total, E = x_rows.shape
    num_seg = R_total // seg_len
    seg_tile = _pick_seg_tile(num_seg, seg_len, row_cap)
    r_tile = seg_tile * seg_len
    s_lanes = max(128, _round_up(n_heads, 128))
    hdk = n_heads * d_k
    hdv = n_heads * d_v

    kern = partial(_attn_kernel, n_heads=n_heads, d_k=d_k, d_v=d_v,
                   seg_len=seg_len, s_lanes=s_lanes)

    # VMEM budget (double-buffered row tiles, single-buffered weights, temporaries)
    vmem = (2 * r_tile * E * 4                              # x tiles
            + (2 * hdk + hdv) * E * 2                       # bf16 weights (single buffer)
            + 2 * r_tile * (hdv + s_lanes) * 4              # output tiles
            + r_tile * (2 * hdk + hdv) * 6                  # q/k/v f32 + bf16 copies
            + 3 * seg_tile * seg_len * seg_len * 4)         # per-head score temporaries
    flops = (2 * R_total * E * (2 * hdk + hdv)
             + 2 * n_heads * num_seg * seg_len * seg_len * (d_k + d_v))
    trans = n_heads * num_seg * seg_len * seg_len + R_total
    bytes_acc = (R_total * E * 4 + (2 * hdk + hdv) * E * 2
                 + R_total * (hdv + s_lanes) * 4)

    out_shapes = (jax.ShapeDtypeStruct((R_total, hdv), jnp.float32),
                  jax.ShapeDtypeStruct((R_total, s_lanes), jnp.float32))
    atts, s = pl.pallas_call(
        kern,
        out_shape=out_shapes,
        grid=(R_total // r_tile,),
        in_specs=[pl.BlockSpec((r_tile, E), lambda i: (i, 0)),
                  _const_spec((1, E)),
                  _const_spec((1, E)),
                  _const_spec((E, hdk)),
                  _const_spec((E, hdk)),
                  _const_spec((E, hdv))],
        out_specs=(pl.BlockSpec((r_tile, hdv), lambda i: (i, 0)),
                   pl.BlockSpec((r_tile, s_lanes), lambda i: (i, 0))),
        compiler_params=pltpu.CompilerParams(
            dimension_semantics=("parallel",),
            vmem_limit_bytes=_vmem_limit(vmem)),
        cost_estimate=pl.CostEstimate(flops=int(flops), transcendentals=int(trans),
                                      bytes_accessed=int(bytes_acc)),
    )(x_rows, ln_g.reshape(1, E), ln_b.reshape(1, E), wq_t, wk_t, wv_t)
    return atts, s[:, :n_heads]


# --------- Fused output-projection + residual + layer_norm_b + FFN ------------
def _proj_ln_ffn_kernel(hc_ref, x_ref, wout_ref, lng_ref, lnb_ref,
                        w1_ref, b1_ref, w2_ref, b2_ref, o_ref):
    # dense_out (no bias) + residual with the ORIGINAL block input (dropout = identity)
    hc = hc_ref[...].astype(jnp.bfloat16)                                  # [TN, H*d_v]
    ss = jnp.dot(hc, wout_ref[...], preferred_element_type=jnp.float32) + x_ref[...]
    # layer_norm_b (f32)
    mean = jnp.mean(ss, axis=-1, keepdims=True)
    var = jnp.mean(jnp.square(ss - mean), axis=-1, keepdims=True)
    h = (ss - mean) * lax.rsqrt(var + 1e-5) * lng_ref[...] + lnb_ref[...]
    # position-wise FFN (Linear -> ReLU -> Linear); no second residual (matches torch)
    h1 = jnp.dot(h.astype(jnp.bfloat16), w1_ref[...],
                 preferred_element_type=jnp.float32) + b1_ref[...]
    h1 = jnp.maximum(h1, 0.0)
    o_ref[...] = jnp.dot(h1.astype(jnp.bfloat16), w2_ref[...],
                         preferred_element_type=jnp.float32) + b2_ref[...]


def proj_ln_ffn(head_cat, x2d, wout_t, ln_g, ln_b, w1_t, b1, w2_t, b2, *, tile_n):
    N, hdv = head_cat.shape
    E = x2d.shape[1]
    F = w1_t.shape[1]
    vmem = (2 * tile_n * (hdv + E) * 4                    # input tiles
            + (hdv * E + 2 * E * F) * 2                   # bf16 weights (single buffer)
            + 2 * tile_n * E * 4                          # output tiles
            + tile_n * (3 * E + 2 * F) * 4)               # intermediates
    flops = 2 * N * (hdv * E + 2 * E * F)
    bytes_acc = N * (hdv + 2 * E) * 4 + (hdv * E + 2 * E * F) * 2
    return pl.pallas_call(
        _proj_ln_ffn_kernel,
        out_shape=jax.ShapeDtypeStruct((N, E), jnp.float32),
        grid=(N // tile_n,),
        in_specs=[pl.BlockSpec((tile_n, hdv), lambda i: (i, 0)),
                  pl.BlockSpec((tile_n, E), lambda i: (i, 0)),
                  _const_spec((hdv, E)),
                  _const_spec((1, E)),
                  _const_spec((1, E)),
                  _const_spec((E, F)),
                  _const_spec((1, F)),
                  _const_spec((F, E)),
                  _const_spec((1, E))],
        out_specs=pl.BlockSpec((tile_n, E), lambda i: (i, 0)),
        compiler_params=pltpu.CompilerParams(
            dimension_semantics=("parallel",),
            vmem_limit_bytes=_vmem_limit(vmem)),
        cost_estimate=pl.CostEstimate(flops=int(flops), transcendentals=int(N),
                                      bytes_accessed=int(bytes_acc)),
    )(head_cat, x2d, wout_t, ln_g.reshape(1, E), ln_b.reshape(1, E),
      w1_t, b1.reshape(1, F), w2_t, b2.reshape(1, E))


# ------------------------- Full block forward (glue) -------------------------
def dilated_transformer_block_forward(x_in, params, dilation_schedule, segment_schedule):
    B, T, E = x_in.shape
    N = B * T
    H, d_k, _ = params["Wq"].shape
    d_v = params["Wv"].shape[1]
    norm_fact = 1.0 / math.sqrt(d_k)
    row_cap = _default_row_cap()

    # Host-side weight prep: head-stacked, pre-transposed to [in, out] so every in-kernel
    # matmul is a native (last-dim x first-dim) MXU contraction; norm_fact folded into Wq.
    wq_t = (params["Wq"].reshape(H * d_k, E) * norm_fact).T.astype(jnp.bfloat16)  # [E, H*d_k]
    wk_t = params["Wk"].reshape(H * d_k, E).T.astype(jnp.bfloat16)                # [E, H*d_k]
    wv_t = params["Wv"].reshape(H * d_v, E).T.astype(jnp.bfloat16)                # [E, H*d_v]
    wout_t = params["Wout"].T.astype(jnp.bfloat16)                                # [H*d_v, E]
    w1_t = params["W1"].T.astype(jnp.bfloat16)                                    # [E, F]
    w2_t = params["W2"].T.astype(jnp.bfloat16)                                    # [F, E]

    # LongNet-style accumulation over all (dilation, segment_count) entries, all heads at once.
    x_out = jnp.zeros((B, T, H * d_v), jnp.float32)   # sum over entries of att * sm_norm
    s_accum = jnp.zeros((B, T, H), jnp.float32)       # sum over entries of sm_norm (per head)
    for d, g in zip(dilation_schedule, segment_schedule):
        segm_size = T // g
        # replicate torch: view(B, segm_size, g, E).permute(0,2,3,1)[..., ::d]
        # TODO(synk): the dilation gather/scatter stays in XLA; an in-kernel strided DMA
        #             (pl.ds(start, P, stride=d*g) from a pl.ANY ref) + input_output_aliases
        #             accumulation would remove ~2 memory-bound HBM passes per entry.
        xs = x_in.reshape(B, segm_size, g, E)[:, ::d, :, :]            # [B, P, g, E]
        P = xs.shape[1]
        xs = jnp.transpose(xs, (0, 2, 1, 3)).reshape(B * g * P, E)     # segment-contiguous rows

        atts, s = dilated_attention_entry(xs, wq_t, wk_t, wv_t,
                                          params["ln_a_g"], params["ln_a_b"],
                                          n_heads=H, d_k=d_k, d_v=d_v,
                                          seg_len=P, row_cap=row_cap)
        # replicate torch's flat (segment-major) scatter into the ::d positions
        x_out = x_out.at[:, ::d, :].add(atts.reshape(B, g * P, H * d_v))
        s_accum = s_accum.at[:, ::d, :].add(s.reshape(B, g * P, H))

    # att_out = x_out / s_accum per head (sm_norm broadcast over the head's d_v lanes).
    # TODO(synk): torch yields NaN (0/0) for positions no schedule entry covers; we return 0.
    s_safe = jnp.where(s_accum > 0, s_accum, 1.0)
    head_cat = (x_out.reshape(B, T, H, d_v) / s_safe[..., None]).reshape(N, H * d_v)

    out = proj_ln_ffn(head_cat, x_in.reshape(N, E), wout_t,
                      params["ln_b_g"], params["ln_b_b"],
                      w1_t, params["b1"], w2_t, params["b2"],
                      tile_n=_pick_row_tile(N, 256))
    return out.reshape(B, T, E)


# ------------------------------- Parameters ----------------------------------
def init_params(key, d_model, n_heads, d_k):
    d_v = d_model // n_heads
    F = 4 * d_model
    ks = jax.random.split(key, 8)
    return {
        "Wq": jax.random.normal(ks[0], (n_heads, d_k, d_model), jnp.float32) / math.sqrt(d_k),
        "Wk": jax.random.normal(ks[1], (n_heads, d_k, d_model), jnp.float32) / math.sqrt(d_k),
        "Wv": jax.random.normal(ks[2], (n_heads, d_v, d_model), jnp.float32) / math.sqrt(d_v),
        "Wout": jax.random.normal(ks[3], (d_model, n_heads * d_v), jnp.float32) / math.sqrt(n_heads * d_v),
        "W1": jax.random.normal(ks[4], (F, d_model), jnp.float32) / math.sqrt(d_model),
        "b1": 0.01 * jax.random.normal(ks[5], (F,), jnp.float32),
        "W2": jax.random.normal(ks[6], (d_model, F), jnp.float32) / math.sqrt(F),
        "b2": 0.01 * jax.random.normal(ks[7], (d_model,), jnp.float32),
        "ln_a_g": jnp.ones((d_model,), jnp.float32),
        "ln_a_b": jnp.zeros((d_model,), jnp.float32),
        "ln_b_g": jnp.ones((d_model,), jnp.float32),
        "ln_b_b": jnp.zeros((d_model,), jnp.float32),
    }


if __name__ == "__main__":
    # small, schedule-consistent shapes: B=2, T=32, d_model=32, n_heads=4 (d_v=8), d_k=8
    B, T, d_model = 2, 32, 32
    n_heads, d_k = 4, 8
    dilation_schedule = [1, 2]
    segment_schedule = [4, 2]      # segment COUNT (torch: segm_size = T // count)

    key = jax.random.PRNGKey(0)
    k_x, k_p = jax.random.split(key)
    x = jax.random.normal(k_x, (B, T, d_model), dtype=jnp.float32)
    params = init_params(k_p, d_model, n_heads, d_k)

    fwd = jax.jit(partial(dilated_transformer_block_forward,
                          dilation_schedule=dilation_schedule,
                          segment_schedule=segment_schedule))
    out = fwd(x, params)
    out = jax.block_until_ready(out)
    assert out.shape == (B, T, d_model)
    assert bool(jnp.all(jnp.isfinite(out)))
    print("KERNEL_OK")
</pallas_src>

<mosaic_0001>
module attributes {stable_mosaic.version = 11 : i64} {
  func.func @_attn_kernel(%arg0: i32, %arg1: memref<64x32xf32, #tpu.memory_space<vmem>>, %arg2: memref<1x32xf32, #tpu.memory_space<vmem>>, %arg3: memref<1x32xf32, #tpu.memory_space<vmem>>, %arg4: memref<32x32xbf16, #tpu.memory_space<vmem>>, %arg5: memref<32x32xbf16, #tpu.memory_space<vmem>>, %arg6: memref<32x32xbf16, #tpu.memory_space<vmem>>, %arg7: memref<64x32xf32, #tpu.memory_space<vmem>>, %arg8: memref<64x128xf32, #tpu.memory_space<vmem>>) attributes {dimension_semantics = [#tpu.dimension_semantics<parallel>], iteration_bounds = array<i64: 1>, scalar_prefetch = 0 : i64, scratch_operands = 0 : i64, tpu.core_type = #tpu.core_type<tc>, window_params = [{transform_indices = @transform_0, window_bounds = array<i64: 64, 32>}, {pipeline_mode = #tpu.pipeline_mode<synchronous>, transform_indices = @transform_1, window_bounds = array<i64: 1, 32>}, {pipeline_mode = #tpu.pipeline_mode<synchronous>, transform_indices = @transform_2, window_bounds = array<i64: 1, 32>}, {pipeline_mode = #tpu.pipeline_mode<synchronous>, transform_indices = @transform_3, window_bounds = array<i64: 32, 32>}, {pipeline_mode = #tpu.pipeline_mode<synchronous>, transform_indices = @transform_4, window_bounds = array<i64: 32, 32>}, {pipeline_mode = #tpu.pipeline_mode<synchronous>, transform_indices = @transform_5, window_bounds = array<i64: 32, 32>}, {transform_indices = @transform_6, window_bounds = array<i64: 64, 32>}, {transform_indices = @transform_7, window_bounds = array<i64: 64, 128>}]} {
    %c0 = arith.constant 0 : index
    %c0_0 = arith.constant 0 : index
    %0 = vector.load %arg1[%c0, %c0_0] : memref<64x32xf32, #tpu.memory_space<vmem>>, vector<64x32xf32>
    %cst = arith.constant dense<0.000000e+00> : vector<64xf32>
    %1 = vector.multi_reduction <add>, %0, %cst [1] : vector<64x32xf32> to vector<64xf32>
    %2 = vector.shape_cast %1 : vector<64xf32> to vector<64x1xf32>
    %cst_1 = arith.constant 3.200000e+01 : f32
    %3 = vector.broadcast %cst_1 : f32 to vector<64x1xf32>
    %4 = arith.divf %2, %3 : vector<64x1xf32>
    %5 = vector.broadcast %4 : vector<64x1xf32> to vector<64x32xf32>
    %6 = arith.subf %0, %5 : vector<64x32xf32>
    %7 = arith.mulf %6, %6 : vector<64x32xf32>
    %cst_2 = arith.constant dense<0.000000e+00> : vector<64xf32>
    %8 = vector.multi_reduction <add>, %7, %cst_2 [1] : vector<64x32xf32> to vector<64xf32>
    %9 = vector.shape_cast %8 : vector<64xf32> to vector<64x1xf32>
    %cst_3 = arith.constant 3.200000e+01 : f32
    %10 = vector.broadcast %cst_3 : f32 to vector<64x1xf32>
    %11 = arith.divf %9, %10 : vector<64x1xf32>
    %12 = vector.broadcast %4 : vector<64x1xf32> to vector<64x32xf32>
    %13 = arith.subf %0, %12 : vector<64x32xf32>
    %cst_4 = arith.constant 9.99999974E-6 : f32
    %14 = vector.broadcast %cst_4 : f32 to vector<64x1xf32>
    %15 = arith.addf %11, %14 : vector<64x1xf32>
    %16 = math.rsqrt %15 : vector<64x1xf32>
    %17 = vector.broadcast %16 : vector<64x1xf32> to vector<64x32xf32>
    %18 = arith.mulf %13, %17 : vector<64x32xf32>
    %c0_5 = arith.constant 0 : index
    %c0_6 = arith.constant 0 : index
    %19 = vector.load %arg2[%c0_5, %c0_6] : memref<1x32xf32, #tpu.memory_space<vmem>>, vector<1x32xf32>
    %20 = vector.broadcast %19 : vector<1x32xf32> to vector<64x32xf32>
    %21 = arith.mulf %18, %20 : vector<64x32xf32>
    %c0_7 = arith.constant 0 : index
    %c0_8 = arith.constant 0 : index
    %22 = vector.load %arg3[%c0_7, %c0_8] : memref<1x32xf32, #tpu.memory_space<vmem>>, vector<1x32xf32>
    %23 = vector.broadcast %22 : vector<1x32xf32> to vector<64x32xf32>
    %24 = arith.addf %21, %23 : vector<64x32xf32>
    %25 = arith.truncf %24 : vector<64x32xf32> to vector<64x32xbf16>
    %c0_9 = arith.constant 0 : index
    %c0_10 = arith.constant 0 : index
    %26 = vector.load %arg4[%c0_9, %c0_10] : memref<32x32xbf16, #tpu.memory_space<vmem>>, vector<32x32xbf16>
    %cst_11 = arith.constant dense<0.000000e+00> : vector<64x32xf32>
    %27 = tpu.matmul %25, %26, %cst_11 {dimension_numbers = #tpu.dot_dimension_numbers<[1], [0], [0], [1], [0, 0, 1, 1], [], []>} : vector<64x32xbf16>, vector<32x32xbf16>, vector<64x32xf32> -> vector<64x32xf32>
    %c0_12 = arith.constant 0 : index
    %c0_13 = arith.constant 0 : index
    %28 = vector.load %arg5[%c0_12, %c0_13] : memref<32x32xbf16, #tpu.memory_space<vmem>>, vector<32x32xbf16>
    %cst_14 = arith.constant dense<0.000000e+00> : vector<64x32xf32>
    %29 = tpu.matmul %25, %28, %cst_14 {dimension_numbers = #tpu.dot_dimension_numbers<[1], [0], [0], [1], [0, 0, 1, 1], [], []>} : vector<64x32xbf16>, vector<32x32xbf16>, vector<64x32xf32> -> vector<64x32xf32>
    %c0_15 = arith.constant 0 : index
    %c0_16 = arith.constant 0 : index
    %30 = vector.load %arg6[%c0_15, %c0_16] : memref<32x32xbf16, #tpu.memory_space<vmem>>, vector<32x32xbf16>
    %cst_17 = arith.constant dense<0.000000e+00> : vector<64x32xf32>
    %31 = tpu.matmul %25, %30, %cst_17 {dimension_numbers = #tpu.dot_dimension_numbers<[1], [0], [0], [1], [0, 0, 1, 1], [], []>} : vector<64x32xbf16>, vector<32x32xbf16>, vector<64x32xf32> -> vector<64x32xf32>
    %32 = arith.truncf %27 : vector<64x32xf32> to vector<64x32xbf16>
    %33 = arith.truncf %29 : vector<64x32xf32> to vector<64x32xbf16>
    %34 = arith.truncf %31 : vector<64x32xf32> to vector<64x32xbf16>
    %35 = tpu.iota {dimensions = array<i32: 0>} : vector<8x8xi32>
    %36 = tpu.iota {dimensions = array<i32: 1>} : vector<8x8xi32>
    %37 = arith.cmpi sle, %35, %36 : vector<8x8xi32>
    %38 = vector.extract_strided_slice %32 {offsets = [0, 0], sizes = [64, 8], strides = [1, 1]} : vector<64x32xbf16> to vector<64x8xbf16>
    %39 = vector.shape_cast %38 : vector<64x8xbf16> to vector<8x8x8xbf16>
    %40 = vector.extract_strided_slice %33 {offsets = [0, 0], sizes = [64, 8], strides = [1, 1]} : vector<64x32xbf16> to vector<64x8xbf16>
    %41 = vector.shape_cast %40 : vector<64x8xbf16> to vector<8x8x8xbf16>
    %42 = vector.extract_strided_slice %34 {offsets = [0, 0], sizes = [64, 8], strides = [1, 1]} : vector<64x32xbf16> to vector<64x8xbf16>
    %43 = vector.shape_cast %42 : vector<64x8xbf16> to vector<8x8x8xbf16>
    "tpu.trace_start"() <{level = 10 : i32, message = "sqd,skd->sqk"}> : () -> ()
    %cst_18 = arith.constant dense<0.000000e+00> : vector<8x8x8xf32>
    %44 = tpu.matmul %39, %41, %cst_18 {dimension_numbers = #tpu.dot_dimension_numbers<[2], [2], [1], [1], [0, 0, 0, 1, 1, 1], [0], [0]>} : vector<8x8x8xbf16>, vector<8x8x8xbf16>, vector<8x8x8xf32> -> vector<8x8x8xf32>
    %cst_19 = arith.constant 0xFF800000 : f32
    "tpu.trace_stop"() : () -> ()
    %45 = vector.shape_cast %37 : vector<8x8xi1> to vector<1x8x8xi1>
    %46 = vector.broadcast %45 : vector<1x8x8xi1> to vector<8x8x8xi1>
    %47 = vector.broadcast %cst_19 : f32 to vector<8x8x8xf32>
    %48 = arith.select %46, %44, %47 : vector<8x8x8xi1>, vector<8x8x8xf32>
    %cst_20 = arith.constant dense<0xFF800000> : vector<8x8xf32>
    %49 = vector.multi_reduction <maximumf>, %48, %cst_20 [1] : vector<8x8x8xf32> to vector<8x8xf32>
    %50 = vector.shape_cast %49 : vector<8x8xf32> to vector<8x1x8xf32>
    %51 = vector.broadcast %50 : vector<8x1x8xf32> to vector<8x8x8xf32>
    %52 = arith.subf %48, %51 : vector<8x8x8xf32>
    %53 = math.exp %52 : vector<8x8x8xf32>
    %cst_21 = arith.constant dense<0.000000e+00> : vector<8x8xf32>
    %54 = vector.multi_reduction <add>, %53, %cst_21 [1] : vector<8x8x8xf32> to vector<8x8xf32>
    %55 = vector.shape_cast %54 : vector<8x8xf32> to vector<8x1x8xf32>
    %56 = tpu.reciprocal %55 {approx = true} : vector<8x1x8xf32> -> vector<8x1x8xf32>
    %57 = vector.broadcast %56 : vector<8x1x8xf32> to vector<8x8x8xf32>
    %58 = arith.mulf %53, %57 : vector<8x8x8xf32>
    %59 = arith.truncf %58 : vector<8x8x8xf32> to vector<8x8x8xbf16>
    "tpu.trace_start"() <{level = 10 : i32, message = "sqk,skd->sqd"}> : () -> ()
    %cst_22 = arith.constant dense<0.000000e+00> : vector<8x8x8xf32>
    %60 = tpu.matmul %59, %43, %cst_22 {dimension_numbers = #tpu.dot_dimension_numbers<[2], [1], [1], [2], [0, 0, 0, 1, 1, 2], [0], [0]>} : vector<8x8x8xbf16>, vector<8x8x8xbf16>, vector<8x8x8xf32> -> vector<8x8x8xf32>
    "tpu.trace_stop"() : () -> ()
    %61 = tpu.transpose %55, [0, 2, 1] : vector<8x1x8xf32> -> vector<8x8x1xf32>
    %62 = vector.broadcast %61 : vector<8x8x1xf32> to vector<8x8x8xf32>
    %63 = arith.mulf %60, %62 : vector<8x8x8xf32>
    %64 = vector.shape_cast %63 : vector<8x8x8xf32> to vector<64x8xf32>
    %65 = vector.shape_cast %61 : vector<8x8x1xf32> to vector<64x1xf32>
    %66 = vector.extract_strided_slice %32 {offsets = [0, 8], sizes = [64, 8], strides = [1, 1]} : vector<64x32xbf16> to vector<64x8xbf16>
    %67 = vector.shape_cast %66 : vector<64x8xbf16> to vector<8x8x8xbf16>
    %68 = vector.extract_strided_slice %33 {offsets = [0, 8], sizes = [64, 8], strides = [1, 1]} : vector<64x32xbf16> to vector<64x8xbf16>
    %69 = vector.shape_cast %68 : vector<64x8xbf16> to vector<8x8x8xbf16>
    %70 = vector.extract_strided_slice %34 {offsets = [0, 8], sizes = [64, 8], strides = [1, 1]} : vector<64x32xbf16> to vector<64x8xbf16>
    %71 = vector.shape_cast %70 : vector<64x8xbf16> to vector<8x8x8xbf16>
    "tpu.trace_start"() <{level = 10 : i32, message = "sqd,skd->sqk"}> : () -> ()
    %cst_23 = arith.constant dense<0.000000e+00> : vector<8x8x8xf32>
    %72 = tpu.matmul %67, %69, %cst_23 {dimension_numbers = #tpu.dot_dimension_numbers<[2], [2], [1], [1], [0, 0, 0, 1, 1, 1], [0], [0]>} : vector<8x8x8xbf16>, vector<8x8x8xbf16>, vector<8x8x8xf32> -> vector<8x8x8xf32>
    %cst_24 = arith.constant 0xFF800000 : f32
    "tpu.trace_stop"() : () -> ()
    %73 = vector.shape_cast %37 : vector<8x8xi1> to vector<1x8x8xi1>
    %74 = vector.broadcast %73 : vector<1x8x8xi1> to vector<8x8x8xi1>
    %75 = vector.broadcast %cst_24 : f32 to vector<8x8x8xf32>
    %76 = arith.select %74, %72, %75 : vector<8x8x8xi1>, vector<8x8x8xf32>
    %cst_25 = arith.constant dense<0xFF800000> : vector<8x8xf32>
    %77 = vector.multi_reduction <maximumf>, %76, %cst_25 [1] : vector<8x8x8xf32> to vector<8x8xf32>
    %78 = vector.shape_cast %77 : vector<8x8xf32> to vector<8x1x8xf32>
    %79 = vector.broadcast %78 : vector<8x1x8xf32> to vector<8x8x8xf32>
    %80 = arith.subf %76, %79 : vector<8x8x8xf32>
    %81 = math.exp %80 : vector<8x8x8xf32>
    %cst_26 = arith.constant dense<0.000000e+00> : vector<8x8xf32>
    %82 = vector.multi_reduction <add>, %81, %cst_26 [1] : vector<8x8x8xf32> to vector<8x8xf32>
    %83 = vector.shape_cast %82 : vector<8x8xf32> to vector<8x1x8xf32>
    %84 = tpu.reciprocal %83 {approx = true} : vector<8x1x8xf32> -> vector<8x1x8xf32>
    %85 = vector.broadcast %84 : vector<8x1x8xf32> to vector<8x8x8xf32>
    %86 = arith.mulf %81, %85 : vector<8x8x8xf32>
    %87 = arith.truncf %86 : vector<8x8x8xf32> to vector<8x8x8xbf16>
    "tpu.trace_start"() <{level = 10 : i32, message = "sqk,skd->sqd"}> : () -> ()
    %cst_27 = arith.constant dense<0.000000e+00> : vector<8x8x8xf32>
    %88 = tpu.matmul %87, %71, %cst_27 {dimension_numbers = #tpu.dot_dimension_numbers<[2], [1], [1], [2], [0, 0, 0, 1, 1, 2], [0], [0]>} : vector<8x8x8xbf16>, vector<8x8x8xbf16>, vector<8x8x8xf32> -> vector<8x8x8xf32>
    "tpu.trace_stop"() : () -> ()
    %89 = tpu.transpose %83, [0, 2, 1] : vector<8x1x8xf32> -> vector<8x8x1xf32>
    %90 = vector.broadcast %89 : vector<8x8x1xf32> to vector<8x8x8xf32>
    %91 = arith.mulf %88, %90 : vector<8x8x8xf32>
    %92 = vector.shape_cast %91 : vector<8x8x8xf32> to vector<64x8xf32>
    %93 = vector.shape_cast %89 : vector<8x8x1xf32> to vector<64x1xf32>
    %94 = vector.extract_strided_slice %32 {offsets = [0, 16], sizes = [64, 8], strides = [1, 1]} : vector<64x32xbf16> to vector<64x8xbf16>
    %95 = vector.shape_cast %94 : vector<64x8xbf16> to vector<8x8x8xbf16>
    %96 = vector.extract_strided_slice %33 {offsets = [0, 16], sizes = [64, 8], strides = [1, 1]} : vector<64x32xbf16> to vector<64x8xbf16>
    %97 = vector.shape_cast %96 : vector<64x8xbf16> to vector<8x8x8xbf16>
    %98 = vector.extract_strided_slice %34 {offsets = [0, 16], sizes = [64, 8], strides = [1, 1]} : vector<64x32xbf16> to vector<64x8xbf16>
    %99 = vector.shape_cast %98 : vector<64x8xbf16> to vector<8x8x8xbf16>
    "tpu.trace_start"() <{level = 10 : i32, message = "sqd,skd->sqk"}> : () -> ()
    %cst_28 = arith.constant dense<0.000000e+00> : vector<8x8x8xf32>
    %100 = tpu.matmul %95, %97, %cst_28 {dimension_numbers = #tpu.dot_dimension_numbers<[2], [2], [1], [1], [0, 0, 0, 1, 1, 1], [0], [0]>} : vector<8x8x8xbf16>, vector<8x8x8xbf16>, vector<8x8x8xf32> -> vector<8x8x8xf32>
    %cst_29 = arith.constant 0xFF800000 : f32
    "tpu.trace_stop"() : () -> ()
    %101 = vector.shape_cast %37 : vector<8x8xi1> to vector<1x8x8xi1>
    %102 = vector.broadcast %101 : vector<1x8x8xi1> to vector<8x8x8xi1>
    %103 = vector.broadcast %cst_29 : f32 to vector<8x8x8xf32>
    %104 = arith.select %102, %100, %103 : vector<8x8x8xi1>, vector<8x8x8xf32>
    %cst_30 = arith.constant dense<0xFF800000> : vector<8x8xf32>
    %105 = vector.multi_reduction <maximumf>, %104, %cst_30 [1] : vector<8x8x8xf32> to vector<8x8xf32>
    %106 = vector.shape_cast %105 : vector<8x8xf32> to vector<8x1x8xf32>
    %107 = vector.broadcast %106 : vector<8x1x8xf32> to vector<8x8x8xf32>
    %108 = arith.subf %104, %107 : vector<8x8x8xf32>
    %109 = math.exp %108 : vector<8x8x8xf32>
    %cst_31 = arith.constant dense<0.000000e+00> : vector<8x8xf32>
    %110 = vector.multi_reduction <add>, %109, %cst_31 [1] : vector<8x8x8xf32> to vector<8x8xf32>
    %111 = vector.shape_cast %110 : vector<8x8xf32> to vector<8x1x8xf32>
    %112 = tpu.reciprocal %111 {approx = true} : vector<8x1x8xf32> -> vector<8x1x8xf32>
    %113 = vector.broadcast %112 : vector<8x1x8xf32> to vector<8x8x8xf32>
    %114 = arith.mulf %109, %113 : vector<8x8x8xf32>
    %115 = arith.truncf %114 : vector<8x8x8xf32> to vector<8x8x8xbf16>
    "tpu.trace_start"() <{level = 10 : i32, message = "sqk,skd->sqd"}> : () -> ()
    %cst_32 = arith.constant dense<0.000000e+00> : vector<8x8x8xf32>
    %116 = tpu.matmul %115, %99, %cst_32 {dimension_numbers = #tpu.dot_dimension_numbers<[2], [1], [1], [2], [0, 0, 0, 1, 1, 2], [0], [0]>} : vector<8x8x8xbf16>, vector<8x8x8xbf16>, vector<8x8x8xf32> -> vector<8x8x8xf32>
    "tpu.trace_stop"() : () -> ()
    %117 = tpu.transpose %111, [0, 2, 1] : vector<8x1x8xf32> -> vector<8x8x1xf32>
    %118 = vector.broadcast %117 : vector<8x8x1xf32> to vector<8x8x8xf32>
    %119 = arith.mulf %116, %118 : vector<8x8x8xf32>
    %120 = vector.shape_cast %119 : vector<8x8x8xf32> to vector<64x8xf32>
    %121 = vector.shape_cast %117 : vector<8x8x1xf32> to vector<64x1xf32>
    %122 = vector.extract_strided_slice %32 {offsets = [0, 24], sizes = [64, 8], strides = [1, 1]} : vector<64x32xbf16> to vector<64x8xbf16>
    %123 = vector.shape_cast %122 : vector<64x8xbf16> to vector<8x8x8xbf16>
    %124 = vector.extract_strided_slice %33 {offsets = [0, 24], sizes = [64, 8], strides = [1, 1]} : vector<64x32xbf16> to vector<64x8xbf16>
    %125 = vector.shape_cast %124 : vector<64x8xbf16> to vector<8x8x8xbf16>
    %126 = vector.extract_strided_slice %34 {offsets = [0, 24], sizes = [64, 8], strides = [1, 1]} : vector<64x32xbf16> to vector<64x8xbf16>
    %127 = vector.shape_cast %126 : vector<64x8xbf16> to vector<8x8x8xbf16>
    "tpu.trace_start"() <{level = 10 : i32, message = "sqd,skd->sqk"}> : () -> ()
    %cst_33 = arith.constant dense<0.000000e+00> : vector<8x8x8xf32>
    %128 = tpu.matmul %123, %125, %cst_33 {dimension_numbers = #tpu.dot_dimension_numbers<[2], [2], [1], [1], [0, 0, 0, 1, 1, 1], [0], [0]>} : vector<8x8x8xbf16>, vector<8x8x8xbf16>, vector<8x8x8xf32> -> vector<8x8x8xf32>
    %cst_34 = arith.constant 0xFF800000 : f32
    "tpu.trace_stop"() : () -> ()
    %129 = vector.shape_cast %37 : vector<8x8xi1> to vector<1x8x8xi1>
    %130 = vector.broadcast %129 : vector<1x8x8xi1> to vector<8x8x8xi1>
    %131 = vector.broadcast %cst_34 : f32 to vector<8x8x8xf32>
    %132 = arith.select %130, %128, %131 : vector<8x8x8xi1>, vector<8x8x8xf32>
    %cst_35 = arith.constant dense<0xFF800000> : vector<8x8xf32>
    %133 = vector.multi_reduction <maximumf>, %132, %cst_35 [1] : vector<8x8x8xf32> to vector<8x8xf32>
    %134 = vector.shape_cast %133 : vector<8x8xf32> to vector<8x1x8xf32>
    %135 = vector.broadcast %134 : vector<8x1x8xf32> to vector<8x8x8xf32>
    %136 = arith.subf %132, %135 : vector<8x8x8xf32>
    %137 = math.exp %136 : vector<8x8x8xf32>
    %cst_36 = arith.constant dense<0.000000e+00> : vector<8x8xf32>
    %138 = vector.multi_reduction <add>, %137, %cst_36 [1] : vector<8x8x8xf32> to vector<8x8xf32>
    %139 = vector.shape_cast %138 : vector<8x8xf32> to vector<8x1x8xf32>
    %140 = tpu.reciprocal %139 {approx = true} : vector<8x1x8xf32> -> vector<8x1x8xf32>
    %141 = vector.broadcast %140 : vector<8x1x8xf32> to vector<8x8x8xf32>
    %142 = arith.mulf %137, %141 : vector<8x8x8xf32>
    %143 = arith.truncf %142 : vector<8x8x8xf32> to vector<8x8x8xbf16>
    "tpu.trace_start"() <{level = 10 : i32, message = "sqk,skd->sqd"}> : () -> ()
    %cst_37 = arith.constant dense<0.000000e+00> : vector<8x8x8xf32>
    %144 = tpu.matmul %143, %127, %cst_37 {dimension_numbers = #tpu.dot_dimension_numbers<[2], [1], [1], [2], [0, 0, 0, 1, 1, 2], [0], [0]>} : vector<8x8x8xbf16>, vector<8x8x8xbf16>, vector<8x8x8xf32> -> vector<8x8x8xf32>
    "tpu.trace_stop"() : () -> ()
    %145 = tpu.transpose %139, [0, 2, 1] : vector<8x1x8xf32> -> vector<8x8x1xf32>
    %146 = vector.broadcast %145 : vector<8x8x1xf32> to vector<8x8x8xf32>
    %147 = arith.mulf %144, %146 : vector<8x8x8xf32>
    %148 = vector.shape_cast %147 : vector<8x8x8xf32> to vector<64x8xf32>
    %149 = vector.shape_cast %145 : vector<8x8x1xf32> to vector<64x1xf32>
    %150 = tpu.concatenate %64, %92, %120, %148 in 1 : vector<64x8xf32>, vector<64x8xf32>, vector<64x8xf32>, vector<64x8xf32> -> vector<64x32xf32>
    %c0_38 = arith.constant 0 : index
    %c0_39 = arith.constant 0 : index
    %151 = vector.load %arg7[%c0_38, %c0_39] : memref<64x32xf32, #tpu.memory_space<vmem>>, vector<64x32xf32>
    tpu.vector_store %arg7[%c0_38, %c0_39], %150 {strides = array<i32>} : memref<64x32xf32, #tpu.memory_space<vmem>>, vector<64x32xf32>,
    %152 = tpu.concatenate %65, %93, %121, %149 in 1 : vector<64x1xf32>, vector<64x1xf32>, vector<64x1xf32>, vector<64x1xf32> -> vector<64x4xf32>
    %cst_40 = arith.constant 0.000000e+00 : f32
    %153 = vector.broadcast %cst_40 : f32 to vector<64x124xf32>
    %154 = tpu.concatenate %152, %153 in 1 : vector<64x4xf32>, vector<64x124xf32> -> vector<64x128xf32>
    %c0_41 = arith.constant 0 : index
    %c0_42 = arith.constant 0 : index
    %155 = vector.load %arg8[%c0_41, %c0_42] : memref<64x128xf32, #tpu.memory_space<vmem>>, vector<64x128xf32>
    tpu.vector_store %arg8[%c0_41, %c0_42], %154 {strides = array<i32>} : memref<64x128xf32, #tpu.memory_space<vmem>>, vector<64x128xf32>,
    return
  }
  func.func @transform_0(%arg0: i32) -> (i32, i32) {
    %c0_i32 = arith.constant 0 : i32
    %c0_i32_0 = arith.constant 0 : i32
    return %arg0, %c0_i32 : i32, i32
  }
  func.func @transform_1(%arg0: i32) -> (i32, i32) {
    %c0_i32 = arith.constant 0 : i32
    %c0_i32_0 = arith.constant 0 : i32
    %c0_i32_1 = arith.constant 0 : i32
    return %c0_i32, %c0_i32_0 : i32, i32
  }
  func.func @transform_2(%arg0: i32) -> (i32, i32) {
    %c0_i32 = arith.constant 0 : i32
    %c0_i32_0 = arith.constant 0 : i32
    %c0_i32_1 = arith.constant 0 : i32
    return %c0_i32, %c0_i32_0 : i32, i32
  }
  func.func @transform_3(%arg0: i32) -> (i32, i32) {
    %c0_i32 = arith.constant 0 : i32
    %c0_i32_0 = arith.constant 0 : i32
    %c0_i32_1 = arith.constant 0 : i32
    return %c0_i32, %c0_i32_0 : i32, i32
  }
  func.func @transform_4(%arg0: i32) -> (i32, i32) {
    %c0_i32 = arith.constant 0 : i32
    %c0_i32_0 = arith.constant 0 : i32
    %c0_i32_1 = arith.constant 0 : i32
    return %c0_i32, %c0_i32_0 : i32, i32
  }
  func.func @transform_5(%arg0: i32) -> (i32, i32) {
    %c0_i32 = arith.constant 0 : i32
    %c0_i32_0 = arith.constant 0 : i32
    %c0_i32_1 = arith.constant 0 : i32
    return %c0_i32, %c0_i32_0 : i32, i32
  }
  func.func @transform_6(%arg0: i32) -> (i32, i32) {
    %c0_i32 = arith.constant 0 : i32
    %c0_i32_0 = arith.constant 0 : i32
    return %arg0, %c0_i32 : i32, i32
  }
  func.func @transform_7(%arg0: i32) -> (i32, i32) {
    %c0_i32 = arith.constant 0 : i32
    %c0_i32_0 = arith.constant 0 : i32
    return %arg0, %c0_i32 : i32, i32
  }
}

module attributes {stable_mosaic.version = 11 : i64} {
  func.func @_attn_kernel(%arg0: i32, %arg1: memref<32x32xf32, #tpu.memory_space<vmem>>, %arg2: memref<1x32xf32, #tpu.memory_space<vmem>>, %arg3: memref<1x32xf32, #tpu.memory_space<vmem>>, %arg4: memref<32x32xbf16, #tpu.memory_space<vmem>>, %arg5: memref<32x32xbf16, #tpu.memory_space<vmem>>, %arg6: memref<32x32xbf16, #tpu.memory_space<vmem>>, %arg7: memref<32x32xf32, #tpu.memory_space<vmem>>, %arg8: memref<32x128xf32, #tpu.memory_space<vmem>>) attributes {dimension_semantics = [#tpu.dimension_semantics<parallel>], iteration_bounds = array<i64: 1>, scalar_prefetch = 0 : i64, scratch_operands = 0 : i64, tpu.core_type = #tpu.core_type<tc>, window_params = [{transform_indices = @transform_0, window_bounds = array<i64: 32, 32>}, {pipeline_mode = #tpu.pipeline_mode<synchronous>, transform_indices = @transform_1, window_bounds = array<i64: 1, 32>}, {pipeline_mode = #tpu.pipeline_mode<synchronous>, transform_indices = @transform_2, window_bounds = array<i64: 1, 32>}, {pipeline_mode = #tpu.pipeline_mode<synchronous>, transform_indices = @transform_3, window_bounds = array<i64: 32, 32>}, {pipeline_mode = #tpu.pipeline_mode<synchronous>, transform_indices = @transform_4, window_bounds = array<i64: 32, 32>}, {pipeline_mode = #tpu.pipeline_mode<synchronous>, transform_indices = @transform_5, window_bounds = array<i64: 32, 32>}, {transform_indices = @transform_6, window_bounds = array<i64: 32, 32>}, {transform_indices = @transform_7, window_bounds = array<i64: 32, 128>}]} {
    %c0 = arith.constant 0 : index
    %c0_0 = arith.constant 0 : index
    %0 = vector.load %arg1[%c0, %c0_0] : memref<32x32xf32, #tpu.memory_space<vmem>>, vector<32x32xf32>
    %cst = arith.constant dense<0.000000e+00> : vector<32xf32>
    %1 = vector.multi_reduction <add>, %0, %cst [1] : vector<32x32xf32> to vector<32xf32>
    %2 = vector.shape_cast %1 : vector<32xf32> to vector<32x1xf32>
    %cst_1 = arith.constant 3.200000e+01 : f32
    %3 = vector.broadcast %cst_1 : f32 to vector<32x1xf32>
    %4 = arith.divf %2, %3 : vector<32x1xf32>
    %5 = vector.broadcast %4 : vector<32x1xf32> to vector<32x32xf32>
    %6 = arith.subf %0, %5 : vector<32x32xf32>
    %7 = arith.mulf %6, %6 : vector<32x32xf32>
    %cst_2 = arith.constant dense<0.000000e+00> : vector<32xf32>
    %8 = vector.multi_reduction <add>, %7, %cst_2 [1] : vector<32x32xf32> to vector<32xf32>
    %9 = vector.shape_cast %8 : vector<32xf32> to vector<32x1xf32>
    %cst_3 = arith.constant 3.200000e+01 : f32
    %10 = vector.broadcast %cst_3 : f32 to vector<32x1xf32>
    %11 = arith.divf %9, %10 : vector<32x1xf32>
    %12 = vector.broadcast %4 : vector<32x1xf32> to vector<32x32xf32>
    %13 = arith.subf %0, %12 : vector<32x32xf32>
    %cst_4 = arith.constant 9.99999974E-6 : f32
    %14 = vector.broadcast %cst_4 : f32 to vector<32x1xf32>
    %15 = arith.addf %11, %14 : vector<32x1xf32>
    %16 = math.rsqrt %15 : vector<32x1xf32>
    %17 = vector.broadcast %16 : vector<32x1xf32> to vector<32x32xf32>
    %18 = arith.mulf %13, %17 : vector<32x32xf32>
    %c0_5 = arith.constant 0 : index
    %c0_6 = arith.constant 0 : index
    %19 = vector.load %arg2[%c0_5, %c0_6] : memref<1x32xf32, #tpu.memory_space<vmem>>, vector<1x32xf32>
    %20 = vector.broadcast %19 : vector<1x32xf32> to vector<32x32xf32>
    %21 = arith.mulf %18, %20 : vector<32x32xf32>
    %c0_7 = arith.constant 0 : index
    %c0_8 = arith.constant 0 : index
    %22 = vector.load %arg3[%c0_7, %c0_8] : memref<1x32xf32, #tpu.memory_space<vmem>>, vector<1x32xf32>
    %23 = vector.broadcast %22 : vector<1x32xf32> to vector<32x32xf32>
    %24 = arith.addf %21, %23 : vector<32x32xf32>
    %25 = arith.truncf %24 : vector<32x32xf32> to vector<32x32xbf16>
    %c0_9 = arith.constant 0 : index
    %c0_10 = arith.constant 0 : index
    %26 = vector.load %arg4[%c0_9, %c0_10] : memref<32x32xbf16, #tpu.memory_space<vmem>>, vector<32x32xbf16>
    %cst_11 = arith.constant dense<0.000000e+00> : vector<32x32xf32>
    %27 = tpu.matmul %25, %26, %cst_11 {dimension_numbers = #tpu.dot_dimension_numbers<[1], [0], [0], [1], [0, 0, 1, 1], [], []>} : vector<32x32xbf16>, vector<32x32xbf16>, vector<32x32xf32> -> vector<32x32xf32>
    %c0_12 = arith.constant 0 : index
    %c0_13 = arith.constant 0 : index
    %28 = vector.load %arg5[%c0_12, %c0_13] : memref<32x32xbf16, #tpu.memory_space<vmem>>, vector<32x32xbf16>
    %cst_14 = arith.constant dense<0.000000e+00> : vector<32x32xf32>
    %29 = tpu.matmul %25, %28, %cst_14 {dimension_numbers = #tpu.dot_dimension_numbers<[1], [0], [0], [1], [0, 0, 1, 1], [], []>} : vector<32x32xbf16>, vector<32x32xbf16>, vector<32x32xf32> -> vector<32x32xf32>
    %c0_15 = arith.constant 0 : index
    %c0_16 = arith.constant 0 : index
    %30 = vector.load %arg6[%c0_15, %c0_16] : memref<32x32xbf16, #tpu.memory_space<vmem>>, vector<32x32xbf16>
    %cst_17 = arith.constant dense<0.000000e+00> : vector<32x32xf32>
    %31 = tpu.matmul %25, %30, %cst_17 {dimension_numbers = #tpu.dot_dimension_numbers<[1], [0], [0], [1], [0, 0, 1, 1], [], []>} : vector<32x32xbf16>, vector<32x32xbf16>, vector<32x32xf32> -> vector<32x32xf32>
    %32 = arith.truncf %27 : vector<32x32xf32> to vector<32x32xbf16>
    %33 = arith.truncf %29 : vector<32x32xf32> to vector<32x32xbf16>
    %34 = arith.truncf %31 : vector<32x32xf32> to vector<32x32xbf16>
    %35 = tpu.iota {dimensions = array<i32: 0>} : vector<8x8xi32>
    %36 = tpu.iota {dimensions = array<i32: 1>} : vector<8x8xi32>
    %37 = arith.cmpi sle, %35, %36 : vector<8x8xi32>
    %38 = vector.extract_strided_slice %32 {offsets = [0, 0], sizes = [32, 8], strides = [1, 1]} : vector<32x32xbf16> to vector<32x8xbf16>
    %39 = vector.shape_cast %38 : vector<32x8xbf16> to vector<4x8x8xbf16>
    %40 = vector.extract_strided_slice %33 {offsets = [0, 0], sizes = [32, 8], strides = [1, 1]} : vector<32x32xbf16> to vector<32x8xbf16>
    %41 = vector.shape_cast %40 : vector<32x8xbf16> to vector<4x8x8xbf16>
    %42 = vector.extract_strided_slice %34 {offsets = [0, 0], sizes = [32, 8], strides = [1, 1]} : vector<32x32xbf16> to vector<32x8xbf16>
    %43 = vector.shape_cast %42 : vector<32x8xbf16> to vector<4x8x8xbf16>
    "tpu.trace_start"() <{level = 10 : i32, message = "sqd,skd->sqk"}> : () -> ()
    %cst_18 = arith.constant dense<0.000000e+00> : vector<4x8x8xf32>
    %44 = tpu.matmul %39, %41, %cst_18 {dimension_numbers = #tpu.dot_dimension_numbers<[2], [2], [1], [1], [0, 0, 0, 1, 1, 1], [0], [0]>} : vector<4x8x8xbf16>, vector<4x8x8xbf16>, vector<4x8x8xf32> -> vector<4x8x8xf32>
    %cst_19 = arith.constant 0xFF800000 : f32
    "tpu.trace_stop"() : () -> ()
    %45 = vector.shape_cast %37 : vector<8x8xi1> to vector<1x8x8xi1>
    %46 = vector.broadcast %45 : vector<1x8x8xi1> to vector<4x8x8xi1>
    %47 = vector.broadcast %cst_19 : f32 to vector<4x8x8xf32>
    %48 = arith.select %46, %44, %47 : vector<4x8x8xi1>, vector<4x8x8xf32>
    %cst_20 = arith.constant dense<0xFF800000> : vector<4x8xf32>
    %49 = vector.multi_reduction <maximumf>, %48, %cst_20 [1] : vector<4x8x8xf32> to vector<4x8xf32>
    %50 = vector.shape_cast %49 : vector<4x8xf32> to vector<4x1x8xf32>
    %51 = vector.broadcast %50 : vector<4x1x8xf32> to vector<4x8x8xf32>
    %52 = arith.subf %48, %51 : vector<4x8x8xf32>
    %53 = math.exp %52 : vector<4x8x8xf32>
    %cst_21 = arith.constant dense<0.000000e+00> : vector<4x8xf32>
    %54 = vector.multi_reduction <add>, %53, %cst_21 [1] : vector<4x8x8xf32> to vector<4x8xf32>
    %55 = vector.shape_cast %54 : vector<4x8xf32> to vector<4x1x8xf32>
    %56 = tpu.reciprocal %55 {approx = true} : vector<4x1x8xf32> -> vector<4x1x8xf32>
    %57 = vector.broadcast %56 : vector<4x1x8xf32> to vector<4x8x8xf32>
    %58 = arith.mulf %53, %57 : vector<4x8x8xf32>
    %59 = arith.truncf %58 : vector<4x8x8xf32> to vector<4x8x8xbf16>
    "tpu.trace_start"() <{level = 10 : i32, message = "sqk,skd->sqd"}> : () -> ()
    %cst_22 = arith.constant dense<0.000000e+00> : vector<4x8x8xf32>
    %60 = tpu.matmul %59, %43, %cst_22 {dimension_numbers = #tpu.dot_dimension_numbers<[2], [1], [1], [2], [0, 0, 0, 1, 1, 2], [0], [0]>} : vector<4x8x8xbf16>, vector<4x8x8xbf16>, vector<4x8x8xf32> -> vector<4x8x8xf32>
    "tpu.trace_stop"() : () -> ()
    %61 = tpu.transpose %55, [0, 2, 1] : vector<4x1x8xf32> -> vector<4x8x1xf32>
    %62 = vector.broadcast %61 : vector<4x8x1xf32> to vector<4x8x8xf32>
    %63 = arith.mulf %60, %62 : vector<4x8x8xf32>
    %64 = vector.shape_cast %63 : vector<4x8x8xf32> to vector<32x8xf32>
    %65 = vector.shape_cast %61 : vector<4x8x1xf32> to vector<32x1xf32>
    %66 = vector.extract_strided_slice %32 {offsets = [0, 8], sizes = [32, 8], strides = [1, 1]} : vector<32x32xbf16> to vector<32x8xbf16>
    %67 = vector.shape_cast %66 : vector<32x8xbf16> to vector<4x8x8xbf16>
    %68 = vector.extract_strided_slice %33 {offsets = [0, 8], sizes = [32, 8], strides = [1, 1]} : vector<32x32xbf16> to vector<32x8xbf16>
    %69 = vector.shape_cast %68 : vector<32x8xbf16> to vector<4x8x8xbf16>
    %70 = vector.extract_strided_slice %34 {offsets = [0, 8], sizes = [32, 8], strides = [1, 1]} : vector<32x32xbf16> to vector<32x8xbf16>
    %71 = vector.shape_cast %70 : vector<32x8xbf16> to vector<4x8x8xbf16>
    "tpu.trace_start"() <{level = 10 : i32, message = "sqd,skd->sqk"}> : () -> ()
    %cst_23 = arith.constant dense<0.000000e+00> : vector<4x8x8xf32>
    %72 = tpu.matmul %67, %69, %cst_23 {dimension_numbers = #tpu.dot_dimension_numbers<[2], [2], [1], [1], [0, 0, 0, 1, 1, 1], [0], [0]>} : vector<4x8x8xbf16>, vector<4x8x8xbf16>, vector<4x8x8xf32> -> vector<4x8x8xf32>
    %cst_24 = arith.constant 0xFF800000 : f32
    "tpu.trace_stop"() : () -> ()
    %73 = vector.shape_cast %37 : vector<8x8xi1> to vector<1x8x8xi1>
    %74 = vector.broadcast %73 : vector<1x8x8xi1> to vector<4x8x8xi1>
    %75 = vector.broadcast %cst_24 : f32 to vector<4x8x8xf32>
    %76 = arith.select %74, %72, %75 : vector<4x8x8xi1>, vector<4x8x8xf32>
    %cst_25 = arith.constant dense<0xFF800000> : vector<4x8xf32>
    %77 = vector.multi_reduction <maximumf>, %76, %cst_25 [1] : vector<4x8x8xf32> to vector<4x8xf32>
    %78 = vector.shape_cast %77 : vector<4x8xf32> to vector<4x1x8xf32>
    %79 = vector.broadcast %78 : vector<4x1x8xf32> to vector<4x8x8xf32>
    %80 = arith.subf %76, %79 : vector<4x8x8xf32>
    %81 = math.exp %80 : vector<4x8x8xf32>
    %cst_26 = arith.constant dense<0.000000e+00> : vector<4x8xf32>
    %82 = vector.multi_reduction <add>, %81, %cst_26 [1] : vector<4x8x8xf32> to vector<4x8xf32>
    %83 = vector.shape_cast %82 : vector<4x8xf32> to vector<4x1x8xf32>
    %84 = tpu.reciprocal %83 {approx = true} : vector<4x1x8xf32> -> vector<4x1x8xf32>
    %85 = vector.broadcast %84 : vector<4x1x8xf32> to vector<4x8x8xf32>
    %86 = arith.mulf %81, %85 : vector<4x8x8xf32>
    %87 = arith.truncf %86 : vector<4x8x8xf32> to vector<4x8x8xbf16>
    "tpu.trace_start"() <{level = 10 : i32, message = "sqk,skd->sqd"}> : () -> ()
    %cst_27 = arith.constant dense<0.000000e+00> : vector<4x8x8xf32>
    %88 = tpu.matmul %87, %71, %cst_27 {dimension_numbers = #tpu.dot_dimension_numbers<[2], [1], [1], [2], [0, 0, 0, 1, 1, 2], [0], [0]>} : vector<4x8x8xbf16>, vector<4x8x8xbf16>, vector<4x8x8xf32> -> vector<4x8x8xf32>
    "tpu.trace_stop"() : () -> ()
    %89 = tpu.transpose %83, [0, 2, 1] : vector<4x1x8xf32> -> vector<4x8x1xf32>
    %90 = vector.broadcast %89 : vector<4x8x1xf32> to vector<4x8x8xf32>
    %91 = arith.mulf %88, %90 : vector<4x8x8xf32>
    %92 = vector.shape_cast %91 : vector<4x8x8xf32> to vector<32x8xf32>
    %93 = vector.shape_cast %89 : vector<4x8x1xf32> to vector<32x1xf32>
    %94 = vector.extract_strided_slice %32 {offsets = [0, 16], sizes = [32, 8], strides = [1, 1]} : vector<32x32xbf16> to vector<32x8xbf16>
    %95 = vector.shape_cast %94 : vector<32x8xbf16> to vector<4x8x8xbf16>
    %96 = vector.extract_strided_slice %33 {offsets = [0, 16], sizes = [32, 8], strides = [1, 1]} : vector<32x32xbf16> to vector<32x8xbf16>
    %97 = vector.shape_cast %96 : vector<32x8xbf16> to vector<4x8x8xbf16>
    %98 = vector.extract_strided_slice %34 {offsets = [0, 16], sizes = [32, 8], strides = [1, 1]} : vector<32x32xbf16> to vector<32x8xbf16>
    %99 = vector.shape_cast %98 : vector<32x8xbf16> to vector<4x8x8xbf16>
    "tpu.trace_start"() <{level = 10 : i32, message = "sqd,skd->sqk"}> : () -> ()
    %cst_28 = arith.constant dense<0.000000e+00> : vector<4x8x8xf32>
    %100 = tpu.matmul %95, %97, %cst_28 {dimension_numbers = #tpu.dot_dimension_numbers<[2], [2], [1], [1], [0, 0, 0, 1, 1, 1], [0], [0]>} : vector<4x8x8xbf16>, vector<4x8x8xbf16>, vector<4x8x8xf32> -> vector<4x8x8xf32>
    %cst_29 = arith.constant 0xFF800000 : f32
    "tpu.trace_stop"() : () -> ()
    %101 = vector.shape_cast %37 : vector<8x8xi1> to vector<1x8x8xi1>
    %102 = vector.broadcast %101 : vector<1x8x8xi1> to vector<4x8x8xi1>
    %103 = vector.broadcast %cst_29 : f32 to vector<4x8x8xf32>
    %104 = arith.select %102, %100, %103 : vector<4x8x8xi1>, vector<4x8x8xf32>
    %cst_30 = arith.constant dense<0xFF800000> : vector<4x8xf32>
    %105 = vector.multi_reduction <maximumf>, %104, %cst_30 [1] : vector<4x8x8xf32> to vector<4x8xf32>
    %106 = vector.shape_cast %105 : vector<4x8xf32> to vector<4x1x8xf32>
    %107 = vector.broadcast %106 : vector<4x1x8xf32> to vector<4x8x8xf32>
    %108 = arith.subf %104, %107 : vector<4x8x8xf32>
    %109 = math.exp %108 : vector<4x8x8xf32>
    %cst_31 = arith.constant dense<0.000000e+00> : vector<4x8xf32>
    %110 = vector.multi_reduction <add>, %109, %cst_31 [1] : vector<4x8x8xf32> to vector<4x8xf32>
    %111 = vector.shape_cast %110 : vector<4x8xf32> to vector<4x1x8xf32>
    %112 = tpu.reciprocal %111 {approx = true} : vector<4x1x8xf32> -> vector<4x1x8xf32>
    %113 = vector.broadcast %112 : vector<4x1x8xf32> to vector<4x8x8xf32>
    %114 = arith.mulf %109, %113 : vector<4x8x8xf32>
    %115 = arith.truncf %114 : vector<4x8x8xf32> to vector<4x8x8xbf16>
    "tpu.trace_start"() <{level = 10 : i32, message = "sqk,skd->sqd"}> : () -> ()
    %cst_32 = arith.constant dense<0.000000e+00> : vector<4x8x8xf32>
    %116 = tpu.matmul %115, %99, %cst_32 {dimension_numbers = #tpu.dot_dimension_numbers<[2], [1], [1], [2], [0, 0, 0, 1, 1, 2], [0], [0]>} : vector<4x8x8xbf16>, vector<4x8x8xbf16>, vector<4x8x8xf32> -> vector<4x8x8xf32>
    "tpu.trace_stop"() : () -> ()
    %117 = tpu.transpose %111, [0, 2, 1] : vector<4x1x8xf32> -> vector<4x8x1xf32>
    %118 = vector.broadcast %117 : vector<4x8x1xf32> to vector<4x8x8xf32>
    %119 = arith.mulf %116, %118 : vector<4x8x8xf32>
    %120 = vector.shape_cast %119 : vector<4x8x8xf32> to vector<32x8xf32>
    %121 = vector.shape_cast %117 : vector<4x8x1xf32> to vector<32x1xf32>
    %122 = vector.extract_strided_slice %32 {offsets = [0, 24], sizes = [32, 8], strides = [1, 1]} : vector<32x32xbf16> to vector<32x8xbf16>
    %123 = vector.shape_cast %122 : vector<32x8xbf16> to vector<4x8x8xbf16>
    %124 = vector.extract_strided_slice %33 {offsets = [0, 24], sizes = [32, 8], strides = [1, 1]} : vector<32x32xbf16> to vector<32x8xbf16>
    %125 = vector.shape_cast %124 : vector<32x8xbf16> to vector<4x8x8xbf16>
    %126 = vector.extract_strided_slice %34 {offsets = [0, 24], sizes = [32, 8], strides = [1, 1]} : vector<32x32xbf16> to vector<32x8xbf16>
    %127 = vector.shape_cast %126 : vector<32x8xbf16> to vector<4x8x8xbf16>
    "tpu.trace_start"() <{level = 10 : i32, message = "sqd,skd->sqk"}> : () -> ()
    %cst_33 = arith.constant dense<0.000000e+00> : vector<4x8x8xf32>
    %128 = tpu.matmul %123, %125, %cst_33 {dimension_numbers = #tpu.dot_dimension_numbers<[2], [2], [1], [1], [0, 0, 0, 1, 1, 1], [0], [0]>} : vector<4x8x8xbf16>, vector<4x8x8xbf16>, vector<4x8x8xf32> -> vector<4x8x8xf32>
    %cst_34 = arith.constant 0xFF800000 : f32
    "tpu.trace_stop"() : () -> ()
    %129 = vector.shape_cast %37 : vector<8x8xi1> to vector<1x8x8xi1>
    %130 = vector.broadcast %129 : vector<1x8x8xi1> to vector<4x8x8xi1>
    %131 = vector.broadcast %cst_34 : f32 to vector<4x8x8xf32>
    %132 = arith.select %130, %128, %131 : vector<4x8x8xi1>, vector<4x8x8xf32>
    %cst_35 = arith.constant dense<0xFF800000> : vector<4x8xf32>
    %133 = vector.multi_reduction <maximumf>, %132, %cst_35 [1] : vector<4x8x8xf32> to vector<4x8xf32>
    %134 = vector.shape_cast %133 : vector<4x8xf32> to vector<4x1x8xf32>
    %135 = vector.broadcast %134 : vector<4x1x8xf32> to vector<4x8x8xf32>
    %136 = arith.subf %132, %135 : vector<4x8x8xf32>
    %137 = math.exp %136 : vector<4x8x8xf32>
    %cst_36 = arith.constant dense<0.000000e+00> : vector<4x8xf32>
    %138 = vector.multi_reduction <add>, %137, %cst_36 [1] : vector<4x8x8xf32> to vector<4x8xf32>
    %139 = vector.shape_cast %138 : vector<4x8xf32> to vector<4x1x8xf32>
    %140 = tpu.reciprocal %139 {approx = true} : vector<4x1x8xf32> -> vector<4x1x8xf32>
    %141 = vector.broadcast %140 : vector<4x1x8xf32> to vector<4x8x8xf32>
    %142 = arith.mulf %137, %141 : vector<4x8x8xf32>
    %143 = arith.truncf %142 : vector<4x8x8xf32> to vector<4x8x8xbf16>
    "tpu.trace_start"() <{level = 10 : i32, message = "sqk,skd->sqd"}> : () -> ()
    %cst_37 = arith.constant dense<0.000000e+00> : vector<4x8x8xf32>
    %144 = tpu.matmul %143, %127, %cst_37 {dimension_numbers = #tpu.dot_dimension_numbers<[2], [1], [1], [2], [0, 0, 0, 1, 1, 2], [0], [0]>} : vector<4x8x8xbf16>, vector<4x8x8xbf16>, vector<4x8x8xf32> -> vector<4x8x8xf32>
    "tpu.trace_stop"() : () -> ()
    %145 = tpu.transpose %139, [0, 2, 1] : vector<4x1x8xf32> -> vector<4x8x1xf32>
    %146 = vector.broadcast %145 : vector<4x8x1xf32> to vector<4x8x8xf32>
    %147 = arith.mulf %144, %146 : vector<4x8x8xf32>
    %148 = vector.shape_cast %147 : vector<4x8x8xf32> to vector<32x8xf32>
    %149 = vector.shape_cast %145 : vector<4x8x1xf32> to vector<32x1xf32>
    %150 = tpu.concatenate %64, %92, %120, %148 in 1 : vector<32x8xf32>, vector<32x8xf32>, vector<32x8xf32>, vector<32x8xf32> -> vector<32x32xf32>
    %c0_38 = arith.constant 0 : index
    %c0_39 = arith.constant 0 : index
    %151 = vector.load %arg7[%c0_38, %c0_39] : memref<32x32xf32, #tpu.memory_space<vmem>>, vector<32x32xf32>
    tpu.vector_store %arg7[%c0_38, %c0_39], %150 {strides = array<i32>} : memref<32x32xf32, #tpu.memory_space<vmem>>, vector<32x32xf32>,
    %152 = tpu.concatenate %65, %93, %121, %149 in 1 : vector<32x1xf32>, vector<32x1xf32>, vector<32x1xf32>, vector<32x1xf32> -> vector<32x4xf32>
    %cst_40 = arith.constant 0.000000e+00 : f32
    %153 = vector.broadcast %cst_40 : f32 to vector<32x124xf32>
    %154 = tpu.concatenate %152, %153 in 1 : vector<32x4xf32>, vector<32x124xf32> -> vector<32x128xf32>
    %c0_41 = arith.constant 0 : index
    %c0_42 = arith.constant 0 : index
    %155 = vector.load %arg8[%c0_41, %c0_42] : memref<32x128xf32, #tpu.memory_space<vmem>>, vector<32x128xf32>
    tpu.vector_store %arg8[%c0_41, %c0_42], %154 {strides = array<i32>} : memref<32x128xf32, #tpu.memory_space<vmem>>, vector<32x128xf32>,
    return
  }
  func.func @transform_0(%arg0: i32) -> (i32, i32) {
    %c0_i32 = arith.constant 0 : i32
    %c0_i32_0 = arith.constant 0 : i32
    return %arg0, %c0_i32 : i32, i32
  }
  func.func @transform_1(%arg0: i32) -> (i32, i32) {
    %c0_i32 = arith.constant 0 : i32
    %c0_i32_0 = arith.constant 0 : i32
    %c0_i32_1 = arith.constant 0 : i32
    return %c0_i32, %c0_i32_0 : i32, i32
  }
  func.func @transform_2(%arg0: i32) -> (i32, i32) {
    %c0_i32 = arith.constant 0 : i32
    %c0_i32_0 = arith.constant 0 : i32
    %c0_i32_1 = arith.constant 0 : i32
    return %c0_i32, %c0_i32_0 : i32, i32
  }
  func.func @transform_3(%arg0: i32) -> (i32, i32) {
    %c0_i32 = arith.constant 0 : i32
    %c0_i32_0 = arith.constant 0 : i32
    %c0_i32_1 = arith.constant 0 : i32
    return %c0_i32, %c0_i32_0 : i32, i32
  }
  func.func @transform_4(%arg0: i32) -> (i32, i32) {
    %c0_i32 = arith.constant 0 : i32
    %c0_i32_0 = arith.constant 0 : i32
    %c0_i32_1 = arith.constant 0 : i32
    return %c0_i32, %c0_i32_0 : i32, i32
  }
  func.func @transform_5(%arg0: i32) -> (i32, i32) {
    %c0_i32 = arith.constant 0 : i32
    %c0_i32_0 = arith.constant 0 : i32
    %c0_i32_1 = arith.constant 0 : i32
    return %c0_i32, %c0_i32_0 : i32, i32
  }
  func.func @transform_6(%arg0: i32) -> (i32, i32) {
    %c0_i32 = arith.constant 0 : i32
    %c0_i32_0 = arith.constant 0 : i32
    return %arg0, %c0_i32 : i32, i32
  }
  func.func @transform_7(%arg0: i32) -> (i32, i32) {
    %c0_i32 = arith.constant 0 : i32
    %c0_i32_0 = arith.constant 0 : i32
    return %arg0, %c0_i32 : i32, i32
  }
}

module attributes {stable_mosaic.version = 11 : i64} {
  func.func @_proj_ln_ffn_kernel(%arg0: i32, %arg1: memref<64x32xf32, #tpu.memory_space<vmem>>, %arg2: memref<64x32xf32, #tpu.memory_space<vmem>>, %arg3: memref<32x32xbf16, #tpu.memory_space<vmem>>, %arg4: memref<1x32xf32, #tpu.memory_space<vmem>>, %arg5: memref<1x32xf32, #tpu.memory_space<vmem>>, %arg6: memref<32x128xbf16, #tpu.memory_space<vmem>>, %arg7: memref<1x128xf32, #tpu.memory_space<vmem>>, %arg8: memref<128x32xbf16, #tpu.memory_space<vmem>>, %arg9: memref<1x32xf32, #tpu.memory_space<vmem>>, %arg10: memref<64x32xf32, #tpu.memory_space<vmem>>) attributes {dimension_semantics = [#tpu.dimension_semantics<parallel>], iteration_bounds = array<i64: 1>, scalar_prefetch = 0 : i64, scratch_operands = 0 : i64, tpu.core_type = #tpu.core_type<tc>, window_params = [{transform_indices = @transform_0, window_bounds = array<i64: 64, 32>}, {transform_indices = @transform_1, window_bounds = array<i64: 64, 32>}, {pipeline_mode = #tpu.pipeline_mode<synchronous>, transform_indices = @transform_2, window_bounds = array<i64: 32, 32>}, {pipeline_mode = #tpu.pipeline_mode<synchronous>, transform_indices = @transform_3, window_bounds = array<i64: 1, 32>}, {pipeline_mode = #tpu.pipeline_mode<synchronous>, transform_indices = @transform_4, window_bounds = array<i64: 1, 32>}, {pipeline_mode = #tpu.pipeline_mode<synchronous>, transform_indices = @transform_5, window_bounds = array<i64: 32, 128>}, {pipeline_mode = #tpu.pipeline_mode<synchronous>, transform_indices = @transform_6, window_bounds = array<i64: 1, 128>}, {pipeline_mode = #tpu.pipeline_mode<synchronous>, transform_indices = @transform_7, window_bounds = array<i64: 128, 32>}, {pipeline_mode = #tpu.pipeline_mode<synchronous>, transform_indices = @transform_8, window_bounds = array<i64: 1, 32>}, {transform_indices = @transform_9, window_bounds = array<i64: 64, 32>}]} {
    %c0 = arith.constant 0 : index
    %c0_0 = arith.constant 0 : index
    %0 = vector.load %arg1[%c0, %c0_0] : memref<64x32xf32, #tpu.memory_space<vmem>>, vector<64x32xf32>
    %1 = arith.truncf %0 : vector<64x32xf32> to vector<64x32xbf16>
    %c0_1 = arith.constant 0 : index
    %c0_2 = arith.constant 0 : index
    %2 = vector.load %arg3[%c0_1, %c0_2] : memref<32x32xbf16, #tpu.memory_space<vmem>>, vector<32x32xbf16>
    %cst = arith.constant dense<0.000000e+00> : vector<64x32xf32>
    %3 = tpu.matmul %1, %2, %cst {dimension_numbers = #tpu.dot_dimension_numbers<[1], [0], [0], [1], [0, 0, 1, 1], [], []>} : vector<64x32xbf16>, vector<32x32xbf16>, vector<64x32xf32> -> vector<64x32xf32>
    %c0_3 = arith.constant 0 : index
    %c0_4 = arith.constant 0 : index
    %4 = vector.load %arg2[%c0_3, %c0_4] : memref<64x32xf32, #tpu.memory_space<vmem>>, vector<64x32xf32>
    %5 = arith.addf %3, %4 : vector<64x32xf32>
    %cst_5 = arith.constant dense<0.000000e+00> : vector<64xf32>
    %6 = vector.multi_reduction <add>, %5, %cst_5 [1] : vector<64x32xf32> to vector<64xf32>
    %7 = vector.shape_cast %6 : vector<64xf32> to vector<64x1xf32>
    %cst_6 = arith.constant 3.200000e+01 : f32
    %8 = vector.broadcast %cst_6 : f32 to vector<64x1xf32>
    %9 = arith.divf %7, %8 : vector<64x1xf32>
    %10 = vector.broadcast %9 : vector<64x1xf32> to vector<64x32xf32>
    %11 = arith.subf %5, %10 : vector<64x32xf32>
    %12 = arith.mulf %11, %11 : vector<64x32xf32>
    %cst_7 = arith.constant dense<0.000000e+00> : vector<64xf32>
    %13 = vector.multi_reduction <add>, %12, %cst_7 [1] : vector<64x32xf32> to vector<64xf32>
    %14 = vector.shape_cast %13 : vector<64xf32> to vector<64x1xf32>
    %cst_8 = arith.constant 3.200000e+01 : f32
    %15 = vector.broadcast %cst_8 : f32 to vector<64x1xf32>
    %16 = arith.divf %14, %15 : vector<64x1xf32>
    %17 = vector.broadcast %9 : vector<64x1xf32> to vector<64x32xf32>
    %18 = arith.subf %5, %17 : vector<64x32xf32>
    %cst_9 = arith.constant 9.99999974E-6 : f32
    %19 = vector.broadcast %cst_9 : f32 to vector<64x1xf32>
    %20 = arith.addf %16, %19 : vector<64x1xf32>
    %21 = math.rsqrt %20 : vector<64x1xf32>
    %22 = vector.broadcast %21 : vector<64x1xf32> to vector<64x32xf32>
    %23 = arith.mulf %18, %22 : vector<64x32xf32>
    %c0_10 = arith.constant 0 : index
    %c0_11 = arith.constant 0 : index
    %24 = vector.load %arg4[%c0_10, %c0_11] : memref<1x32xf32, #tpu.memory_space<vmem>>, vector<1x32xf32>
    %25 = vector.broadcast %24 : vector<1x32xf32> to vector<64x32xf32>
    %26 = arith.mulf %23, %25 : vector<64x32xf32>
    %c0_12 = arith.constant 0 : index
    %c0_13 = arith.constant 0 : index
    %27 = vector.load %arg5[%c0_12, %c0_13] : memref<1x32xf32, #tpu.memory_space<vmem>>, vector<1x32xf32>
    %28 = vector.broadcast %27 : vector<1x32xf32> to vector<64x32xf32>
    %29 = arith.addf %26, %28 : vector<64x32xf32>
    %30 = arith.truncf %29 : vector<64x32xf32> to vector<64x32xbf16>
    %c0_14 = arith.constant 0 : index
    %c0_15 = arith.constant 0 : index
    %31 = vector.load %arg6[%c0_14, %c0_15] : memref<32x128xbf16, #tpu.memory_space<vmem>>, vector<32x128xbf16>
    %cst_16 = arith.constant dense<0.000000e+00> : vector<64x128xf32>
    %32 = tpu.matmul %30, %31, %cst_16 {dimension_numbers = #tpu.dot_dimension_numbers<[1], [0], [0], [1], [0, 0, 1, 1], [], []>} : vector<64x32xbf16>, vector<32x128xbf16>, vector<64x128xf32> -> vector<64x128xf32>
    %c0_17 = arith.constant 0 : index
    %c0_18 = arith.constant 0 : index
    %33 = vector.load %arg7[%c0_17, %c0_18] : memref<1x128xf32, #tpu.memory_space<vmem>>, vector<1x128xf32>
    %34 = vector.broadcast %33 : vector<1x128xf32> to vector<64x128xf32>
    %35 = arith.addf %32, %34 : vector<64x128xf32>
    %cst_19 = arith.constant 0.000000e+00 : f32
    %36 = vector.broadcast %cst_19 : f32 to vector<64x128xf32>
    %37 = arith.maximumf %35, %36 : vector<64x128xf32>
    %38 = arith.truncf %37 : vector<64x128xf32> to vector<64x128xbf16>
    %c0_20 = arith.constant 0 : index
    %c0_21 = arith.constant 0 : index
    %39 = vector.load %arg8[%c0_20, %c0_21] : memref<128x32xbf16, #tpu.memory_space<vmem>>, vector<128x32xbf16>
    %cst_22 = arith.constant dense<0.000000e+00> : vector<64x32xf32>
    %40 = tpu.matmul %38, %39, %cst_22 {dimension_numbers = #tpu.dot_dimension_numbers<[1], [0], [0], [1], [0, 0, 1, 1], [], []>} : vector<64x128xbf16>, vector<128x32xbf16>, vector<64x32xf32> -> vector<64x32xf32>
    %c0_23 = arith.constant 0 : index
    %c0_24 = arith.constant 0 : index
    %41 = vector.load %arg9[%c0_23, %c0_24] : memref<1x32xf32, #tpu.memory_space<vmem>>, vector<1x32xf32>
    %42 = vector.broadcast %41 : vector<1x32xf32> to vector<64x32xf32>
    %43 = arith.addf %40, %42 : vector<64x32xf32>
    %c0_25 = arith.constant 0 : index
    %c0_26 = arith.constant 0 : index
    %44 = vector.load %arg10[%c0_25, %c0_26] : memref<64x32xf32, #tpu.memory_space<vmem>>, vector<64x32xf32>
    tpu.vector_store %arg10[%c0_25, %c0_26], %43 {strides = array<i32>} : memref<64x32xf32, #tpu.memory_space<vmem>>, vector<64x32xf32>,
    return
  }
  func.func @transform_0(%arg0: i32) -> (i32, i32) {
    %c0_i32 = arith.constant 0 : i32
    %c0_i32_0 = arith.constant 0 : i32
    return %arg0, %c0_i32 : i32, i32
  }
  func.func @transform_1(%arg0: i32) -> (i32, i32) {
    %c0_i32 = arith.constant 0 : i32
    %c0_i32_0 = arith.constant 0 : i32
    return %arg0, %c0_i32 : i32, i32
  }
  func.func @transform_2(%arg0: i32) -> (i32, i32) {
    %c0_i32 = arith.constant 0 : i32
    %c0_i32_0 = arith.constant 0 : i32
    %c0_i32_1 = arith.constant 0 : i32
    return %c0_i32, %c0_i32_0 : i32, i32
  }
  func.func @transform_3(%arg0: i32) -> (i32, i32) {
    %c0_i32 = arith.constant 0 : i32
    %c0_i32_0 = arith.constant 0 : i32
    %c0_i32_1 = arith.constant 0 : i32
    return %c0_i32, %c0_i32_0 : i32, i32
  }
  func.func @transform_4(%arg0: i32) -> (i32, i32) {
    %c0_i32 = arith.constant 0 : i32
    %c0_i32_0 = arith.constant 0 : i32
    %c0_i32_1 = arith.constant 0 : i32
    return %c0_i32, %c0_i32_0 : i32, i32
  }
  func.func @transform_5(%arg0: i32) -> (i32, i32) {
    %c0_i32 = arith.constant 0 : i32
    %c0_i32_0 = arith.constant 0 : i32
    %c0_i32_1 = arith.constant 0 : i32
    return %c0_i32, %c0_i32_0 : i32, i32
  }
  func.func @transform_6(%arg0: i32) -> (i32, i32) {
    %c0_i32 = arith.constant 0 : i32
    %c0_i32_0 = arith.constant 0 : i32
    %c0_i32_1 = arith.constant 0 : i32
    return %c0_i32, %c0_i32_0 : i32, i32
  }
  func.func @transform_7(%arg0: i32) -> (i32, i32) {
    %c0_i32 = arith.constant 0 : i32
    %c0_i32_0 = arith.constant 0 : i32
    %c0_i32_1 = arith.constant 0 : i32
    return %c0_i32, %c0_i32_0 : i32, i32
  }
  func.func @transform_8(%arg0: i32) -> (i32, i32) {
    %c0_i32 = arith.constant 0 : i32
    %c0_i32_0 = arith.constant 0 : i32
    %c0_i32_1 = arith.constant 0 : i32
    return %c0_i32, %c0_i32_0 : i32, i32
  }
  func.func @transform_9(%arg0: i32) -> (i32, i32) {
    %c0_i32 = arith.constant 0 : i32
    %c0_i32_0 = arith.constant 0 : i32
    return %arg0, %c0_i32 : i32, i32
  }
}

</mosaic_0001>

<bundles_post_ra>
// kernel: div.0
= control target key start
LH: loop header
LB: loop body
LE: loop exit
PB: predicated region body
PF: predicated region fallthrough
CT: control target
= control target key end

     0   :  { %s462_s0 = inlined_call_operand.vmem [shape: f32[64,32], index: 0, kind: input, shape index: {}]   ;;  %s463_s1 = inlined_call_operand.vmem [shape: f32[64,32], index: 1, kind: input, shape index: {}]   ;;  %s464_s2 = inlined_call_operand.vmem [shape: f32[64,32], index: 2, kind: output, shape index: {}]  }
   0x1   :  { %v4_v0 = vld [vmem:[%s463_s1] sm:$0xff]  ;;  %v250_v1 = vld [vmem:[%s463_s1 + $0x8] sm:$0xff]  ;;  %v255_v2 = vld [vmem:[%s463_s1 + $0x10] sm:$0xff] }
   0x2   :  { %213 = vrcp.f32 %v4_v0  ;;  %v16_v3 = vand.u32 2147483647, %v4_v0  ;;  %v18_v4 = vand.u32 2147483648, %v4_v0  ;;  %v261_v5 = vld [vmem:[%s463_s1 + $0x18] sm:$0xff]  ;;  %v39_v6 = vand.u32 2147483647, %v250_v1 }
   0x3   :  { %215 = vrcp.f32 %v250_v1  ;;  %v41_v7 = vand.u32 2147483648, %v250_v1  ;;  %v269_v8 = vld [vmem:[%s463_s1 + $0x20] sm:$0xff]  ;;  %v63_v9 = vand.u32 2147483647, %v255_v2  ;;  %v65_v10 = vand.u32 2147483648, %v255_v2  ;;  %v279_v12 = vld [vmem:[%s463_s1 + $0x28] sm:$0xff] }
   0x4   :  { %217 = vrcp.f32 %v255_v2  ;;  %vm12_vm0 = vweird.f32 %v4_v0  ;;  %vm35_vm1 = vweird.f32 %v250_v1  ;;  %v89_v11 = vand.u32 2147483648, %v261_v5  ;;  %v308_v25 = vld [vmem:[%s463_s1 + $0x30] sm:$0xff]  ;;  %v3_v51 = vld [vmem:[%s462_s0] sm:$0xff]  ;;  %v192_v58 = vld [vmem:[%s462_s0 + $0x8] sm:$0xff] }
   0x5   :  { %219 = vrcp.f32 %v261_v5  ;;  %vm281_vm2 = vcmp.eq.f32.partialorder %v16_v3, 8.507059e+37  ;;  %v285_v14 = vor.u32 1.1754944e-38, %v18_v4  ;;  %vm59_vm3 = vweird.f32 %v255_v2  ;;  %v201_v17 = vld [vmem:[%s462_s0 + $0x20] sm:$0xff] }
   0x6   :  { %v87_v15 = vand.u32 2147483647, %v261_v5  ;;  %221 = vrcp.f32 %v269_v8  ;;  %vm290_vm4 = vcmp.eq.f32.partialorder %v39_v6, 8.507059e+37  ;;  %v294_v18 = vor.u32 1.1754944e-38, %v41_v7 }
   0x7   :  { %vm83_vm5 = vweird.f32 %v261_v5  ;;  %v111_v19 = vand.u32 2147483647, %v269_v8  ;;  %v113_v20 = vand.u32 2147483648, %v269_v8  ;;  %vm299_vm6 = vcmp.eq.f32.partialorder %v63_v9, 8.507059e+37 }
   0x8   :  { %v214_v16 = vpop.eup %213  ;;  %v66_v24 = vor.u32 1.1754944e-38, %v65_v10  ;;  %vm107_vm7 = vweird.f32 %v269_v8  ;;  %223 = vrcp.f32 %v279_v12  ;;  %v311_v28 = vor.u32 1.1754944e-38, %v89_v11  ;;  %v198_v11 = vld [vmem:[%s462_s0 + $0x18] sm:$0xff] }
   0x9   :  { %v216_v21 = vpop.eup %215  ;;  %v8_v22 = vmul.f32 %v214_v16, %v4_v0  ;;  %vm13_vm8 = vweird.f32 %v214_v16  ;;  %vm131_vm9 = vweird.f32 %v279_v12  ;;  %vm315_vm11 = vcmp.eq.f32.partialorder %v87_v15, 8.507059e+37  ;;  %v195_v0 = vld [vmem:[%s462_s0 + $0x10] sm:$0xff] }
   0xa   :  { %v218_v26 = vpop.eup %217  ;;  %v31_v27 = vmul.f32 %v216_v21, %v250_v1  ;;  %vm36_vm10 = vweird.f32 %v216_v21  ;;  %v135_v32 = vand.u32 2147483647, %v279_v12  ;;  %vm320_vm12 = vcmp.eq.f32.partialorder %v111_v19, 8.507059e+37  ;;  %vm331_vm14 = vmor %vm12_vm0, %vm13_vm8 }
   0xb   :  { %v9_v29 = vsub.f32 1.0, %v8_v22  ;;  %v55_v30 = vmul.f32 %v218_v26, %v255_v2  ;;  %v220_v33 = vpop.eup %219  ;;  %v324_v36 = vor.u32 1.1754944e-38, %v113_v20  ;;  %v137_v37 = vand.u32 2147483648, %v279_v12  ;;  %vm339_vm1 = vmor %vm35_vm1, %vm36_vm10  ;;  %v211_v20 = vld [vmem:[%s463_s1 + $0x38] sm:$0xff] }
   0xc   :  { %v32_v34 = vsub.f32 1.0, %v31_v27  ;;  %225 = vrcp.f32 %v308_v25  ;;  %v222_v38 = vpop.eup %221  ;;  %vm60_vm13 = vweird.f32 %v218_v26  ;;  %v79_v41 = vmul.f32 %v220_v33, %v261_v5  ;;  %v204_v27 = vld [vmem:[%s462_s0 + $0x28] sm:$0xff] }
   0xd   :  { %v10_v39 = vmul.f32 %v214_v16, %v9_v29  ;;  %v56_v40 = vsub.f32 1.0, %v55_v30  ;;  %vm84_vm15 = vweird.f32 %v220_v33  ;;  %v103_v44 = vmul.f32 %v222_v38, %v269_v8  ;;  %vm354_vm3 = vmor %vm59_vm3, %vm60_vm13 }
   0xe   :  { %v33_v43 = vmul.f32 %v216_v21, %v32_v34  ;;  %vm108_vm0 = vweird.f32 %v222_v38  ;;  %v224_v45 = vpop.eup %223  ;;  %v80_v49 = vsub.f32 1.0, %v79_v41  ;;  %vm343_vm8 = vcmp.eq.f32.partialorder %v135_v32, 8.507059e+37 }
   0xf   :  { %v11_v46 = vadd.f32 %v214_v16, %v10_v39  ;;  %v57_v48 = vmul.f32 %v218_v26, %v56_v40  ;;  %vm155_vm10 = vweird.f32 %v308_v25  ;;  %v104_v54 = vsub.f32 1.0, %v103_v44 }
  0x10   :  { %v34_v52 = vadd.f32 %v216_v21, %v33_v43  ;;  %v127_v55 = vmul.f32 %v224_v45, %v279_v12  ;;  %v138_v56 = vor.u32 1.1754944e-38, %v137_v37  ;;  %v81_v60 = vmul.f32 %v220_v33, %v80_v49 }
  0x11   :  { %v15_v57 = vsel %vm331_vm14, %v214_v16, %v11_v46  ;;  %v58_v59 = vadd.f32 %v218_v26, %v57_v48  ;;  %vm132_vm13 = vweird.f32 %v224_v45  ;;  %v105_v2 = vmul.f32 %v222_v38, %v104_v54  ;;  %v210_v48 = vld [vmem:[%s462_s0 + $0x38] sm:$0xff] }
  0x12   :  { %v226_v61 = vpop.eup %225  ;;  %v20_v62 = vsel %vm281_vm2, %v285_v14, %v15_v57  ;;  %v38_v63 = vsel %vm339_vm1, %v216_v21, %v34_v52  ;;  %vm375_vm2 = vmor %vm83_vm5, %vm84_vm15  ;;  %v128_v3 = vsub.f32 1.0, %v127_v55  ;;  %v82_v7 = vadd.f32 %v220_v33, %v81_v60 }
  0x13   :  { %v21_v4 = vmul.f32 %v20_v62, %v3_v51  ;;  %v43_v5 = vsel %vm290_vm4, %v294_v18, %v38_v63  ;;  %v62_v6 = vsel %vm354_vm3, %v218_v26, %v58_v59  ;;  %vm387_vm4 = vmor %vm107_vm7, %vm108_vm0  ;;  %v106_v13 = vadd.f32 %v222_v38, %v105_v2 }
  0x14   :  { %v44_v9 = vmul.f32 %v192_v58, %v43_v5  ;;  %v67_v10 = vsel %vm299_vm6, %v66_v24, %v62_v6  ;;  %v129_v14 = vmul.f32 %v224_v45, %v128_v3  ;;  %v86_v16 = vsel %vm375_vm2, %v220_v33, %v82_v7  ;;  %vm407_vm5 = vmor %vm131_vm9, %vm132_vm13 }
  0x15   :  { %23 = vst [vmem:[%s464_s2] sm:$0xff] %v21_v4  ;;  %v68_v15 = vmul.f32 %v195_v0, %v67_v10  ;;  %v151_v18 = vmul.f32 %v226_v61, %v308_v25  ;;  %v159_v19 = vand.u32 2147483647, %v308_v25  ;;  %v91_v21 = vsel %vm315_vm11, %v311_v28, %v86_v16 }
  0x16   :  { %194 = vst [vmem:[%s464_s2 + $0x8] sm:$0xff] %v44_v9  ;;  %v110_v22 = vsel %vm387_vm4, %v222_v38, %v106_v13  ;;  %v130_v23 = vadd.f32 %v224_v45, %v129_v14  ;;  %vm156_vm6 = vweird.f32 %v226_v61  ;;  %v92_v24 = vmul.f32 %v198_v11, %v91_v21 }
  0x17   :  { %197 = vst [vmem:[%s464_s2 + $0x10] sm:$0xff] %v68_v15  ;;  %v115_v26 = vsel %vm320_vm12, %v324_v36, %v110_v22  ;;  %v152_v28 = vsub.f32 1.0, %v151_v18  ;;  %v161_v29 = vand.u32 2147483648, %v308_v25  ;;  %227 = vrcp.f32 %v211_v20  ;;  %vm157_vm7 = vmor %vm155_vm10, %vm156_vm6  ;;  %v207_v36 = vld [vmem:[%s462_s0 + $0x30] sm:$0xff] }
  0x18   :  { %v116_v30 = vmul.f32 %v201_v17, %v115_v26  ;;  %v134_v31 = vsel %vm407_vm5, %v224_v45, %v130_v23  ;;  %200 = vst [vmem:[%s464_s2 + $0x18] sm:$0xff] %v92_v24  ;;  %vm160_vm9 = vcmp.eq.f32.partialorder %v159_v19, 8.507059e+37  ;;  %v185_v42 = vand.u32 2147483648, %v211_v20 }
  0x19   :  { %v139_v32 = vsel %vm343_vm8, %v138_v56, %v134_v31  ;;  %v153_v33 = vmul.f32 %v226_v61, %v152_v28  ;;  %v162_v25 = vor.u32 1.1754944e-38, %v161_v29  ;;  %vm179_vm11 = vweird.f32 %v211_v20 }
  0x1a   :  { %203 = vst [vmem:[%s464_s2 + $0x20] sm:$0xff] %v116_v30  ;;  %v140_v34 = vmul.f32 %v204_v27, %v139_v32  ;;  %v183_v44 = vand.u32 2147483647, %v211_v20  ;;  %v186_v46 = vor.u32 1.1754944e-38, %v185_v42 }
  0x1b   :  { %v154_v35 = vadd.f32 %v226_v61, %v153_v33 }
  0x1c   :  { %206 = vst [vmem:[%s464_s2 + $0x28] sm:$0xff] %v140_v34  ;;  %vm184_vm15 = vcmp.eq.f32.partialorder %v183_v44, 8.507059e+37 }
  0x1d   :  { %v158_v37 = vsel %vm157_vm7, %v226_v61, %v154_v35  ;;  %v228_v38 = vpop.eup %227 }
  0x1e   :  { %v163_v39 = vsel %vm160_vm9, %v162_v25, %v158_v37  ;;  %v175_v41 = vmul.f32 %v228_v38, %v211_v20  ;;  %vm180_vm12 = vweird.f32 %v228_v38 }
  0x1f   :  { %v164_v40 = vmul.f32 %v207_v36, %v163_v39  ;;  %vm181_vm14 = vmor %vm179_vm11, %vm180_vm12 }
  0x20   :  { %v176_v43 = vsub.f32 1.0, %v175_v41 }
  0x21   :  { %209 = vst [vmem:[%s464_s2 + $0x30] sm:$0xff] %v164_v40 }
  0x22   :  { %v177_v45 = vmul.f32 %v228_v38, %v176_v43 }
  0x24   :  { %v178_v47 = vadd.f32 %v228_v38, %v177_v45 }
  0x26   :  { %v182_v49 = vsel %vm181_vm14, %v228_v38, %v178_v47 }
  0x27   :  { %v187_v50 = vsel %vm184_vm15, %v186_v46, %v182_v49 }
  0x28   :  { %v188_v51 = vmul.f32 %v210_v48, %v187_v50 }
  0x2a   :  { %212 = vst [vmem:[%s464_s2 + $0x38] sm:$0xff] %v188_v51 }

// kernel: dilated_transformer_block_forward.4
= control target key start
LH: loop header
LB: loop body
LE: loop exit
PB: predicated region body
PF: predicated region fallthrough
CT: control target
= control target key end

     0   :  { %vm30_vm0 = vcmask 261120   ;;  %v2229_v8 = vmov 32.0   ;;  %vm272_vm14 = vcmask 64512   ;;  %vm438_vm15 = vcmask 1043456   ;;  %s2232_s21 = smov 104   ;;  %s2234_s22 = smov 1   ;;  %s2769_s0 = inlined_call_operand.vmem [shape: f32[32,32], index: 0, kind: input, shape index: {}]   ;;  %s2770_s1 = inlined_call_operand.vmem [shape: f32[1,32], index: 1, kind: input, shape index: {}]   ;;  %s2771_s2 = inlined_call_operand.vmem [shape: f32[1,32], index: 2, kind: input, shape index: {}]   ;;  %s2772_s3 = inlined_call_operand.vmem [shape: bf16[32,32], index: 3, kind: input, shape index: {}]   ;;  %s2773_s4 = inlined_call_operand.vmem [shape: bf16[32,32], index: 4, kind: input, shape index: {}]   ;;  %s2774_s5 = inlined_call_operand.vmem [shape: bf16[32,32], index: 5, kind: input, shape index: {}]   ;;  %s2775_s7 = inlined_call_operand.vmem [shape: f32[32,128], index: 7, kind: output, shape index: {1}]   ;;  %s2776_s6 = inlined_call_operand.vmem [shape: f32[32,32], index: 6, kind: output, shape index: {0}]  }
   0x1   :  { %v28_v0 = vld [vmem:[%s2769_s0 + $0x10] sm:$0xff]  ;;  %v26_v1 = vld [vmem:[%s2769_s0] sm:$0xff]  ;;  %v29_v4 = vld [vmem:[%s2769_s0 + $0x18] sm:$0xff]  ;;  %2155 = vrcp.f32 %v2229_v8  ;;  %s2235_s23 = smov 8   ;;  %s2236_s24 = smov 2  }
   0x2   :  { %v37_v2 = vsel %vm30_vm0, %v28_v0, 0.0  ;;  %v31_v3 = vsel %vm30_vm0, %v26_v1, 0.0  ;;  %v27_v5 = vld [vmem:[%s2769_s0 + $0x8] sm:$0xff]  ;;  %v40_v6 = vsel %vm30_vm0, %v29_v4, 0.0  ;;  %v2132_v41 = vld [vmem:[%s2772_s3] sm:$0xff]  ;;  %s2237_s25 = smov 16  }
   0x3   :  { %38 = vadd.xlane.f32.xlu1 %v37_v2  ;;  %32 = vadd.xlane.f32.xlu0 %v31_v3  ;;  %v34_v7 = vsel %vm30_vm0, %v27_v5, 0.0  ;;  %v2133_v35 = vld [vmem:[%s2772_s3 + $0x8] sm:$0xff]  ;;  %v2134_v42 = vld [vmem:[%s2773_s4] sm:$0xff]  ;;  %s2238_s26 = smov 3   ;;  %s2239_s27 = smov 24  }
   0x4   :  { %v2135_v36 = vld [vmem:[%s2773_s4 + $0x8] sm:$0xff]  ;;  %172 = vmatpush.bf16.msra.mxu0 %v2133_v35  ;;  %v2136_v43 = vld [vmem:[%s2774_s5] sm:$0xff] }
   0x5   :  { %v2137_v37 = vld [vmem:[%s2774_s5 + $0x8] sm:$0xff]  ;;  %207 = vmatpush.bf16.msra.mxu1 %v2135_v36 }
   0x6   :  { %242 = vmatpush.bf16.msra.mxu2 %v2137_v37 }
   0x7   :  { %v2156_v9 = vpop.eup %2155 }
   0x8   :  { %v44_v10 = vmul.f32 32.0, %v2156_v9  ;;  %vm48_vm1 = vweird.f32 %v2156_v9  ;;  %173 = vmatpush.bf16.msra.mxu0 %v2132_v41 }
   0x9   :  { %208 = vmatpush.bf16.msra.mxu1 %v2134_v42 }
   0xa   :  { %v45_v11 = vsub.f32 1.0, %v44_v10  ;;  %243 = vmatpush.bf16.msra.mxu2 %v2136_v43 }
   0xb   :  { %41 = vadd.xlane.f32.xlu1 %v40_v6  ;;  %35 = vadd.xlane.f32.xlu0 %v34_v7 }
   0xc   :  { %v46_v12 = vmul.f32 %v2156_v9, %v45_v11 }
   0xe   :  { %v47_v13 = vadd.f32 %v2156_v9, %v46_v12 }
  0x10   :  { %v49_v14 = vsel %vm48_vm1, %v2156_v9, %v47_v13  ;;  %v2153_v9 = vld [vmem:[%s2770_s1] ss:$0 sm:$0xff]  ;;  %s2230_s1 = smov 120  }
  0x76   :  { %v39_v15 = vpop.xlane.xlu1 %38  ;;  %v33_v16 = vpop.xlane.xlu0 %32 }
  0x77   :  { %v52_v17 = vmul.f32 %v49_v14, %v39_v15  ;;  %v50_v18 = vmul.f32 %v49_v14, %v33_v16  ;;  %v2154_v16 = vld [vmem:[%s2771_s2] ss:$0 sm:$0xff]  ;;  %s2231_s2 = smov 112  }
  0x79   :  { %v2296_v19 = vsub.f32 %v28_v0, %v52_v17  ;;  %v2298_v20 = vsub.f32 %v26_v1, %v50_v18 }
  0x7b   :  { %v60_v21 = vmul.f32 %v2296_v19, %v2296_v19  ;;  %v58_v22 = vmul.f32 %v2298_v20, %v2298_v20 }
  0x7d   :  { %v68_v23 = vsel %vm30_vm0, %v60_v21, 0.0  ;;  %v62_v24 = vsel %vm30_vm0, %v58_v22, 0.0 }
  0x7e   :  { %v42_v25 = vpop.xlane.xlu1 %41  ;;  %69 = vadd.xlane.f32.xlu0 %v68_v23  ;;  %63 = vadd.xlane.f32.xlu2 %v62_v24  ;;  %v36_v26 = vpop.xlane.xlu0 %35 }
  0x7f   :  { %v53_v27 = vmul.f32 %v49_v14, %v42_v25  ;;  %v51_v28 = vmul.f32 %v49_v14, %v36_v26 }
  0x81   :  { %v2306_v29 = vsub.f32 %v29_v4, %v53_v27  ;;  %v2308_v30 = vsub.f32 %v27_v5, %v51_v28 }
  0x83   :  { %v61_v31 = vmul.f32 %v2306_v29, %v2306_v29  ;;  %v59_v32 = vmul.f32 %v2308_v30, %v2308_v30 }
  0x85   :  { %v71_v33 = vsel %vm30_vm0, %v61_v31, 0.0  ;;  %v65_v34 = vsel %vm30_vm0, %v59_v32, 0.0 }
  0x86   :  { %72 = vadd.xlane.f32.xlu1 %v71_v33  ;;  %66 = vadd.xlane.f32.xlu2 %v65_v34 }
  0xf1   :  { %v64_v38 = vpop.xlane.xlu2 %63  ;;  %v70_v40 = vpop.xlane.xlu0 %69 }
  0xf2   :  { %v74_v39 = vmul.f32 %v64_v38, %v49_v14  ;;  %v76_v45 = vmul.f32 %v70_v40, %v49_v14 }
  0xf4   :  { %v78_v44 = vadd.f32 1e-05, %v74_v39  ;;  %v80_v46 = vadd.f32 1e-05, %v76_v45 }
  0xf6   :  { %2157 = vrsqrt.f32 %v78_v44  ;;  %vm88_vm3 = vweird.f32 %v78_v44  ;;  %vm108_vm10 = vweird.f32 %v80_v46 }
  0xf7   :  { %2159 = vrsqrt.f32 %v80_v46 }
  0xf9   :  { %v73_v47 = vpop.xlane.xlu1 %72  ;;  %v67_v48 = vpop.xlane.xlu2 %66 }
  0xfa   :  { %v77_v49 = vmul.f32 %v73_v47, %v49_v14  ;;  %v75_v50 = vmul.f32 %v67_v48, %v49_v14 }
  0xfc   :  { %v2158_v51 = vpop.eup %2157  ;;  %v81_v52 = vadd.f32 1e-05, %v77_v49  ;;  %v79_v53 = vadd.f32 1e-05, %v75_v50 }
  0xfd   :  { %v83_v54 = vmul.f32 %v2158_v51, %v78_v44  ;;  %v2160_v57 = vpop.eup %2159  ;;  %vm89_vm2 = vweird.f32 %v2158_v51 }
  0xfe   :  { %2161 = vrsqrt.f32 %v81_v52  ;;  %v103_v63 = vmul.f32 %v2160_v57, %v80_v46  ;;  %vm90_vm4 = vmor %vm88_vm3, %vm89_vm2  ;;  %vm98_vm6 = vweird.f32 %v79_v53  ;;  %vm118_vm8 = vweird.f32 %v81_v52 }
  0xff   :  { %v84_v55 = vmul.f32 %v2158_v51, %v83_v54  ;;  %2163 = vrsqrt.f32 %v79_v53  ;;  %vm109_vm11 = vweird.f32 %v2160_v57  ;;  %vm2038_vm2 = vcmask 7168  }
 0x100   :  { %v104_v4 = vmul.f32 %v2160_v57, %v103_v63  ;;  %vm110_vm13 = vmor %vm108_vm10, %vm109_vm11  ;;  %vm2043_vm3 = vcmask 15360  }
 0x101   :  { %v85_v56 = vmul.f32 0.5, %v84_v55 }
 0x102   :  { %v105_v10 = vmul.f32 0.5, %v104_v4 }
 0x103   :  { %v86_v58 = vsub.f32 1.5, %v85_v56 }
 0x104   :  { %v2162_v59 = vpop.eup %2161  ;;  %v106_v17 = vsub.f32 1.5, %v105_v10 }
 0x105   :  { %v2164_v60 = vpop.eup %2163  ;;  %v113_v61 = vmul.f32 %v2162_v59, %v81_v52  ;;  %v87_v62 = vmul.f32 %v2158_v51, %v86_v58  ;;  %vm119_vm9 = vweird.f32 %v2162_v59 }
 0x106   :  { %v93_v0 = vmul.f32 %v2164_v60, %v79_v53  ;;  %vm99_vm5 = vweird.f32 %v2164_v60  ;;  %vm120_vm12 = vmor %vm118_vm8, %vm119_vm9  ;;  %v107_v23 = vmul.f32 %v2160_v57, %v106_v17 }
 0x107   :  { %v114_v1 = vmul.f32 %v2162_v59, %v113_v61  ;;  %v91_v3 = vsel %vm90_vm4, %v2158_v51, %v87_v62  ;;  %vm100_vm7 = vmor %vm98_vm6, %vm99_vm5  ;;  %vm1988_vm4 = vcmask 130048   ;;  %vm2048_vm5 = vcmask 23552  }
 0x108   :  { %v94_v2 = vmul.f32 %v2164_v60, %v93_v0  ;;  %v122_v8 = vmul.f32 %v91_v3, %v2298_v20  ;;  %v111_v26 = vsel %vm110_vm13, %v2160_v57, %v107_v23  ;;  %vm2053_vm6 = vcmask 31744  }
 0x109   :  { %v115_v6 = vmul.f32 0.5, %v114_v1  ;;  %v124_v28 = vmul.f32 %v111_v26, %v2296_v19 }
 0x10a   :  { %v95_v5 = vmul.f32 0.5, %v94_v2  ;;  %v130_v15 = vmul.f32 %v2153_v9, %v122_v8 }
 0x10b   :  { %v116_v12 = vsub.f32 1.5, %v115_v6  ;;  %v132_v31 = vmul.f32 %v2153_v9, %v124_v28 }
 0x10c   :  { %v96_v7 = vsub.f32 1.5, %v95_v5  ;;  %v138_v21 = vadd.f32 %v2154_v16, %v130_v15 }
 0x10d   :  { %v117_v20 = vmul.f32 %v2162_v59, %v116_v12  ;;  %v140_v33 = vadd.f32 %v2154_v16, %v132_v31 }
 0x10e   :  { %v97_v11 = vmul.f32 %v2164_v60, %v96_v7 }
 0x10f   :  { %v121_v25 = vsel %vm120_vm12, %v2162_v59, %v117_v20 }
 0x110   :  { %v101_v13 = vsel %vm100_vm7, %v2164_v60, %v97_v11  ;;  %v125_v27 = vmul.f32 %v121_v25, %v2306_v29  ;;  %vm1993_vm7 = vcmask 195584  }
 0x111   :  { %v123_v14 = vmul.f32 %v101_v13, %v2308_v30 }
 0x112   :  { %v133_v30 = vmul.f32 %v2153_v9, %v125_v27 }
 0x113   :  { %v131_v18 = vmul.f32 %v2153_v9, %v123_v14 }
 0x114   :  { %v141_v32 = vadd.f32 %v2154_v16, %v133_v30 }
 0x115   :  { %v139_v22 = vadd.f32 %v2154_v16, %v131_v18 }
 0x116   :  { %v143_v34 = vpack.c.bf16 %v141_v32, %v140_v33 }
 0x117   :  { %v142_v24 = vpack.c.bf16 %v139_v22, %v138_v21 }
 0x119   :  { %2078 = vmatmul.msk.bf16.vlgmr.msra.gmra.mxu0 %vm30_vm0, %v142_v24  ;;  %2088 = vmatmul.msk.bf16.vlgmr.msra.gmra.mxu1 %vm30_vm0, %v142_v24 }
 0x11a   :  { %2098 = vmatmul.msk.bf16.vlgmr.msra.gmra.mxu2 %vm30_vm0, %v142_v24 }
 0x129   :  { %2079 = vmatmul.msk.bf16.gmra.mxu0 %vm30_vm0, %v143_v34  ;;  %2089 = vmatmul.msk.bf16.gmra.mxu1 %vm30_vm0, %v143_v34 }
 0x12a   :  { %2099 = vmatmul.msk.bf16.gmra.mxu2 %vm30_vm0, %v143_v34  ;;  %v267_v34 = vlaneseq }
 0x196   :  { %v175_v35 = vpop.f32.mrf.mxu0  ;;  %v210_v36 = vpop.f32.mrf.mxu1 }
 0x197   :  { %v255_v37 = vpack.c.bf16 %v175_v35, %v175_v35  ;;  %v259_v38 = vpack.c.bf16 %v210_v36, %v210_v36  ;;  %v268_v35 = vshrl.u32 %v267_v34, 7  ;;  %v270_v36 = vand.u32 127, %v267_v34 }
 0x199   :  { %v665_v39 = vunpack.c.l.b16 %v255_v37  ;;  %v670_v29 = vunpack.c.l.b16 %v259_v38  ;;  %v277_v19 = vsel %vm272_vm14, %v259_v38, 0  ;;  %vm2407_vm1 = vcmp.le.s32.totalorder %v268_v35, %v270_v36 }
 0x19a   :  { %286 = vmatpush.bf16.xpose.msra.mxu3 %v277_v19 }
 0x19b   :  { %v2351_v40 = vpack.c.b16 %v665_v39, %v665_v39  ;;  %v2353_v41 = vpack.c.b16 %v670_v29, %v670_v29 }
 0x19d   :  { %v245_v42 = vpop.f32.mrf.mxu2  ;;  %672 = vrot.lane.b32.xlu2 %v2353_v41, %s2230_s1  ;;  %667 = vrot.lane.b32.xlu1 %v2351_v40, %s2230_s1 }
 0x19e   :  { %v263_v43 = vpack.c.bf16 %v245_v42, %v245_v42  ;;  %v177_v44 = vpop.f32.mrf.mxu0  ;;  %v212_v45 = vpop.f32.mrf.mxu1 }
 0x19f   :  { %v256_v46 = vpack.c.bf16 %v177_v44, %v177_v44  ;;  %v260_v47 = vpack.c.bf16 %v212_v45, %v212_v45 }
 0x1a0   :  { %v440_v48 = vsel %vm438_vm15, %v263_v43, 0  ;;  %v865_v15 = vunpack.c.l.b16 %v263_v43 }
 0x1a1   :  { %v694_v49 = vunpack.c.l.b16 %v256_v46  ;;  %v699_v50 = vunpack.c.l.b16 %v260_v47  ;;  %449 = vmatpush.bf16.msrb.mxu2 %v440_v48  ;;  %2100 = vmatmul.msk.bf16.vlgmr.msra.gmra.mxu3 %vm272_vm14, %v255_v37  ;;  %v296_v51 = vsel %vm272_vm14, %v260_v47, 0 }
 0x1a2   :  { %305 = vmatpush.bf16.xpose.msrb.mxu3 %v296_v51  ;;  %v866_v20 = vpack.c.b16 %v865_v15, %v865_v15 }
 0x1a3   :  { %v2362_v52 = vpack.c.b16 %v694_v49, %v694_v49  ;;  %v700_v53 = vpack.c.b16 %v699_v50, %v699_v50 }
 0x1a5   :  { %v247_v54 = vpop.f32.mrf.mxu2  ;;  %701 = vrot.lane.b32.xlu0 %v700_v53, %s2230_s1  ;;  %696 = vrot.lane.b32.xlu2 %v2362_v52, %s2230_s1 }
 0x1a6   :  { %v264_v55 = vpack.c.bf16 %v247_v54, %v247_v54  ;;  %v180_v56 = vpop.f32.mrf.mxu0  ;;  %v215_v57 = vpop.f32.mrf.mxu1 }
 0x1a7   :  { %v257_v58 = vpack.c.bf16 %v180_v56, %v180_v56  ;;  %v261_v59 = vpack.c.bf16 %v215_v57, %v215_v57 }
 0x1a8   :  { %v459_v60 = vsel %vm438_vm15, %v264_v55, 0  ;;  %v889_v6 = vunpack.c.l.b16 %v264_v55 }
 0x1a9   :  { %v723_v61 = vunpack.c.l.b16 %v257_v58  ;;  %v728_v62 = vunpack.c.l.b16 %v261_v59  ;;  %v315_v63 = vsel %vm272_vm14, %v261_v59, 0 }
 0x1aa   :  { %468 = vmatpush.bf16.msra.mxu3 %v459_v60  ;;  %324 = vmatpush.bf16.xpose.msrb.mxu0 %v315_v63  ;;  %v890_v11 = vpack.c.b16 %v889_v6, %v889_v6 }
 0x1ab   :  { %v724_v0 = vpack.c.b16 %v723_v61, %v723_v61  ;;  %v729_v1 = vpack.c.b16 %v728_v62, %v728_v62 }
 0x1ad   :  { %v250_v2 = vpop.f32.mrf.mxu2  ;;  %730 = vrot.lane.b32.xlu0 %v729_v1, %s2230_s1  ;;  %725 = vrot.lane.b32.xlu1 %v724_v0, %s2230_s1 }
 0x1ae   :  { %v265_v3 = vpack.c.bf16 %v250_v2, %v250_v2  ;;  %v217_v4 = vpop.f32.mrf.mxu1  ;;  %v182_v12 = vpop.f32.mrf.mxu0 }
 0x1af   :  { %v262_v5 = vpack.c.bf16 %v217_v4, %v217_v4  ;;  %v258_v17 = vpack.c.bf16 %v182_v12, %v182_v12 }
 0x1b0   :  { %v478_v7 = vsel %vm438_vm15, %v265_v3, 0  ;;  %v913_v16 = vunpack.c.l.b16 %v265_v3 }
 0x1b1   :  { %v757_v8 = vunpack.c.l.b16 %v262_v5  ;;  %2101 = vmatmul.msk.bf16.vlgmr.msrb.gmra.mxu3 %vm272_vm14, %v256_v46  ;;  %v334_v9 = vsel %vm272_vm14, %v262_v5, 0  ;;  %2102 = vmatmul.msk.bf16.vlgmr.msrb.gmra.mxu0 %vm272_vm14, %v257_v58  ;;  %v752_v22 = vunpack.c.l.b16 %v258_v17 }
 0x1b2   :  { %487 = vmatpush.bf16.msra.mxu0 %v478_v7  ;;  %343 = vmatpush.bf16.xpose.msrb.mxu1 %v334_v9  ;;  %v914_v21 = vpack.c.b16 %v913_v16, %v913_v16 }
 0x1b3   :  { %v758_v10 = vpack.c.b16 %v757_v8, %v757_v8  ;;  %v753_v23 = vpack.c.b16 %v752_v22, %v752_v22 }
 0x1b5   :  { %v252_v13 = vpop.f32.mrf.mxu2  ;;  %1114 = vrot.lane.b32.xlu0 %v2353_v41, %s2231_s2  ;;  %759 = vrot.lane.b32.xlu2 %v758_v10, %s2230_s1 }
 0x1b6   :  { %v266_v14 = vpack.c.bf16 %v252_v13, %v252_v13  ;;  %891 = vrot.lane.b32.xlu1 %v890_v11, %s2230_s1 }
 0x1b8   :  { %v497_v18 = vsel %vm438_vm15, %v266_v14, 0  ;;  %v937_v24 = vunpack.c.l.b16 %v266_v14 }
 0x1b9   :  { %2103 = vmatmul.msk.bf16.vlgmr.msrb.gmra.mxu1 %vm272_vm14, %v258_v17 }
 0x1ba   :  { %506 = vmatpush.bf16.msra.mxu1 %v497_v18  ;;  %v938_v25 = vpack.c.b16 %v937_v24, %v937_v24 }
 0x1bd   :  { %1160 = vrot.lane.b32.xlu0 %v729_v1, %s2231_s2  ;;  %867 = vrot.lane.b32.xlu2 %v866_v20, %s2230_s1 }
 0x1be   :  { %915 = vrot.lane.b32.xlu1 %v914_v21, %s2230_s1 }
 0x1c5   :  { %1137 = vrot.lane.b32.xlu2 %v700_v53, %s2231_s2  ;;  %754 = vrot.lane.b32.xlu0 %v753_v23, %s2230_s1 }
 0x1c6   :  { %1135 = vrot.lane.b32.xlu1 %v2362_v52, %s2231_s2 }
 0x1cd   :  { %1112 = vrot.lane.b32.xlu2 %v2351_v40, %s2231_s2  ;;  %1309 = vrot.lane.b32.xlu0 %v890_v11, %s2231_s2 }
 0x1ce   :  { %1158 = vrot.lane.b32.xlu1 %v724_v0, %s2231_s2 }
 0x1d5   :  { %1570 = vrot.lane.b32.xlu2 %v724_v0, %s2232_s21  ;;  %1549 = vrot.lane.b32.xlu0 %v700_v53, %s2232_s21 }
 0x1d6   :  { %1288 = vrot.lane.b32.xlu1 %v866_v20, %s2231_s2 }
 0x1dd   :  { %1742 = vrot.lane.b32.xlu2 %v914_v21, %s2232_s21  ;;  %1547 = vrot.lane.b32.xlu0 %v2362_v52, %s2232_s21 }
 0x1de   :  { %1330 = vrot.lane.b32.xlu1 %v914_v21, %s2231_s2 }
 0x1e5   :  { %1183 = vrot.lane.b32.xlu2 %v758_v10, %s2231_s2  ;;  %1700 = vrot.lane.b32.xlu0 %v866_v20, %s2232_s21 }
 0x1e6   :  { %1526 = vrot.lane.b32.xlu1 %v2353_v41, %s2232_s21 }
 0x1ed   :  { %1763 = vrot.lane.b32.xlu2 %v938_v25, %s2232_s21  ;;  %1181 = vrot.lane.b32.xlu0 %v753_v23, %s2231_s2 }
 0x1ee   :  { %1524 = vrot.lane.b32.xlu1 %v2351_v40, %s2232_s21 }
 0x1f5   :  { %1595 = vrot.lane.b32.xlu0 %v758_v10, %s2232_s21 }
 0x1f6   :  { %1572 = vrot.lane.b32.xlu1 %v729_v1, %s2232_s21 }
 0x1f7   :  { %v673_v26 = vpop.permute.xlu2 %672 }
 0x1f8   :  { %v678_v27 = vsel %vm272_vm14, %v673_v26, 0 }
 0x1f9   :  { %687 = vmatpush.bf16.xpose.msra.mxu2 %v678_v27 }
 0x1fd   :  { %939 = vrot.lane.b32.xlu0 %v938_v25, %s2230_s1 }
 0x1fe   :  { %1721 = vrot.lane.b32.xlu1 %v890_v11, %s2232_s21 }
 0x1ff   :  { %v2402_v28 = vpop.permute.xlu2 %696 }
 0x205   :  { %1351 = vrot.lane.b32.xlu0 %v938_v25, %s2231_s2 }
 0x206   :  { %1593 = vrot.lane.b32.xlu1 %v753_v23, %s2232_s21 }
 0x20f   :  { %v760_v30 = vpop.permute.xlu2 %759  ;;  %v2432_v25 = vpop.permute.xlu1 %667 }
 0x210   :  { %v765_v31 = vsel %vm272_vm14, %v760_v30, 0 }
 0x211   :  { %774 = vmatpush.bf16.xpose.msrb.mxu1 %v765_v31 }
 0x217   :  { %v702_v32 = vpop.permute.xlu0 %701  ;;  %v868_v31 = vpop.permute.xlu2 %867 }
 0x218   :  { %v707_v33 = vsel %vm272_vm14, %v702_v32, 0 }
 0x219   :  { %716 = vmatpush.bf16.xpose.msrb.mxu3 %v707_v33 }
 0x21f   :  { %v731_v37 = vpop.permute.xlu0 %730 }
 0x220   :  { %v736_v38 = vsel %vm272_vm14, %v731_v37, 0 }
 0x221   :  { %745 = vmatpush.bf16.xpose.msrb.mxu0 %v736_v38 }
 0x224   :  { %v288_v29 = vpop.f32.mrf.mxu3 }
 0x225   :  { %v351_v19 = vsel %vm2407_vm1, %v288_v29, -inf }
 0x226   :  { %v355_v40 = vsel %vm272_vm14, %v351_v19, -inf }
 0x227   :  { %v356_v41 = vrot.slane %v355_v40, 4  ;;  %v2414_v42 = vpop.permute.xlu0 %1114 }
 0x229   :  { %v357_v43 = vmax.f32 %v355_v40, %v356_v41  ;;  %v2437_v41 = vpop.permute.xlu1 %725 }
 0x22b   :  { %v358_v44 = vrot.slane %v357_v43, 2 }
 0x22c   :  { %v290_v45 = vpop.f32.mrf.mxu3 }
 0x22d   :  { %v359_v46 = vmax.f32 %v357_v43, %v358_v44 }
 0x22e   :  { %v326_v48 = vpop.f32.mrf.mxu0 }
 0x22f   :  { %v360_v47 = vrot.slane %v359_v46, 1  ;;  %v353_v49 = vsel %vm2407_vm1, %v326_v48, -inf  ;;  %v2418_v50 = vpop.permute.xlu0 %1160 }
 0x230   :  { %v369_v52 = vsel %vm272_vm14, %v353_v49, -inf }
 0x231   :  { %v361_v51 = vmax.f32 %v359_v46, %v360_v47  ;;  %v370_v53 = vrot.slane %v369_v52, 4  ;;  %v2439_v46 = vpop.permute.xlu2 %1137 }
 0x233   :  { %v383_v54 = vsub.f32 %v351_v19, %v361_v51  ;;  %v371_v55 = vmax.f32 %v369_v52, %v370_v53 }
 0x234   :  { %v307_v56 = vpop.f32.mrf.mxu3 }
 0x235   :  { %v387_v57 = vmul.f32 1.442695, %v383_v54  ;;  %v352_v58 = vsel %vm2407_vm1, %v307_v56, -inf  ;;  %v372_v59 = vrot.slane %v371_v55, 2 }
 0x236   :  { %v362_v60 = vsel %vm272_vm14, %v352_v58, -inf  ;;  %v328_v62 = vpop.f32.mrf.mxu0  ;;  %v345_v63 = vpop.f32.mrf.mxu1 }
 0x237   :  { %2165 = vpow2.f32 %v387_v57  ;;  %v363_v61 = vrot.slane %v362_v60, 4  ;;  %v373_v0 = vmax.f32 %v371_v55, %v372_v59  ;;  %v354_v1 = vsel %vm2407_vm1, %v345_v63, -inf  ;;  %v2427_v4 = vpop.permute.xlu0 %754 }
 0x238   :  { %v376_v3 = vsel %vm272_vm14, %v354_v1, -inf }
 0x239   :  { %v364_v2 = vmax.f32 %v362_v60, %v363_v61  ;;  %v374_v5 = vrot.slane %v373_v0, 1  ;;  %v377_v6 = vrot.slane %v376_v3, 4  ;;  %v892_v61 = vpop.permute.xlu1 %891 }
 0x23b   :  { %v365_v7 = vrot.slane %v364_v2, 2  ;;  %v375_v8 = vmax.f32 %v373_v0, %v374_v5  ;;  %v378_v9 = vmax.f32 %v376_v3, %v377_v6  ;;  %v2447_v6 = vpop.permute.xlu2 %1112 }
 0x23c   :  { %v309_v10 = vpop.f32.mrf.mxu3 }
 0x23d   :  { %v2166_v11 = vpop.eup %2165  ;;  %v366_v12 = vmax.f32 %v364_v2, %v365_v7  ;;  %v385_v13 = vsub.f32 %v353_v49, %v375_v8  ;;  %v379_v14 = vrot.slane %v378_v9, 2  ;;  %v873_v2 = vsel %vm438_vm15, %v868_v31, 0 }
 0x23e   :  { %v395_v15 = vsel %vm272_vm14, %v2166_v11, 0.0  ;;  %v347_v17 = vpop.f32.mrf.mxu1 }
 0x23f   :  { %v367_v16 = vrot.slane %v366_v12, 1  ;;  %v396_v18 = vrot.slane %v395_v15, 4  ;;  %v391_v20 = vmul.f32 1.442695, %v385_v13  ;;  %v380_v21 = vmax.f32 %v378_v9, %v379_v14  ;;  %v2430_v23 = vpop.permute.xlu0 %1309 }
 0x241   :  { %v368_v22 = vmax.f32 %v366_v12, %v367_v16  ;;  %v397_v24 = vadd.f32 %v396_v18, %v395_v15  ;;  %2167 = vpow2.f32 %v391_v20  ;;  %v381_v26 = vrot.slane %v380_v21, 1  ;;  %v916_v14 = vpop.permute.xlu1 %915 }
 0x242   :  { %v921_v17 = vsel %vm438_vm15, %v916_v14, 0 }
 0x243   :  { %v384_v27 = vsub.f32 %v352_v58, %v368_v22  ;;  %v398_v30 = vrot.slane %v397_v24, 2  ;;  %v382_v32 = vmax.f32 %v380_v21, %v381_v26  ;;  %v2455_v20 = vpop.permute.xlu2 %1570 }
 0x245   :  { %v389_v33 = vmul.f32 1.442695, %v384_v27  ;;  %v399_v34 = vadd.f32 %v398_v30, %v397_v24  ;;  %v386_v35 = vsub.f32 %v354_v1, %v382_v32  ;;  %v897_v27 = vsel %vm438_vm15, %v892_v61, 0 }
 0x246   :  { %v1120_v30 = vsel %vm272_vm14, %v2414_v42, 0 }
 0x247   :  { %2169 = vpow2.f32 %v389_v33  ;;  %v400_v36 = vrot.slane %v399_v34, 1  ;;  %v2168_v37 = vpop.eup %2167  ;;  %v393_v38 = vmul.f32 1.442695, %v386_v35  ;;  %v2434_v29 = vpop.permute.xlu0 %1549 }
 0x248   :  { %v409_v40 = vsel %vm272_vm14, %v2168_v37, 0.0 }
 0x249   :  { %v401_v19 = vadd.f32 %v400_v36, %v399_v34  ;;  %2171 = vpow2.f32 %v393_v38  ;;  %v410_v43 = vrot.slane %v409_v40, 4  ;;  %v1166_v34 = vsel %vm272_vm14, %v2418_v50, 0  ;;  %v2480_v50 = vpop.permute.xlu1 %1135 }
 0x24b   :  { %2173 = vrcp.f32 %v401_v19  ;;  %512 = vxpose.xlu2.b32.start.end [1/1] (short) (narrow) %v401_v19, 8  ;;  %v411_v44 = vadd.f32 %v410_v43, %v409_v40  ;;  %v2466_v33 = vpop.permute.xlu2 %1742 }
 0x24d   :  { %v2170_v45 = vpop.eup %2169  ;;  %v412_v47 = vrot.slane %v411_v44, 2 }
 0x24e   :  { %v402_v48 = vsel %vm272_vm14, %v2170_v45, 0.0 }
 0x24f   :  { %v403_v49 = vrot.slane %v402_v48, 4  ;;  %v2172_v51 = vpop.eup %2171  ;;  %v413_v52 = vadd.f32 %v412_v47, %v411_v44  ;;  %v2442_v54 = vpop.permute.xlu0 %1547 }
 0x250   :  { %v416_v56 = vsel %vm272_vm14, %v2172_v51, 0.0 }
 0x251   :  { %v2174_v53 = vpop.eup %2173  ;;  %v404_v55 = vadd.f32 %v403_v49, %v402_v48  ;;  %v414_v57 = vrot.slane %v413_v52, 1  ;;  %v417_v59 = vrot.slane %v416_v56, 4  ;;  %v2482_v38 = vpop.permute.xlu1 %1158 }
 0x252   :  { %v427_v58 = vmul.f32 %v2174_v53, %v2166_v11 }
 0x253   :  { %v405_v60 = vrot.slane %v404_v55, 2  ;;  %v415_v62 = vadd.f32 %v414_v57, %v413_v52  ;;  %v418_v0 = vadd.f32 %v417_v59, %v416_v56  ;;  %v1184_v36 = vpop.permute.xlu2 %1183 }
 0x254   :  { %v431_v63 = vpack.c.bf16 %v427_v58, %v427_v58 }
 0x255   :  { %v406_v1 = vadd.f32 %v405_v60, %v404_v55  ;;  %2175 = vrcp.f32 %v415_v62  ;;  %576 = vxpose.xlu1.b32.start.end [1/1] (short) (narrow) %v415_v62, 8  ;;  %v419_v3 = vrot.slane %v418_v0, 2 }
 0x256   :  { %2104 = vmatmul.msk.bf16.vlgmr.msrb.gmra.mxu2 %vm272_vm14, %v431_v63 }
 0x257   :  { %882 = vmatpush.bf16.msrb.mxu2 %v873_v2  ;;  %v407_v5 = vrot.slane %v406_v1, 1  ;;  %v420_v7 = vadd.f32 %v419_v3, %v418_v0  ;;  %v2449_v8 = vpop.permute.xlu0 %1700 }
 0x259   :  { %v408_v9 = vadd.f32 %v407_v5, %v406_v1  ;;  %v421_v10 = vrot.slane %v420_v7, 1  ;;  %v2484_v19 = vpop.permute.xlu1 %1288 }
 0x25b   :  { %2177 = vrcp.f32 %v408_v9  ;;  %544 = vxpose.xlu0.b32.start.end [1/1] (short) (narrow) %v408_v9, 8  ;;  %v2176_v11 = vpop.eup %2175  ;;  %v422_v12 = vadd.f32 %v421_v10, %v420_v7 }
 0x25c   :  { %v429_v13 = vmul.f32 %v2176_v11, %v2168_v37  ;;  %v1189_v37 = vsel %vm272_vm14, %v1184_v36, 0 }
 0x25d   :  { %2179 = vrcp.f32 %v422_v12 }
 0x25e   :  { %v433_v15 = vpack.c.bf16 %v429_v13, %v429_v13 }
 0x25f   :  { %v2452_v18 = vpop.permute.xlu0 %1181 }
 0x260   :  { %2106 = vmatmul.msk.bf16.vlgmr.msra.gmra.mxu0 %vm272_vm14, %v433_v15 }
 0x261   :  { %v2178_v16 = vpop.eup %2177  ;;  %930 = vmatpush.bf16.msra.mxu0 %v921_v17  ;;  %v2486_v40 = vpop.permute.xlu1 %1330 }
 0x262   :  { %v428_v21 = vmul.f32 %v2178_v16, %v2170_v45 }
 0x263   :  { %608 = vxpose.xlu0.b32.start.end [1/1] (short) (narrow) %v422_v12, 8  ;;  %v2180_v22 = vpop.eup %2179 }
 0x264   :  { %v432_v24 = vpack.c.bf16 %v428_v21, %v428_v21  ;;  %v430_v26 = vmul.f32 %v2180_v22, %v2172_v51 }
 0x266   :  { %2105 = vmatmul.msk.bf16.vlgmr.msra.gmra.mxu3 %vm272_vm14, %v432_v24  ;;  %2108 = vmatmul.msk.bf16.vlgmr.msra.gmra.mxu2 %vm272_vm14, %v2432_v25  ;;  %v434_v31 = vpack.c.bf16 %v430_v26, %v430_v26  ;;  %v1143_v25 = vsel %vm272_vm14, %v2439_v46, 0 }
 0x267   :  { %906 = vmatpush.bf16.msra.mxu3 %v897_v27  ;;  %1129 = vmatpush.bf16.xpose.msra.mxu2 %v1120_v30  ;;  %v2463_v32 = vpop.permute.xlu0 %1595 }
 0x268   :  { %2107 = vmatmul.msk.bf16.vlgmr.msra.gmra.mxu1 %vm272_vm14, %v434_v31 }
 0x269   :  { %v2488_v43 = vpop.permute.xlu1 %1526 }
 0x26f   :  { %v940_v35 = vpop.permute.xlu0 %939 }
 0x270   :  { %2110 = vmatmul.msk.bf16.vlgmr.msrb.gmra.mxu0 %vm272_vm14, %v2437_v41  ;;  %v945_v42 = vsel %vm438_vm15, %v940_v35, 0  ;;  %v2233_v41 = vmov 0  }
 0x271   :  { %1175 = vmatpush.bf16.xpose.msrb.mxu0 %v1166_v34  ;;  %954 = vmatpush.bf16.msra.mxu1 %v945_v42 }
 0x276   :  { %2109 = vmatmul.msk.bf16.vlgmr.msrb.gmra.mxu3 %vm272_vm14, %v2402_v28  ;;  %v2490_v28 = vpop.permute.xlu1 %1524 }
 0x277   :  { %1152 = vmatpush.bf16.xpose.msrb.mxu3 %v1143_v25  ;;  %v2517_v15 = vpop.permute.xlu0 %1351 }
 0x278   :  { %2111 = vmatmul.msk.bf16.vlgmr.msrb.gmra.mxu1 %vm272_vm14, %v2427_v4  ;;  %v2494_v4 = vpop.permute.xlu2 %1763 }
 0x279   :  { %1198 = vmatpush.bf16.xpose.msrb.mxu1 %v1189_v37 }
 0x27e   :  { %v2496_v45 = vpop.permute.xlu1 %1572 }
 0x286   :  { %v2505_v52 = vpop.permute.xlu1 %1721 }
 0x28e   :  { %v2515_v5 = vpop.permute.xlu1 %1593 }
 0x2a8   :  { %2152 = vset.pattern.permute.xlu1 %v2233_v41 }
 0x2ad   :  { %2151 = vset.pattern.permute.xlu2 %v2233_v41 }
 0x2ca   :  { %2150 = vset.pattern.permute.xlu0 %v2233_v41 }
 0x2d9   :  { %v2492_v44 = vpop.f32.mrf.mxu2 }
 0x2dd   :  { %v2498_v46 = vpop.f32.mrf.mxu0 }
 0x2e1   :  { %v453_v47 = vpop.f32.mrf.mxu2 }
 0x2e4   :  { %v2500_v48 = vpop.trf.xlu2 }
 0x2e5   :  { %642 = vperm.xlu0 %2150, %v2500_v48   ;;  %v491_v49 = vpop.f32.mrf.mxu0  ;;  %v2503_v51 = vpop.f32.mrf.mxu1 }
 0x2e9   :  { %v2507_v53 = vpop.f32.mrf.mxu3  ;;  %v689_v55 = vpop.f32.mrf.mxu2 }
 0x2ea   :  { %v780_v56 = vsel %vm2407_vm1, %v689_v55, -inf }
 0x2eb   :  { %v784_v57 = vsel %vm272_vm14, %v780_v56, -inf }
 0x2ec   :  { %v785_v58 = vrot.slane %v784_v57, 4 }
 0x2ed   :  { %v510_v60 = vpop.f32.mrf.mxu1  ;;  %v747_v61 = vpop.f32.mrf.mxu0 }
 0x2ee   :  { %v786_v59 = vmax.f32 %v784_v57, %v785_v58  ;;  %v782_v62 = vsel %vm2407_vm1, %v747_v61, -inf }
 0x2ef   :  { %v798_v0 = vsel %vm272_vm14, %v782_v62, -inf }
 0x2f0   :  { %v787_v63 = vrot.slane %v786_v59, 2  ;;  %v799_v1 = vrot.slane %v798_v0, 4 }
 0x2f1   :  { %v472_v2 = vpop.f32.mrf.mxu3  ;;  %v691_v3 = vpop.f32.mrf.mxu2 }
 0x2f2   :  { %v788_v7 = vmax.f32 %v786_v59, %v787_v63  ;;  %v800_v9 = vmax.f32 %v798_v0, %v799_v1 }
 0x2f4   :  { %v789_v10 = vrot.slane %v788_v7, 1  ;;  %v801_v11 = vrot.slane %v800_v9, 2 }
 0x2f5   :  { %v749_v13 = vpop.f32.mrf.mxu0  ;;  %v776_v14 = vpop.f32.mrf.mxu1 }
 0x2f6   :  { %v790_v12 = vmax.f32 %v788_v7, %v789_v10  ;;  %v802_v16 = vmax.f32 %v800_v9, %v801_v11  ;;  %v783_v17 = vsel %vm2407_vm1, %v776_v14, -inf }
 0x2f7   :  { %v805_v22 = vsel %vm272_vm14, %v783_v17, -inf }
 0x2f8   :  { %v812_v21 = vsub.f32 %v780_v56, %v790_v12  ;;  %v803_v24 = vrot.slane %v802_v16, 1  ;;  %v806_v26 = vrot.slane %v805_v22, 4 }
 0x2f9   :  { %v718_v27 = vpop.f32.mrf.mxu3  ;;  %v2522_v31 = vpop.trf.xlu1 }
 0x2fa   :  { %v816_v30 = vmul.f32 1.442695, %v812_v21  ;;  %v781_v34 = vsel %vm2407_vm1, %v718_v27, -inf  ;;  %v804_v35 = vmax.f32 %v802_v16, %v803_v24  ;;  %v807_v42 = vmax.f32 %v805_v22, %v806_v26  ;;  %652 = vperm.xlu2 %2151, %v2522_v31  }
 0x2fb   :  { %v791_v25 = vsel %vm272_vm14, %v781_v34, -inf }
 0x2fc   :  { %2181 = vpow2.f32 %v816_v30  ;;  %v792_v36 = vrot.slane %v791_v25, 4  ;;  %v814_v37 = vsub.f32 %v782_v62, %v804_v35  ;;  %v808_v41 = vrot.slane %v807_v42, 2 }
 0x2fd   :  { %v778_v49 = vpop.f32.mrf.mxu1 }
 0x2fe   :  { %v793_v47 = vmax.f32 %v791_v25, %v792_v36  ;;  %v820_v55 = vmul.f32 1.442695, %v814_v37  ;;  %v809_v56 = vmax.f32 %v807_v42, %v808_v41 }
 0x2ff   :  { %v2528_v57 = vpop.trf.xlu0 }
 0x300   :  { %v794_v58 = vrot.slane %v793_v47, 2  ;;  %647 = vperm.xlu1 %2152, %v2528_v57   ;;  %2183 = vpow2.f32 %v820_v55  ;;  %v810_v59 = vrot.slane %v809_v56, 1 }
 0x301   :  { %v720_v60 = vpop.f32.mrf.mxu3 }
 0x302   :  { %v2182_v61 = vpop.eup %2181  ;;  %v795_v63 = vmax.f32 %v793_v47, %v794_v58  ;;  %v811_v1 = vmax.f32 %v809_v56, %v810_v59 }
 0x303   :  { %v824_v0 = vsel %vm272_vm14, %v2182_v61, 0.0 }
 0x304   :  { %v825_v2 = vrot.slane %v824_v0, 4  ;;  %v796_v62 = vrot.slane %v795_v63, 1  ;;  %v815_v3 = vsub.f32 %v783_v17, %v811_v1 }
 0x306   :  { %v826_v7 = vadd.f32 %v825_v2, %v824_v0  ;;  %v797_v9 = vmax.f32 %v795_v63, %v796_v62  ;;  %v2184_v10 = vpop.eup %2183  ;;  %v822_v11 = vmul.f32 1.442695, %v815_v3 }
 0x307   :  { %v2532_v12 = vpop.trf.xlu0  ;;  %v838_v14 = vsel %vm272_vm14, %v2184_v10, 0.0 }
 0x308   :  { %v827_v13 = vrot.slane %v826_v7, 2  ;;  %v813_v16 = vsub.f32 %v781_v34, %v797_v9  ;;  %657 = vperm.xlu2 %2151, %v2532_v12   ;;  %v839_v21 = vrot.slane %v838_v14, 4  ;;  %2185 = vpow2.f32 %v822_v11 }
 0x30a   :  { %v828_v22 = vadd.f32 %v827_v13, %v826_v7  ;;  %v818_v24 = vmul.f32 1.442695, %v813_v16  ;;  %v840_v26 = vadd.f32 %v839_v21, %v838_v14  ;;  %v1294_v7 = vsel %vm438_vm15, %v2484_v19, 0 }
 0x30c   :  { %v829_v27 = vrot.slane %v828_v22, 1  ;;  %2187 = vpow2.f32 %v818_v24  ;;  %v841_v17 = vrot.slane %v840_v26, 2 }
 0x30e   :  { %v830_v30 = vadd.f32 %v829_v27, %v828_v22  ;;  %v2186_v35 = vpop.eup %2185  ;;  %v842_v42 = vadd.f32 %v841_v17, %v840_v26  ;;  %v1357_v27 = vsel %vm438_vm15, %v2517_v15, 0  ;;  %v1315_v17 = vsel %vm438_vm15, %v2430_v23, 0 }
 0x30f   :  { %v845_v25 = vsel %vm272_vm14, %v2186_v35, 0.0  ;;  %v1578_v15 = vsel %vm272_vm14, %v2496_v45, 0  ;;  %v1601_v23 = vsel %vm272_vm14, %v2463_v32, 0 }
 0x310   :  { %2189 = vrcp.f32 %v830_v30  ;;  %v846_v36 = vrot.slane %v845_v25, 4  ;;  %v843_v37 = vrot.slane %v842_v42, 1 }
 0x312   :  { %v2188_v41 = vpop.eup %2187  ;;  %v847_v34 = vadd.f32 %v846_v36, %v845_v25  ;;  %v844_v49 = vadd.f32 %v843_v37, %v842_v42 }
 0x313   :  { %v831_v47 = vsel %vm272_vm14, %v2188_v41, 0.0 }
 0x314   :  { %v832_v55 = vrot.slane %v831_v47, 4  ;;  %v848_v56 = vrot.slane %v847_v34, 2  ;;  %1024 = vxpose.xlu0.b32.start.end [1/1] (short) (narrow) %v844_v49, 8  ;;  %2191 = vrcp.f32 %v844_v49 }
 0x316   :  { %v2190_v58 = vpop.eup %2189  ;;  %v833_v59 = vadd.f32 %v832_v55, %v831_v47  ;;  %v849_v63 = vadd.f32 %v848_v56, %v847_v34 }
 0x317   :  { %v856_v60 = vmul.f32 %v2190_v58, %v2182_v61  ;;  %v1336_v61 = vsel %vm438_vm15, %v2486_v40, 0  ;;  %v1532_v40 = vsel %vm272_vm14, %v2488_v43, 0 }
 0x318   :  { %v834_v0 = vrot.slane %v833_v59, 2  ;;  %v850_v2 = vrot.slane %v849_v63, 1 }
 0x319   :  { %v860_v1 = vpack.c.bf16 %v856_v60, %v856_v60 }
 0x31a   :  { %v835_v62 = vadd.f32 %v834_v0, %v833_v59  ;;  %v2192_v3 = vpop.eup %2191  ;;  %v851_v9 = vadd.f32 %v850_v2, %v849_v63 }
 0x31b   :  { %2112 = vmatmul.msk.bf16.vlgmr.msrb.gmra.mxu2 %vm272_vm14, %v860_v1  ;;  %v858_v13 = vmul.f32 %v2192_v3, %v2184_v10 }
 0x31c   :  { %v836_v11 = vrot.slane %v835_v62, 1  ;;  %1303 = vmatpush.bf16.msrb.mxu2 %v1294_v7  ;;  %2193 = vrcp.f32 %v851_v9 }
 0x31d   :  { %v862_v16 = vpack.c.bf16 %v858_v13, %v858_v13 }
 0x31e   :  { %v837_v14 = vadd.f32 %v836_v11, %v835_v62 }
 0x31f   :  { %2114 = vmatmul.msk.bf16.vlgmr.msra.gmra.mxu0 %vm272_vm14, %v862_v16 }
 0x320   :  { %2195 = vrcp.f32 %v837_v14  ;;  %1345 = vmatpush.bf16.msra.mxu0 %v1336_v61 }
 0x322   :  { %v2194_v21 = vpop.eup %2193 }
 0x323   :  { %v859_v22 = vmul.f32 %v2194_v21, %v2186_v35 }
 0x325   :  { %v863_v19 = vpack.c.bf16 %v859_v22, %v859_v22 }
 0x326   :  { %v2196_v24 = vpop.eup %2195 }
 0x327   :  { %v857_v26 = vmul.f32 %v2196_v24, %v2188_v41  ;;  %2115 = vmatmul.msk.bf16.vlgmr.msra.gmra.mxu1 %vm272_vm14, %v863_v19 }
 0x328   :  { %1366 = vmatpush.bf16.msra.mxu1 %v1357_v27 }
 0x329   :  { %v861_v10 = vpack.c.bf16 %v857_v26, %v857_v26 }
 0x32b   :  { %2113 = vmatmul.msk.bf16.vlgmr.msra.gmra.mxu3 %vm272_vm14, %v861_v10  ;;  %2116 = vmatmul.msk.bf16.vlgmr.msra.gmra.mxu2 %vm272_vm14, %v2447_v6  ;;  %v1555_v6 = vsel %vm272_vm14, %v2434_v29, 0 }
 0x32c   :  { %1324 = vmatpush.bf16.msra.mxu3 %v1315_v17  ;;  %1541 = vmatpush.bf16.xpose.msra.mxu2 %v1532_v40 }
 0x32e   :  { %960 = vxpose.xlu2.b32.start.end [1/1] (short) (narrow) %v830_v30, 8 }
 0x32f   :  { %2118 = vmatmul.msk.bf16.vlgmr.msrb.gmra.mxu0 %vm272_vm14, %v2482_v38 }
 0x330   :  { %1587 = vmatpush.bf16.xpose.msrb.mxu0 %v1578_v15 }
 0x335   :  { %992 = vxpose.xlu1.b32.start.end [1/1] (short) (narrow) %v837_v14, 8 }
 0x336   :  { %1056 = vxpose.xlu2.b32.start.end [1/1] (short) (narrow) %v851_v9, 8 }
 0x337   :  { %2119 = vmatmul.msk.bf16.vlgmr.msrb.gmra.mxu1 %vm272_vm14, %v2452_v18 }
 0x338   :  { %1610 = vmatpush.bf16.xpose.msrb.mxu1 %v1601_v23 }
 0x33b   :  { %2117 = vmatmul.msk.bf16.vlgmr.msrb.gmra.mxu3 %vm272_vm14, %v2480_v50 }
 0x33c   :  { %1564 = vmatpush.bf16.xpose.msrb.mxu3 %v1555_v6 }
 0x354   :  { %v2584_v62 = vpop.permute.xlu2 %652 }
 0x357   :  { %v2580_v34 = vpop.permute.xlu0 %642 }
 0x362   :  { %v2591_v40 = vpop.permute.xlu2 %657 }
 0x39c   :  { %v2566_v43 = vpop.f32.mrf.mxu0 }
 0x39e   :  { %v2568_v38 = vpop.f32.mrf.mxu2 }
 0x3a4   :  { %v934_v45 = vpop.f32.mrf.mxu0  ;;  %v2570_v30 = vpop.f32.mrf.mxu1 }
 0x3a6   :  { %v886_v35 = vpop.f32.mrf.mxu2 }
 0x3ac   :  { %v958_v32 = vpop.f32.mrf.mxu1  ;;  %v1177_v42 = vpop.f32.mrf.mxu0 }
 0x3ad   :  { %v1206_v18 = vsel %vm2407_vm1, %v1177_v42, -inf }
 0x3ae   :  { %v2574_v25 = vpop.f32.mrf.mxu3  ;;  %v1131_v29 = vpop.f32.mrf.mxu2  ;;  %v1222_v36 = vsel %vm272_vm14, %v1206_v18, -inf }
 0x3af   :  { %v1204_v50 = vsel %vm2407_vm1, %v1131_v29, -inf  ;;  %v1223_v37 = vrot.slane %v1222_v36, 4 }
 0x3b0   :  { %v1208_v41 = vsel %vm272_vm14, %v1204_v50, -inf }
 0x3b1   :  { %v1209_v47 = vrot.slane %v1208_v41, 4  ;;  %v1224_v49 = vmax.f32 %v1222_v36, %v1223_v37 }
 0x3b3   :  { %v1210_v55 = vmax.f32 %v1208_v41, %v1209_v47  ;;  %v1225_v56 = vrot.slane %v1224_v49, 2 }
 0x3b4   :  { %v1179_v59 = vpop.f32.mrf.mxu0  ;;  %v1200_v60 = vpop.f32.mrf.mxu1 }
 0x3b5   :  { %v1211_v58 = vrot.slane %v1210_v55, 2  ;;  %v1226_v63 = vmax.f32 %v1224_v49, %v1225_v56  ;;  %v1207_v0 = vsel %vm2407_vm1, %v1200_v60, -inf }
 0x3b6   :  { %v910_v1 = vpop.f32.mrf.mxu3  ;;  %v1133_v2 = vpop.f32.mrf.mxu2  ;;  %v1229_v7 = vsel %vm272_vm14, %v1207_v0, -inf }
 0x3b7   :  { %v1212_v3 = vmax.f32 %v1210_v55, %v1211_v58  ;;  %v1227_v9 = vrot.slane %v1226_v63, 1  ;;  %v1230_v11 = vrot.slane %v1229_v7, 4 }
 0x3b8   :  { %v2587_v14 = vpop.trf.xlu0 }
 0x3b9   :  { %v1213_v13 = vrot.slane %v1212_v3, 1  ;;  %v1228_v16 = vmax.f32 %v1226_v63, %v1227_v9  ;;  %v1231_v61 = vmax.f32 %v1229_v7, %v1230_v11  ;;  %2006 = vrot.lane.b32.xlu0 %v2587_v14, %s2234_s22 }
 0x3bb   :  { %v1214_v21 = vmax.f32 %v1212_v3, %v1213_v13  ;;  %v1238_v22 = vsub.f32 %v1206_v18, %v1228_v16  ;;  %v1232_v24 = vrot.slane %v1231_v61, 2 }
 0x3bc   :  { %v1202_v26 = vpop.f32.mrf.mxu1 }
 0x3bd   :  { %v1236_v19 = vsub.f32 %v1204_v50, %v1214_v21  ;;  %v1244_v27 = vmul.f32 1.442695, %v1238_v22  ;;  %v1233_v10 = vmax.f32 %v1231_v61, %v1232_v24 }
 0x3be   :  { %v1154_v17 = vpop.f32.mrf.mxu3 }
 0x3bf   :  { %v1240_v15 = vmul.f32 1.442695, %v1236_v19  ;;  %v1205_v23 = vsel %vm2407_vm1, %v1154_v17, -inf  ;;  %2197 = vpow2.f32 %v1244_v27  ;;  %v1234_v6 = vrot.slane %v1233_v10, 1  ;;  %v2600_v19 = vpop.permute.xlu1 %647 }
 0x3c0   :  { %v1215_v45 = vsel %vm272_vm14, %v1205_v23, -inf }
 0x3c1   :  { %2199 = vpow2.f32 %v1240_v15  ;;  %v1216_v35 = vrot.slane %v1215_v45, 4  ;;  %v1235_v32 = vmax.f32 %v1233_v10, %v1234_v6 }
 0x3c3   :  { %v1217_v42 = vmax.f32 %v1215_v45, %v1216_v35  ;;  %v1239_v18 = vsub.f32 %v1207_v0, %v1235_v32 }
 0x3c5   :  { %v1218_v29 = vrot.slane %v1217_v42, 2  ;;  %v2198_v36 = vpop.eup %2197  ;;  %v1246_v50 = vmul.f32 1.442695, %v1239_v18 }
 0x3c6   :  { %v1156_v37 = vpop.f32.mrf.mxu3  ;;  %v1262_v47 = vsel %vm272_vm14, %v2198_v36, 0.0 }
 0x3c7   :  { %v2200_v41 = vpop.eup %2199  ;;  %v1219_v49 = vmax.f32 %v1217_v42, %v1218_v29  ;;  %v976_v55 = vpop.trf.xlu2  ;;  %v1263_v56 = vrot.slane %v1262_v47, 4  ;;  %2201 = vpow2.f32 %v1246_v50 }
 0x3c8   :  { %v1248_v58 = vsel %vm272_vm14, %v2200_v41, 0.0  ;;  %1090 = vperm.xlu2 %2151, %v976_v55  }
 0x3c9   :  { %v1249_v59 = vrot.slane %v1248_v58, 4  ;;  %v1220_v60 = vrot.slane %v1219_v49, 1  ;;  %v1264_v63 = vadd.f32 %v1263_v56, %v1262_v47 }
 0x3cb   :  { %v1250_v1 = vadd.f32 %v1249_v59, %v1248_v58  ;;  %v1221_v2 = vmax.f32 %v1219_v49, %v1220_v60  ;;  %v1265_v0 = vrot.slane %v1264_v63, 2  ;;  %v1748_v59 = vsel %vm438_vm15, %v2466_v33, 0 }
 0x3cc   :  { %v1769_v33 = vsel %vm438_vm15, %v2494_v4, 0 }
 0x3cd   :  { %v1251_v3 = vrot.slane %v1250_v1, 2  ;;  %v1237_v7 = vsub.f32 %v1205_v23, %v1221_v2  ;;  %v2202_v9 = vpop.eup %2201  ;;  %v1266_v11 = vadd.f32 %v1265_v0, %v1264_v63 }
 0x3ce   :  { %v1269_v16 = vsel %vm272_vm14, %v2202_v9, 0.0 }
 0x3cf   :  { %v1252_v13 = vadd.f32 %v1251_v3, %v1250_v1  ;;  %v1242_v61 = vmul.f32 1.442695, %v1237_v7  ;;  %v1072_v21 = vpop.trf.xlu2  ;;  %v1267_v22 = vrot.slane %v1266_v11, 1  ;;  %v1270_v24 = vrot.slane %v1269_v16, 4 }
 0x3d0   :  { %2002 = vrot.lane.b32.xlu2 %v976_v55, %s2234_s22  ;;  %1105 = vperm.xlu1 %2152, %v1072_v21   ;;  %v1727_v7 = vsel %vm438_vm15, %v2505_v52, 0 }
 0x3d1   :  { %v1253_v26 = vrot.slane %v1252_v13, 1  ;;  %2203 = vpow2.f32 %v1242_v61  ;;  %v1268_v27 = vadd.f32 %v1267_v22, %v1266_v11  ;;  %v1271_v10 = vadd.f32 %v1270_v24, %v1269_v16 }
 0x3d3   :  { %v2602_v17 = vadd.f32 %v1253_v26, %v1252_v13  ;;  %2205 = vrcp.f32 %v1268_v27  ;;  %v1272_v15 = vrot.slane %v1271_v10, 2 }
 0x3d5   :  { %2207 = vrcp.f32 %v2602_v17  ;;  %v1273_v23 = vadd.f32 %v1272_v15, %v1271_v10 }
 0x3d7   :  { %v2204_v6 = vpop.eup %2203  ;;  %v1274_v45 = vrot.slane %v1273_v23, 1 }
 0x3d8   :  { %v1255_v35 = vsel %vm272_vm14, %v2204_v6, 0.0  ;;  %1100 = vperm.xlu2 %2151, %v2587_v14   ;;  %v1706_v14 = vsel %vm438_vm15, %v2449_v8, 0 }
 0x3d9   :  { %v1256_v32 = vrot.slane %v1255_v35, 4  ;;  %v1008_v42 = vpop.trf.xlu1  ;;  %v2206_v18 = vpop.eup %2205  ;;  %v1275_v29 = vadd.f32 %v1274_v45, %v1273_v23 }
 0x3da   :  { %2004 = vrot.lane.b32.xlu1 %v1008_v42, %s2234_s22  ;;  %v1282_v37 = vmul.f32 %v2206_v18, %v2198_v36 }
 0x3db   :  { %v2208_v50 = vpop.eup %2207  ;;  %v1257_v47 = vadd.f32 %v1256_v32, %v1255_v35  ;;  %2209 = vrcp.f32 %v1275_v29 }
 0x3dc   :  { %v1280_v49 = vmul.f32 %v2208_v50, %v2200_v41  ;;  %v1286_v55 = vpack.c.bf16 %v1282_v37, %v1282_v37 }
 0x3dd   :  { %v1258_v56 = vrot.slane %v1257_v47, 2 }
 0x3de   :  { %v1284_v58 = vpack.c.bf16 %v1280_v49, %v1280_v49  ;;  %2122 = vmatmul.msk.bf16.vlgmr.msra.gmra.mxu0 %vm272_vm14, %v1286_v55 }
 0x3df   :  { %v1259_v60 = vadd.f32 %v1258_v56, %v1257_v47  ;;  %1757 = vmatpush.bf16.msra.mxu0 %v1748_v59 }
 0x3e0   :  { %2120 = vmatmul.msk.bf16.vlgmr.msrb.gmra.mxu2 %vm272_vm14, %v1284_v58  ;;  %2008 = vrot.lane.b32.xlu2 %v1072_v21, %s2234_s22 }
 0x3e1   :  { %v1260_v63 = vrot.slane %v1259_v60, 1  ;;  %1715 = vmatpush.bf16.msrb.mxu2 %v1706_v14  ;;  %v2210_v36 = vpop.eup %2209 }
 0x3e2   :  { %v1283_v41 = vmul.f32 %v2210_v36, %v2202_v9 }
 0x3e3   :  { %v1261_v1 = vadd.f32 %v1260_v63, %v1259_v60 }
 0x3e4   :  { %v1287_v2 = vpack.c.bf16 %v1283_v41, %v1283_v41 }
 0x3e5   :  { %2211 = vrcp.f32 %v1261_v1 }
 0x3e6   :  { %2123 = vmatmul.msk.bf16.vlgmr.msra.gmra.mxu1 %vm272_vm14, %v1287_v2 }
 0x3e7   :  { %1778 = vmatpush.bf16.msra.mxu1 %v1769_v33 }
 0x3e8   :  { %1095 = vperm.xlu2 %2151, %v1008_v42  }
 0x3eb   :  { %v2212_v8 = vpop.eup %2211 }
 0x3ec   :  { %v1281_v0 = vmul.f32 %v2212_v8, %v2204_v6 }
 0x3ee   :  { %v1285_v3 = vpack.c.bf16 %v1281_v0, %v1281_v0  ;;  %2126 = vmatmul.msk.bf16.vlgmr.msrb.gmra.mxu0 %vm272_vm14, %v2455_v20 }
 0x3f0   :  { %2121 = vmatmul.msk.bf16.vlgmr.msra.gmra.mxu3 %vm272_vm14, %v1285_v3  ;;  %2124 = vmatmul.msk.bf16.vlgmr.msra.gmra.mxu2 %vm272_vm14, %v2490_v28 }
 0x3f1   :  { %1736 = vmatpush.bf16.msra.mxu3 %v1727_v7 }
 0x3f6   :  { %2127 = vmatmul.msk.bf16.vlgmr.msrb.gmra.mxu1 %vm272_vm14, %v2515_v5 }
 0x400   :  { %2125 = vmatmul.msk.bf16.vlgmr.msrb.gmra.mxu3 %vm272_vm14, %v2442_v54 }
 0x40e   :  { %1404 = vxpose.xlu2.b32.start.end [1/1] (short) (narrow) %v1261_v1, 8 }
 0x422   :  { %v1091_v4 = vpop.permute.xlu2 %1090 }
 0x423   :  { %v1108_v9 = vmul.f32 %v1091_v4, %v2568_v38 }
 0x425   :  { %1940 = vrot.lane.b32.xlu1 %v1108_v9, %s2235_s23 }
 0x42a   :  { %v2631_v20 = vpop.permute.xlu2 %2002 }
 0x432   :  { %v2633_v52 = vpop.permute.xlu2 %1100 }
 0x43a   :  { %v2635_v11 = vpop.permute.xlu2 %2008 }
 0x442   :  { %v1096_v28 = vpop.permute.xlu2 %1095 }
 0x443   :  { %v1109_v13 = vmul.f32 %v1096_v28, %v2574_v25 }
 0x445   :  { %1942 = vrot.lane.b32.xlu0 %v1109_v13, %s2235_s23 }
 0x45a   :  { %1436 = vxpose.xlu1.b32.start.end [1/1] (short) (narrow) %v1268_v27, 8 }
 0x45b   :  { %v2639_v54 = vpop.f32.mrf.mxu0 }
 0x463   :  { %v2641_v5 = vpop.f32.mrf.mxu2  ;;  %v1349_v38 = vpop.f32.mrf.mxu0 }
 0x464   :  { %v2643_v16 = vpop.f32.mrf.mxu1 }
 0x467   :  { %1372 = vxpose.xlu0.b32.start.end [1/1] (short) (narrow) %v2602_v17, 8 }
 0x46b   :  { %v1307_v61 = vpop.f32.mrf.mxu2  ;;  %v1589_v22 = vpop.f32.mrf.mxu0 }
 0x46c   :  { %v1370_v21 = vpop.f32.mrf.mxu1  ;;  %v1618_v24 = vsel %vm2407_vm1, %v1589_v22, -inf }
 0x46d   :  { %v1634_v25 = vsel %vm272_vm14, %v1618_v24, -inf }
 0x46e   :  { %v1635_v26 = vrot.slane %v1634_v25, 4 }
 0x46f   :  { %1468 = vxpose.xlu0.b32.start.end [1/1] (short) (narrow) %v1275_v29, 8 }
 0x470   :  { %v1636_v27 = vmax.f32 %v1634_v25, %v1635_v26 }
 0x472   :  { %v1637_v10 = vrot.slane %v1636_v27, 2 }
 0x473   :  { %v2649_v15 = vpop.f32.mrf.mxu3  ;;  %v1543_v23 = vpop.f32.mrf.mxu2 }
 0x474   :  { %v1616_v6 = vsel %vm2407_vm1, %v1543_v23, -inf  ;;  %v1591_v45 = vpop.f32.mrf.mxu0  ;;  %v1612_v17 = vpop.f32.mrf.mxu1  ;;  %v1638_v35 = vmax.f32 %v1636_v27, %v1637_v10 }
 0x475   :  { %v1620_v32 = vsel %vm272_vm14, %v1616_v6, -inf  ;;  %v1619_v42 = vsel %vm2407_vm1, %v1612_v17, -inf }
 0x476   :  { %v1621_v18 = vrot.slane %v1620_v32, 4  ;;  %v1641_v50 = vsel %vm272_vm14, %v1619_v42, -inf  ;;  %v1639_v29 = vrot.slane %v1638_v35, 1 }
 0x477   :  { %v1642_v37 = vrot.slane %v1641_v50, 4 }
 0x478   :  { %v1622_v47 = vmax.f32 %v1620_v32, %v1621_v18  ;;  %v1640_v49 = vmax.f32 %v1638_v35, %v1639_v29 }
 0x479   :  { %v1643_v55 = vmax.f32 %v1641_v50, %v1642_v37 }
 0x47a   :  { %v1623_v56 = vrot.slane %v1622_v47, 2  ;;  %v1650_v58 = vsub.f32 %v1618_v24, %v1640_v49 }
 0x47b   :  { %v1644_v59 = vrot.slane %v1643_v55, 2  ;;  %v1328_v60 = vpop.f32.mrf.mxu3  ;;  %v1545_v14 = vpop.f32.mrf.mxu2 }
 0x47c   :  { %v1624_v63 = vmax.f32 %v1622_v47, %v1623_v56  ;;  %v1614_v36 = vpop.f32.mrf.mxu1  ;;  %v1656_v41 = vmul.f32 1.442695, %v1650_v58 }
 0x47d   :  { %v1645_v1 = vmax.f32 %v1643_v55, %v1644_v59 }
 0x47e   :  { %v1625_v2 = vrot.slane %v1624_v63, 1  ;;  %2213 = vpow2.f32 %v1656_v41 }
 0x47f   :  { %v1646_v33 = vrot.slane %v1645_v1, 1 }
 0x480   :  { %v1626_v8 = vmax.f32 %v1624_v63, %v1625_v2 }
 0x481   :  { %v1647_v0 = vmax.f32 %v1645_v1, %v1646_v33 }
 0x482   :  { %v1648_v3 = vsub.f32 %v1616_v6, %v1626_v8 }
 0x483   :  { %v1651_v7 = vsub.f32 %v1619_v42, %v1647_v0  ;;  %v1566_v4 = vpop.f32.mrf.mxu3 }
 0x484   :  { %v1652_v9 = vmul.f32 1.442695, %v1648_v3  ;;  %v1617_v28 = vsel %vm2407_vm1, %v1566_v4, -inf  ;;  %v2214_v13 = vpop.eup %2213 }
 0x485   :  { %v1658_v38 = vmul.f32 1.442695, %v1651_v7  ;;  %v1627_v61 = vsel %vm272_vm14, %v1617_v28, -inf  ;;  %v1674_v21 = vsel %vm272_vm14, %v2214_v13, 0.0 }
 0x486   :  { %2215 = vpow2.f32 %v1652_v9  ;;  %v1628_v22 = vrot.slane %v1627_v61, 4  ;;  %v1675_v24 = vrot.slane %v1674_v21, 4 }
 0x487   :  { %2217 = vpow2.f32 %v1658_v38 }
 0x488   :  { %v1629_v25 = vmax.f32 %v1627_v61, %v1628_v22  ;;  %v1676_v26 = vadd.f32 %v1675_v24, %v1674_v21 }
 0x48a   :  { %v1630_v27 = vrot.slane %v1629_v25, 2  ;;  %v1677_v10 = vrot.slane %v1676_v26, 2 }
 0x48b   :  { %v1568_v23 = vpop.f32.mrf.mxu3 }
 0x48c   :  { %v2216_v6 = vpop.eup %2215  ;;  %v1631_v45 = vmax.f32 %v1629_v25, %v1630_v27  ;;  %v1678_v39 = vadd.f32 %v1677_v10, %v1676_v26 }
 0x48d   :  { %v2218_v17 = vpop.eup %2217  ;;  %v1660_v35 = vsel %vm272_vm14, %v2216_v6, 0.0 }
 0x48e   :  { %v1661_v32 = vrot.slane %v1660_v35, 4  ;;  %v1681_v42 = vsel %vm272_vm14, %v2218_v17, 0.0  ;;  %v1632_v18 = vrot.slane %v1631_v45, 1  ;;  %v1679_v50 = vrot.slane %v1678_v39, 1 }
 0x48f   :  { %v1682_v29 = vrot.slane %v1681_v42, 4 }
 0x490   :  { %v1662_v37 = vadd.f32 %v1661_v32, %v1660_v35  ;;  %v1633_v47 = vmax.f32 %v1631_v45, %v1632_v18  ;;  %v2663_v49 = vadd.f32 %v1679_v50, %v1678_v39  ;;  %v2675_v32 = vpop.permute.xlu0 %2006 }
 0x491   :  { %v1683_v55 = vadd.f32 %v1682_v29, %v1681_v42 }
 0x492   :  { %v1663_v56 = vrot.slane %v1662_v37, 2  ;;  %v1649_v58 = vsub.f32 %v1617_v28, %v1633_v47  ;;  %2219 = vrcp.f32 %v2663_v49 }
 0x493   :  { %v1684_v59 = vrot.slane %v1683_v55, 2 }
 0x494   :  { %v1664_v60 = vadd.f32 %v1663_v56, %v1662_v37  ;;  %v1654_v14 = vmul.f32 1.442695, %v1649_v58 }
 0x495   :  { %v1685_v63 = vadd.f32 %v1684_v59, %v1683_v55 }
 0x496   :  { %v1665_v36 = vrot.slane %v1664_v60, 1  ;;  %2221 = vpow2.f32 %v1654_v14 }
 0x497   :  { %v1686_v41 = vrot.slane %v1685_v63, 1 }
 0x498   :  { %v1666_v1 = vadd.f32 %v1665_v36, %v1664_v60  ;;  %v2220_v2 = vpop.eup %2219 }
 0x499   :  { %v1687_v33 = vadd.f32 %v1686_v41, %v1685_v63  ;;  %v1694_v8 = vmul.f32 %v2220_v2, %v2214_v13 }
 0x49a   :  { %2223 = vrcp.f32 %v1666_v1 }
 0x49b   :  { %2225 = vrcp.f32 %v1687_v33  ;;  %v1698_v3 = vpack.c.bf16 %v1694_v8, %v1694_v8 }
 0x49c   :  { %v2222_v0 = vpop.eup %2221 }
 0x49d   :  { %v1667_v7 = vsel %vm272_vm14, %v2222_v0, 0.0  ;;  %2130 = vmatmul.msk.bf16.vlgmr.msra.gmra.mxu0 %vm272_vm14, %v1698_v3  ;;  %v1110_v3 = vmul.f32 %v2633_v52, %v2566_v43 }
 0x49e   :  { %v1668_v4 = vrot.slane %v1667_v7, 4 }
 0x4a0   :  { %v2224_v9 = vpop.eup %2223  ;;  %v1669_v28 = vadd.f32 %v1668_v4, %v1667_v7 }
 0x4a1   :  { %v2226_v38 = vpop.eup %2225  ;;  %v1692_v61 = vmul.f32 %v2224_v9, %v2216_v6  ;;  %v1106_v6 = vpop.permute.xlu1 %1105 }
 0x4a2   :  { %v1695_v21 = vmul.f32 %v2226_v38, %v2218_v17  ;;  %v1670_v22 = vrot.slane %v1669_v28, 2  ;;  %v1111_v7 = vmul.f32 %v1106_v6, %v2570_v30 }
 0x4a3   :  { %v1696_v24 = vpack.c.bf16 %v1692_v61, %v1692_v61 }
 0x4a4   :  { %v1699_v25 = vpack.c.bf16 %v1695_v21, %v1695_v21  ;;  %v1671_v26 = vadd.f32 %v1670_v22, %v1669_v28 }
 0x4a5   :  { %2128 = vmatmul.msk.bf16.vlgmr.msrb.gmra.mxu2 %vm272_vm14, %v1696_v24 }
 0x4a6   :  { %v1672_v13 = vrot.slane %v1671_v26, 1  ;;  %2131 = vmatmul.msk.bf16.vlgmr.msra.gmra.mxu1 %vm272_vm14, %v1699_v25 }
 0x4a7   :  { %v1420_v39 = vpop.trf.xlu2 }
 0x4a8   :  { %v1673_v27 = vadd.f32 %v1672_v13, %v1671_v26 }
 0x4a9   :  { %v2671_v17 = vpop.permute.xlu1 %2004 }
 0x4aa   :  { %2227 = vrcp.f32 %v1673_v27 }
 0x4b0   :  { %v2228_v10 = vpop.eup %2227 }
 0x4b1   :  { %v1693_v23 = vmul.f32 %v2228_v10, %v2222_v0  ;;  %v2673_v35 = vpop.permute.xlu1 %1940 }
 0x4b3   :  { %v1697_v45 = vpack.c.bf16 %v1693_v23, %v1693_v23 }
 0x4b5   :  { %2129 = vmatmul.msk.bf16.vlgmr.msra.gmra.mxu3 %vm272_vm14, %v1697_v45 }
 0x4b7   :  { %v2677_v18 = vpop.permute.xlu0 %1942 }
 0x4dd   :  { %1507 = vperm.xlu0 %2150, %v1420_v39  }
 0x4fe   :  { %v1452_v42 = vpop.trf.xlu1 }
 0x4ff   :  { %1512 = vperm.xlu1 %2152, %v1452_v42   ;;  %1880 = vxpose.xlu0.b32.start.end [1/1] (short) (narrow) %v1687_v33, 8 }
 0x507   :  { %1816 = vxpose.xlu0.b32.start.end [1/1] (short) (narrow) %v1673_v27, 8 }
 0x50b   :  { %v1388_v50 = vpop.trf.xlu0 }
 0x50c   :  { %1502 = vperm.xlu2 %2151, %v1388_v50  }
 0x513   :  { %v1484_v29 = vpop.trf.xlu0 }
 0x514   :  { %1517 = vperm.xlu2 %2151, %v1484_v29  }
 0x51a   :  { %v2679_v37 = vpop.f32.mrf.mxu0 }
 0x522   :  { %v1761_v47 = vpop.f32.mrf.mxu0 }
 0x523   :  { %v2681_v55 = vpop.f32.mrf.mxu1 }
 0x528   :  { %v1717_v56 = vpop.f32.mrf.mxu2 }
 0x52b   :  { %v1782_v58 = vpop.f32.mrf.mxu1 }
 0x530   :  { %v1719_v59 = vpop.f32.mrf.mxu2 }
 0x534   :  { %1784 = vxpose.xlu1.b32.start.end [1/1] (short) (narrow) %v1666_v1, 8 }
 0x538   :  { %v1738_v60 = vpop.f32.mrf.mxu3 }
 0x53a   :  { %1848 = vxpose.xlu2.b32.start.end [1/1] (short) (narrow) %v2663_v49, 8 }
 0x540   :  { %v1740_v14 = vpop.f32.mrf.mxu3 }
 0x541   :  { %v661_v14 = vmul.f32 %v2600_v19, %v2507_v53  ;;  %v660_v53 = vmul.f32 %v2580_v34, %v2492_v44 }
 0x543   :  { %v1984_v19 = vsel %vm272_vm14, %v660_v53, %v2673_v35 }
 0x54f   :  { %v1508_v63 = vpop.permute.xlu0 %1507 }
 0x550   :  { %v1521_v43 = vmul.f32 %v1508_v63, %v2649_v15 }
 0x566   :  { %v1503_v8 = vpop.permute.xlu2 %1502 }
 0x567   :  { %v1520_v28 = vmul.f32 %v1503_v8, %v2641_v5 }
 0x56e   :  { %v1518_v1 = vpop.permute.xlu2 %1517 }
 0x56f   :  { %v1523_v30 = vmul.f32 %v1518_v1, %v2643_v16  ;;  %v662_v16 = vmul.f32 %v2584_v62, %v2498_v46 }
 0x571   :  { %v1513_v2 = vpop.permute.xlu1 %1512 }
 0x572   :  { %v1522_v33 = vmul.f32 %v1513_v2, %v2639_v54  ;;  %v2039_v54 = vsel %vm2038_vm2, %v2500_v48, %v2631_v20  ;;  %v2042_v48 = vsel %vm2038_vm2, %v2532_v12, %v2635_v11  ;;  %v2040_v12 = vsel %vm2038_vm2, %v2528_v57, %v2671_v17 }
 0x575   :  { %2014 = vrot.lane.b32.xlu0 %v1388_v50, %s2236_s24 }
 0x5a3   :  { %v1896_v36 = vpop.trf.xlu0 }
 0x5ab   :  { %v1832_v41 = vpop.trf.xlu0 }
 0x5ac   :  { %1919 = vperm.xlu0 %2150, %v1832_v41  }
 0x5b4   :  { %2020 = vrot.lane.b32.xlu0 %v1484_v29, %s2236_s24  ;;  %v2041_v29 = vsel %vm2038_vm2, %v2522_v31, %v2675_v32 }
 0x5bc   :  { %1960 = vrot.lane.b32.xlu0 %v1522_v33, %s2237_s25 }
 0x5c4   :  { %2028 = vrot.lane.b32.xlu0 %v1832_v41, %s2238_s26 }
 0x5d3   :  { %v1864_v0 = vpop.trf.xlu2 }
 0x5d4   :  { %1924 = vperm.xlu1 %2152, %v1864_v0  }
 0x5d8   :  { %v1800_v49 = vpop.trf.xlu1 }
 0x5d9   :  { %1914 = vperm.xlu2 %2151, %v1800_v49  }
 0x5dc   :  { %1929 = vperm.xlu1 %2152, %v1896_v36  }
 0x5e1   :  { %1944 = vrot.lane.b32.xlu2 %v1110_v3, %s2235_s23 }
 0x5e4   :  { %1946 = vrot.lane.b32.xlu1 %v1111_v7, %s2235_s23 }
 0x5e7   :  { %v2015_v4 = vpop.permute.xlu0 %2014 }
 0x5e8   :  { %v2044_v9 = vsel %vm2043_vm3, %v2039_v54, %v2015_v4 }
 0x5e9   :  { %2016 = vrot.lane.b32.xlu2 %v1420_v39, %s2236_s24  ;;  %v663_v39 = vmul.f32 %v2591_v40, %v2503_v51 }
 0x5ec   :  { %2018 = vrot.lane.b32.xlu1 %v1452_v42, %s2236_s24 }
 0x5f1   :  { %1956 = vrot.lane.b32.xlu2 %v1520_v28, %s2237_s25 }
 0x5f4   :  { %1958 = vrot.lane.b32.xlu1 %v1521_v43, %s2237_s25 }
 0x5f9   :  { %1962 = vrot.lane.b32.xlu2 %v1523_v30, %s2237_s25 }
 0x5fc   :  { %2026 = vrot.lane.b32.xlu1 %v1800_v49, %s2238_s26 }
 0x601   :  { %2030 = vrot.lane.b32.xlu2 %v1864_v0, %s2238_s26 }
 0x604   :  { %2032 = vrot.lane.b32.xlu1 %v1896_v36, %s2238_s26  ;;  %v1985_v36 = vsel %vm272_vm14, %v661_v14, %v2677_v18 }
 0x61e   :  { %v1920_v52 = vpop.permute.xlu0 %1919 }
 0x61f   :  { %v1933_v38 = vmul.f32 %v1920_v52, %v1738_v60 }
 0x621   :  { %1974 = vrot.lane.b32.xlu2 %v1933_v38, %s2239_s27 }
 0x626   :  { %v2021_v20 = vpop.permute.xlu0 %2020 }
 0x627   :  { %v2047_v5 = vsel %vm2043_vm3, %v2042_v48, %v2021_v20 }
 0x62e   :  { %v1961_v21 = vpop.permute.xlu0 %1960 }
 0x633   :  { %v1915_v61 = vpop.permute.xlu2 %1914 }
 0x634   :  { %v1932_v15 = vmul.f32 %v1915_v61, %v1717_v56 }
 0x636   :  { %1972 = vrot.lane.b32.xlu0 %v1932_v15, %s2239_s27  ;;  %v2029_v26 = vpop.permute.xlu0 %2028 }
 0x63b   :  { %v1945_v22 = vpop.permute.xlu2 %1944 }
 0x63c   :  { %v1986_v24 = vsel %vm272_vm14, %v662_v16, %v1945_v22 }
 0x63d   :  { %v1991_v25 = vsel %vm1988_vm4, %v1986_v24, %v1961_v21 }
 0x643   :  { %v2017_v11 = vpop.permute.xlu2 %2016 }
 0x644   :  { %v2045_v13 = vsel %vm2043_vm3, %v2040_v12, %v2017_v11 }
 0x645   :  { %v2050_v27 = vsel %vm2048_vm5, %v2045_v13, %v2029_v26 }
 0x646   :  { %v2055_v46 = vsel %vm2053_vm6, %v2050_v27, 0.0  ;;  %v1925_v62 = vpop.permute.xlu1 %1924 }
 0x647   :  { %2059 = vst [vmem:[%s2775_s7 + $0x8] sm:$0xff] %v2055_v46  ;;  %v1934_v10 = vmul.f32 %v1925_v62, %v2679_v37 }
 0x649   :  { %1976 = vrot.lane.b32.xlu1 %v1934_v10, %s2239_s27 }
 0x64b   :  { %v1957_v23 = vpop.permute.xlu2 %1956 }
 0x64c   :  { %v1989_v8 = vsel %vm1988_vm4, %v1984_v19, %v1957_v23 }
 0x64e   :  { %v1930_v45 = vpop.permute.xlu1 %1929 }
 0x64f   :  { %v1935_v57 = vmul.f32 %v1930_v45, %v2681_v55 }
 0x651   :  { %1978 = vrot.lane.b32.xlu0 %v1935_v57, %s2239_s27 }
 0x653   :  { %v1963_v6 = vpop.permute.xlu2 %1962 }
 0x656   :  { %v1947_v17 = vpop.permute.xlu1 %1946 }
 0x657   :  { %v1987_v42 = vsel %vm272_vm14, %v663_v39, %v1947_v17 }
 0x658   :  { %v1992_v50 = vsel %vm1988_vm4, %v1987_v42, %v1963_v6 }
 0x65b   :  { %v2031_v47 = vpop.permute.xlu2 %2030 }
 0x65e   :  { %v2019_v37 = vpop.permute.xlu1 %2018 }
 0x65f   :  { %v2046_v56 = vsel %vm2043_vm3, %v2041_v29, %v2019_v37 }
 0x660   :  { %v2051_v55 = vsel %vm2048_vm5, %v2046_v56, %v2031_v47 }
 0x661   :  { %v2056_v58 = vsel %vm2053_vm6, %v2051_v55, 0.0 }
 0x662   :  { %2060 = vst [vmem:[%s2775_s7 + $0x10] sm:$0xff] %v2056_v58 }
 0x666   :  { %v1959_v51 = vpop.permute.xlu1 %1958 }
 0x667   :  { %v1990_v41 = vsel %vm1988_vm4, %v1985_v36, %v1959_v51 }
 0x66e   :  { %v2027_v40 = vpop.permute.xlu1 %2026 }
 0x66f   :  { %v2049_v59 = vsel %vm2048_vm5, %v2044_v9, %v2027_v40 }
 0x670   :  { %v2054_v60 = vsel %vm2053_vm6, %v2049_v59, 0.0 }
 0x671   :  { %2058 = vst [vmem:[%s2775_s7] sm:$0xff] %v2054_v60 }
 0x676   :  { %v2033_v31 = vpop.permute.xlu1 %2032 }
 0x677   :  { %v2052_v32 = vsel %vm2048_vm5, %v2047_v5, %v2033_v31 }
 0x678   :  { %v2057_v63 = vsel %vm2053_vm6, %v2052_v32, 0.0 }
 0x679   :  { %2061 = vst [vmem:[%s2775_s7 + $0x18] sm:$0xff] %v2057_v63 }
 0x67b   :  { %v1975_v2 = vpop.permute.xlu2 %1974 }
 0x67c   :  { %v1995_v33 = vsel %vm1993_vm7, %v1990_v41, %v1975_v2 }
 0x67d   :  { %1999 = vst.msk [vmem:[%s2776_s6 + $0x8] sm:$0xff] %vm30_vm0, %v1995_v33 }
 0x6a8   :  { %v1973_v1 = vpop.permute.xlu0 %1972 }
 0x6a9   :  { %v1994_v18 = vsel %vm1993_vm7, %v1989_v8, %v1973_v1 }
 0x6aa   :  { %1998 = vst.msk [vmem:[%s2776_s6] sm:$0xff] %vm30_vm0, %v1994_v18 }
 0x6bb   :  { %v1977_v0 = vpop.permute.xlu1 %1976 }
 0x6bc   :  { %v1996_v49 = vsel %vm1993_vm7, %v1991_v25, %v1977_v0 }
 0x6bd   :  { %2000 = vst.msk [vmem:[%s2776_s6 + $0x10] sm:$0xff] %vm30_vm0, %v1996_v49 }
 0x6c3   :  { %v1979_v44 = vpop.permute.xlu0 %1978 }
 0x6c4   :  { %v1997_v34 = vsel %vm1993_vm7, %v1992_v50, %v1979_v44 }
 0x6c5   :  { %2001 = vst.msk [vmem:[%s2776_s6 + $0x18] sm:$0xff] %vm30_vm0, %v1997_v34 }

// kernel: dilated_transformer_block_forward.3
= control target key start
LH: loop header
LB: loop body
LE: loop exit
PB: predicated region body
PF: predicated region fallthrough
CT: control target
= control target key end

     0   :  { %vm34_vm0 = vcmask 261120   ;;  %v4269_v14 = vmov 32.0   ;;  %s4272_s29 = smov 104   ;;  %s4274_s30 = smov 1   ;;  %s5585_s0 = inlined_call_operand.vmem [shape: f32[64,32], index: 0, kind: input, shape index: {}]   ;;  %s5586_s1 = inlined_call_operand.vmem [shape: f32[1,32], index: 1, kind: input, shape index: {}]   ;;  %s5587_s2 = inlined_call_operand.vmem [shape: f32[1,32], index: 2, kind: input, shape index: {}]   ;;  %s5588_s3 = inlined_call_operand.vmem [shape: bf16[32,32], index: 3, kind: input, shape index: {}]   ;;  %s5589_s4 = inlined_call_operand.vmem [shape: bf16[32,32], index: 4, kind: input, shape index: {}]   ;;  %s5590_s5 = inlined_call_operand.vmem [shape: bf16[32,32], index: 5, kind: input, shape index: {}]   ;;  %s5591_s7 = inlined_call_operand.vmem [shape: f32[64,128], index: 7, kind: output, shape index: {1}]   ;;  %s5592_s6 = inlined_call_operand.vmem [shape: f32[64,32], index: 6, kind: output, shape index: {0}]  }
   0x1   :  { %v30_v0 = vld [vmem:[%s5585_s0 + $0x20] sm:$0xff]  ;;  %v28_v1 = vld [vmem:[%s5585_s0 + $0x10] sm:$0xff]  ;;  %v31_v6 = vld [vmem:[%s5585_s0 + $0x28] sm:$0xff]  ;;  %4123 = vrcp.f32 %v4269_v14  ;;  %s4275_s8 = smov 8   ;;  %s4276_s9 = smov 2  }
   0x2   :  { %v26_v2 = vld [vmem:[%s5585_s0] sm:$0xff]  ;;  %v47_v3 = vsel %vm34_vm0, %v30_v0, 0.0  ;;  %v41_v4 = vsel %vm34_vm0, %v28_v1, 0.0  ;;  %v29_v7 = vld [vmem:[%s5585_s0 + $0x18] sm:$0xff]  ;;  %v27_v8 = vld [vmem:[%s5585_s0 + $0x8] sm:$0xff]  ;;  %v50_v9 = vsel %vm34_vm0, %v31_v6, 0.0 }
   0x3   :  { %v35_v5 = vsel %vm34_vm0, %v26_v2, 0.0  ;;  %48 = vadd.xlane.f32.xlu2 %v47_v3  ;;  %42 = vadd.xlane.f32.xlu1 %v41_v4  ;;  %v44_v10 = vsel %vm34_vm0, %v29_v7, 0.0  ;;  %v38_v11 = vsel %vm34_vm0, %v27_v8, 0.0  ;;  %v32_v12 = vld [vmem:[%s5585_s0 + $0x30] sm:$0xff]  ;;  %v33_v36 = vld [vmem:[%s5585_s0 + $0x38] sm:$0xff]  ;;  %v4101_v58 = vld [vmem:[%s5588_s3 + $0x8] sm:$0xff] }
   0x4   :  { %36 = vadd.xlane.f32.xlu0 %v35_v5  ;;  %v53_v13 = vsel %vm34_vm0, %v32_v12, 0.0  ;;  %v56_v41 = vsel %vm34_vm0, %v33_v36, 0.0  ;;  %v4103_v59 = vld [vmem:[%s5589_s4 + $0x8] sm:$0xff]  ;;  %280 = vmatpush.bf16.msra.mxu0 %v4101_v58  ;;  %v4454_v58 = vld [vmem:[%s5587_s2] ss:$0 sm:$0xff]  ;;  %s4271_s2 = smov 112  }
   0x5   :  { %v4105_v60 = vld [vmem:[%s5590_s5 + $0x8] sm:$0xff]  ;;  %325 = vmatpush.bf16.msra.mxu1 %v4103_v59  ;;  %s4277_s10 = smov 16   ;;  %s4278_s11 = smov 3  }
   0x6   :  { %370 = vmatpush.bf16.msra.mxu2 %v4105_v60  ;;  %s4279_s12 = smov 24  }
   0x7   :  { %v4124_v15 = vpop.eup %4123 }
   0x8   :  { %v60_v16 = vmul.f32 32.0, %v4124_v15  ;;  %vm64_vm1 = vweird.f32 %v4124_v15 }
   0xa   :  { %v61_v17 = vsub.f32 1.0, %v60_v16 }
   0xb   :  { %51 = vadd.xlane.f32.xlu2 %v50_v9  ;;  %45 = vadd.xlane.f32.xlu1 %v44_v10 }
   0xc   :  { %39 = vadd.xlane.f32.xlu0 %v38_v11  ;;  %v62_v18 = vmul.f32 %v4124_v15, %v61_v17 }
   0xe   :  { %v63_v19 = vadd.f32 %v4124_v15, %v62_v18 }
  0x10   :  { %v4348_v20 = vsel %vm64_vm1, %v4124_v15, %v63_v19 }
  0x13   :  { %54 = vadd.xlane.f32.xlu2 %v53_v13 }
  0x76   :  { %v49_v21 = vpop.xlane.xlu2 %48  ;;  %v43_v22 = vpop.xlane.xlu1 %42 }
  0x77   :  { %v37_v23 = vpop.xlane.xlu0 %36  ;;  %v70_v32 = vmul.f32 %v4348_v20, %v49_v21  ;;  %v68_v33 = vmul.f32 %v4348_v20, %v43_v22 }
  0x78   :  { %v66_v24 = vmul.f32 %v4348_v20, %v37_v23 }
  0x79   :  { %v4369_v39 = vsub.f32 %v30_v0, %v70_v32  ;;  %v4371_v40 = vsub.f32 %v28_v1, %v68_v33  ;;  %v4100_v0 = vld [vmem:[%s5588_s3] sm:$0xff] }
  0x7a   :  { %v4351_v25 = vsub.f32 %v26_v2, %v66_v24  ;;  %v4102_v1 = vld [vmem:[%s5589_s4] sm:$0xff]  ;;  %281 = vmatpush.bf16.msra.mxu0 %v4100_v0 }
  0x7b   :  { %v86_v48 = vmul.f32 %v4369_v39, %v4369_v39  ;;  %v84_v49 = vmul.f32 %v4371_v40, %v4371_v40  ;;  %v4104_v2 = vld [vmem:[%s5590_s5] sm:$0xff]  ;;  %326 = vmatpush.bf16.msra.mxu1 %v4102_v1 }
  0x7c   :  { %v82_v26 = vmul.f32 %v4351_v25, %v4351_v25  ;;  %371 = vmatpush.bf16.msra.mxu2 %v4104_v2 }
  0x7d   :  { %v102_v53 = vsel %vm34_vm0, %v86_v48, 0.0  ;;  %v96_v54 = vsel %vm34_vm0, %v84_v49, 0.0  ;;  %v4447_v49 = vld [vmem:[%s5586_s1] ss:$0 sm:$0xff]  ;;  %s4270_s1 = smov 120  }
  0x7e   :  { %v52_v27 = vpop.xlane.xlu2 %51  ;;  %v46_v28 = vpop.xlane.xlu1 %45  ;;  %v90_v29 = vsel %vm34_vm0, %v82_v26, 0.0 }
  0x7f   :  { %v69_v30 = vmul.f32 %v4348_v20, %v46_v28  ;;  %91 = vadd.xlane.f32.xlu0 %v90_v29  ;;  %v40_v31 = vpop.xlane.xlu0 %39  ;;  %v71_v47 = vmul.f32 %v4348_v20, %v52_v27 }
  0x80   :  { %v67_v34 = vmul.f32 %v4348_v20, %v40_v31 }
  0x81   :  { %v4360_v35 = vsub.f32 %v29_v7, %v69_v30  ;;  %v4388_v52 = vsub.f32 %v31_v6, %v71_v47 }
  0x82   :  { %v4365_v37 = vsub.f32 %v27_v8, %v67_v34 }
  0x83   :  { %v85_v38 = vmul.f32 %v4360_v35, %v4360_v35  ;;  %v87_v56 = vmul.f32 %v4388_v52, %v4388_v52 }
  0x84   :  { %v83_v42 = vmul.f32 %v4365_v37, %v4365_v37 }
  0x85   :  { %v99_v43 = vsel %vm34_vm0, %v85_v38, 0.0  ;;  %v105_v57 = vsel %vm34_vm0, %v87_v56, 0.0 }
  0x86   :  { %v55_v44 = vpop.xlane.xlu2 %54  ;;  %100 = vadd.xlane.f32.xlu2 %v99_v43  ;;  %v93_v45 = vsel %vm34_vm0, %v83_v42, 0.0 }
  0x87   :  { %v72_v46 = vmul.f32 %v4348_v20, %v55_v44  ;;  %57 = vadd.xlane.f32.xlu0 %v56_v41  ;;  %94 = vadd.xlane.f32.xlu1 %v93_v45 }
  0x89   :  { %v4384_v50 = vsub.f32 %v32_v12, %v72_v46 }
  0x8b   :  { %v88_v51 = vmul.f32 %v4384_v50, %v4384_v50 }
  0x8d   :  { %v108_v55 = vsel %vm34_vm0, %v88_v51, 0.0 }
  0x8e   :  { %109 = vadd.xlane.f32.xlu2 %v108_v55 }
  0x8f   :  { %103 = vadd.xlane.f32.xlu0 %v102_v53  ;;  %97 = vadd.xlane.f32.xlu1 %v96_v54 }
  0x97   :  { %106 = vadd.xlane.f32.xlu1 %v105_v57 }
  0xf2   :  { %v92_v61 = vpop.xlane.xlu0 %91 }
  0xf3   :  { %v114_v62 = vmul.f32 %v92_v61, %v4348_v20 }
  0xf5   :  { %v122_v63 = vadd.f32 1e-05, %v114_v62 }
  0xf7   :  { %4125 = vrsqrt.f32 %v122_v63  ;;  %vm136_vm3 = vweird.f32 %v122_v63 }
  0xf9   :  { %v101_v3 = vpop.xlane.xlu2 %100 }
  0xfa   :  { %v117_v4 = vmul.f32 %v101_v3, %v4348_v20  ;;  %v95_v5 = vpop.xlane.xlu1 %94  ;;  %v58_v6 = vpop.xlane.xlu0 %57 }
  0xfb   :  { %v115_v7 = vmul.f32 %v95_v5, %v4348_v20  ;;  %v73_v8 = vmul.f32 %v4348_v20, %v58_v6 }
  0xfc   :  { %v4418_v9 = vadd.f32 1e-05, %v117_v4 }
  0xfd   :  { %v4126_v10 = vpop.eup %4125  ;;  %v123_v11 = vadd.f32 1e-05, %v115_v7  ;;  %v4420_v12 = vsub.f32 %v33_v36, %v73_v8 }
  0xfe   :  { %v131_v13 = vmul.f32 %v4126_v10, %v122_v63  ;;  %4127 = vrsqrt.f32 %v4418_v9  ;;  %vm137_vm2 = vweird.f32 %v4126_v10  ;;  %vm166_vm10 = vweird.f32 %v4418_v9 }
  0xff   :  { %4129 = vrsqrt.f32 %v123_v11  ;;  %v89_v14 = vmul.f32 %v4420_v12, %v4420_v12  ;;  %vm4432_vm4 = vmor %vm136_vm3, %vm137_vm2  ;;  %vm146_vm5 = vweird.f32 %v123_v11 }
 0x100   :  { %v132_v15 = vmul.f32 %v4126_v10, %v131_v13 }
 0x101   :  { %v111_v16 = vsel %vm34_vm0, %v89_v14, 0.0  ;;  %v110_v32 = vpop.xlane.xlu2 %109 }
 0x102   :  { %v133_v17 = vmul.f32 0.5, %v132_v15  ;;  %v98_v18 = vpop.xlane.xlu1 %97  ;;  %112 = vadd.xlane.f32.xlu0 %v111_v16  ;;  %v104_v21 = vpop.xlane.xlu0 %103 }
 0x103   :  { %v116_v19 = vmul.f32 %v98_v18, %v4348_v20  ;;  %v118_v28 = vmul.f32 %v104_v21, %v4348_v20 }
 0x104   :  { %v4427_v22 = vpop.eup %4127  ;;  %v134_v23 = vsub.f32 1.5, %v133_v17 }
 0x105   :  { %v4130_v24 = vpop.eup %4129  ;;  %v124_v26 = vadd.f32 1e-05, %v116_v19  ;;  %v161_v30 = vmul.f32 %v4427_v22, %v4418_v9  ;;  %v4436_v34 = vadd.f32 1e-05, %v118_v28  ;;  %vm167_vm11 = vweird.f32 %v4427_v22 }
 0x106   :  { %v141_v27 = vmul.f32 %v4130_v24, %v123_v11  ;;  %v135_v29 = vmul.f32 %v4126_v10, %v134_v23  ;;  %vm147_vm6 = vweird.f32 %v4130_v24  ;;  %vm168_vm13 = vmor %vm166_vm10, %vm167_vm11  ;;  %vm422_vm11 = vcmask 64512  }
 0x107   :  { %4131 = vrsqrt.f32 %v124_v26  ;;  %v162_v41 = vmul.f32 %v4427_v22, %v161_v30  ;;  %vm148_vm7 = vmor %vm146_vm5, %vm147_vm6  ;;  %vm156_vm8 = vweird.f32 %v124_v26  ;;  %vm176_vm1 = vweird.f32 %v4436_v34 }
 0x108   :  { %v142_v31 = vmul.f32 %v4130_v24, %v141_v27  ;;  %v139_v38 = vsel %vm4432_vm4, %v4126_v10, %v135_v29  ;;  %4133 = vrsqrt.f32 %v4436_v34 }
 0x109   :  { %v210_v48 = vmul.f32 %v139_v38, %v4351_v25  ;;  %v163_v51 = vmul.f32 0.5, %v162_v41 }
 0x10a   :  { %v143_v33 = vmul.f32 0.5, %v142_v31  ;;  %v107_v36 = vpop.xlane.xlu1 %106 }
 0x10b   :  { %v119_v42 = vmul.f32 %v107_v36, %v4348_v20  ;;  %v222_v57 = vmul.f32 %v4447_v49, %v210_v48  ;;  %v164_v25 = vsub.f32 1.5, %v163_v51 }
 0x10c   :  { %v144_v43 = vsub.f32 1.5, %v143_v33 }
 0x10d   :  { %v4132_v44 = vpop.eup %4131  ;;  %v127_v45 = vadd.f32 1e-05, %v119_v42  ;;  %v234_v0 = vadd.f32 %v4454_v58, %v222_v57  ;;  %v165_v1 = vmul.f32 %v4427_v22, %v164_v25 }
 0x10e   :  { %v145_v46 = vmul.f32 %v4130_v24, %v144_v43  ;;  %v151_v47 = vmul.f32 %v4132_v44, %v124_v26  ;;  %vm157_vm9 = vweird.f32 %v4132_v44  ;;  %v4134_v60 = vpop.eup %4133 }
 0x10f   :  { %4135 = vrsqrt.f32 %v127_v45  ;;  %vm158_vm12 = vmor %vm156_vm8, %vm157_vm9  ;;  %v171_v2 = vmul.f32 %v4134_v60, %v4436_v34  ;;  %v169_v7 = vsel %vm168_vm13, %v4427_v22, %v165_v1  ;;  %vm186_vm14 = vweird.f32 %v127_v45 }
 0x110   :  { %v149_v53 = vsel %vm148_vm7, %v4130_v24, %v145_v46  ;;  %v152_v54 = vmul.f32 %v4132_v44, %v151_v47  ;;  %v213_v11 = vmul.f32 %v169_v7, %v4360_v35  ;;  %vm177_vm2 = vweird.f32 %v4134_v60 }
 0x111   :  { %v211_v55 = vmul.f32 %v149_v53, %v4365_v37  ;;  %v172_v8 = vmul.f32 %v4134_v60, %v171_v2  ;;  %vm178_vm4 = vmor %vm176_vm1, %vm177_vm2  ;;  %vm3850_vm1 = vcmask 130048   ;;  %vm3966_vm2 = vcmask 23552  }
 0x112   :  { %v153_v56 = vmul.f32 0.5, %v152_v54  ;;  %v225_v16 = vmul.f32 %v4447_v49, %v213_v11 }
 0x113   :  { %v223_v59 = vmul.f32 %v4447_v49, %v211_v55  ;;  %v173_v13 = vmul.f32 0.5, %v172_v8 }
 0x114   :  { %v154_v61 = vsub.f32 1.5, %v153_v56 }
 0x115   :  { %v235_v37 = vadd.f32 %v4454_v58, %v223_v59  ;;  %v4136_v62 = vpop.eup %4135  ;;  %v174_v17 = vsub.f32 1.5, %v173_v13 }
 0x116   :  { %v155_v63 = vmul.f32 %v4132_v44, %v154_v61  ;;  %v181_v3 = vmul.f32 %v4136_v62, %v127_v45  ;;  %vm187_vm15 = vweird.f32 %v4136_v62 }
 0x117   :  { %v242_v4 = vpack.c.bf16 %v235_v37, %v234_v0  ;;  %vm188_vm3 = vmor %vm186_vm14, %vm187_vm15  ;;  %v175_v21 = vmul.f32 %v4134_v60, %v174_v17  ;;  %vm3948_vm14 = vcmask 7168   ;;  %vm3957_vm15 = vcmask 15360  }
 0x118   :  { %v159_v5 = vsel %vm158_vm12, %v4132_v44, %v155_v63  ;;  %v182_v6 = vmul.f32 %v4136_v62, %v181_v3  ;;  %vm748_vm12 = vcmask 1043456  }
 0x119   :  { %4008 = vmatmul.msk.bf16.vlgmr.msra.gmra.mxu0 %vm34_vm0, %v242_v4  ;;  %4020 = vmatmul.msk.bf16.vlgmr.msra.gmra.mxu1 %vm34_vm0, %v242_v4  ;;  %v212_v9 = vmul.f32 %v159_v5, %v4371_v40  ;;  %v237_v40 = vadd.f32 %v4454_v58, %v225_v16  ;;  %v179_v23 = vsel %vm178_vm4, %v4134_v60, %v175_v21  ;;  %vm3859_vm4 = vcmask 195584  }
 0x11a   :  { %4032 = vmatmul.msk.bf16.vlgmr.msra.gmra.mxu2 %vm34_vm0, %v242_v4  ;;  %v183_v10 = vmul.f32 0.5, %v182_v6  ;;  %v214_v26 = vmul.f32 %v179_v23, %v4369_v39 }
 0x11b   :  { %v224_v14 = vmul.f32 %v4447_v49, %v212_v9 }
 0x11c   :  { %v184_v15 = vsub.f32 1.5, %v183_v10  ;;  %v226_v28 = vmul.f32 %v4447_v49, %v214_v26 }
 0x11d   :  { %v236_v18 = vadd.f32 %v4454_v58, %v224_v14 }
 0x11e   :  { %v185_v19 = vmul.f32 %v4136_v62, %v184_v15  ;;  %v238_v30 = vadd.f32 %v4454_v58, %v226_v28 }
 0x11f   :  { %v243_v35 = vpack.c.bf16 %v237_v40, %v236_v18 }
 0x120   :  { %v189_v22 = vsel %vm188_vm3, %v4136_v62, %v185_v19  ;;  %vm3975_vm3 = vcmask 31744  }
 0x121   :  { %v215_v24 = vmul.f32 %v189_v22, %v4388_v52  ;;  %v120_v52 = vmul.f32 %v110_v32, %v4348_v20 }
 0x123   :  { %v227_v27 = vmul.f32 %v4447_v49, %v215_v24  ;;  %v128_v33 = vadd.f32 1e-05, %v120_v52 }
 0x125   :  { %v239_v29 = vadd.f32 %v4454_v58, %v227_v27  ;;  %4137 = vrsqrt.f32 %v128_v33  ;;  %vm196_vm5 = vweird.f32 %v128_v33 }
 0x127   :  { %v244_v31 = vpack.c.bf16 %v239_v29, %v238_v30 }
 0x129   :  { %4009 = vmatmul.msk.bf16.gmra.mxu0 %vm34_vm0, %v243_v35  ;;  %4021 = vmatmul.msk.bf16.gmra.mxu1 %vm34_vm0, %v243_v35 }
 0x12a   :  { %4033 = vmatmul.msk.bf16.gmra.mxu2 %vm34_vm0, %v243_v35 }
 0x12b   :  { %v4138_v39 = vpop.eup %4137 }
 0x12c   :  { %v191_v34 = vmul.f32 %v4138_v39, %v128_v33  ;;  %vm197_vm6 = vweird.f32 %v4138_v39 }
 0x12d   :  { %vm198_vm7 = vmor %vm196_vm5, %vm197_vm6 }
 0x12e   :  { %v192_v36 = vmul.f32 %v4138_v39, %v191_v34 }
 0x130   :  { %v193_v43 = vmul.f32 0.5, %v192_v36 }
 0x132   :  { %v194_v44 = vsub.f32 1.5, %v193_v43 }
 0x134   :  { %v195_v46 = vmul.f32 %v4138_v39, %v194_v44 }
 0x136   :  { %v199_v51 = vsel %vm198_vm7, %v4138_v39, %v195_v46 }
 0x137   :  { %v216_v55 = vmul.f32 %v199_v51, %v4384_v50 }
 0x139   :  { %4010 = vmatmul.msk.bf16.gmra.mxu0 %vm34_vm0, %v244_v31  ;;  %4022 = vmatmul.msk.bf16.gmra.mxu1 %vm34_vm0, %v244_v31  ;;  %v228_v25 = vmul.f32 %v4447_v49, %v216_v55 }
 0x13a   :  { %4034 = vmatmul.msk.bf16.gmra.mxu2 %vm34_vm0, %v244_v31 }
 0x13b   :  { %v240_v60 = vadd.f32 %v4454_v58, %v228_v25 }
 0x175   :  { %v113_v38 = vpop.xlane.xlu0 %112 }
 0x176   :  { %v121_v41 = vmul.f32 %v113_v38, %v4348_v20 }
 0x178   :  { %v129_v42 = vadd.f32 1e-05, %v121_v41 }
 0x17a   :  { %4139 = vrsqrt.f32 %v129_v42  ;;  %vm206_vm9 = vweird.f32 %v129_v42 }
 0x180   :  { %v4140_v45 = vpop.eup %4139 }
 0x181   :  { %v201_v47 = vmul.f32 %v4140_v45, %v129_v42  ;;  %vm207_vm8 = vweird.f32 %v4140_v45 }
 0x182   :  { %vm208_vm10 = vmor %vm206_vm9, %vm207_vm8 }
 0x183   :  { %v202_v48 = vmul.f32 %v4140_v45, %v201_v47 }
 0x185   :  { %v203_v53 = vmul.f32 0.5, %v202_v48 }
 0x187   :  { %v204_v54 = vsub.f32 1.5, %v203_v53 }
 0x189   :  { %v205_v56 = vmul.f32 %v4140_v45, %v204_v54 }
 0x18b   :  { %v209_v20 = vsel %vm208_vm10, %v4140_v45, %v205_v56 }
 0x18c   :  { %v217_v57 = vmul.f32 %v209_v20, %v4420_v12 }
 0x18e   :  { %v229_v59 = vmul.f32 %v4447_v49, %v217_v57 }
 0x190   :  { %v241_v61 = vadd.f32 %v4454_v58, %v229_v59 }
 0x192   :  { %v245_v37 = vpack.c.bf16 %v241_v61, %v240_v60 }
 0x194   :  { %4011 = vmatmul.msk.bf16.gmra.mxu0 %vm34_vm0, %v245_v37  ;;  %4023 = vmatmul.msk.bf16.gmra.mxu1 %vm34_vm0, %v245_v37 }
 0x195   :  { %4035 = vmatmul.msk.bf16.gmra.mxu2 %vm34_vm0, %v245_v37 }
 0x196   :  { %v283_v50 = vpop.f32.mrf.mxu0  ;;  %v328_v62 = vpop.f32.mrf.mxu1 }
 0x197   :  { %v393_v63 = vpack.c.bf16 %v283_v50, %v283_v50  ;;  %v401_v12 = vpack.c.bf16 %v328_v62, %v328_v62 }
 0x199   :  { %v1203_v0 = vunpack.c.l.b16 %v393_v63  ;;  %v1208_v1 = vunpack.c.l.b16 %v401_v12  ;;  %v427_v49 = vsel %vm422_vm11, %v401_v12, 0 }
 0x19a   :  { %436 = vmatpush.bf16.xpose.msra.mxu3 %v427_v49 }
 0x19b   :  { %v1204_v2 = vpack.c.b16 %v1203_v0, %v1203_v0  ;;  %v1209_v3 = vpack.c.b16 %v1208_v1, %v1208_v1 }
 0x19d   :  { %v373_v58 = vpop.f32.mrf.mxu2  ;;  %1210 = vrot.lane.b32.xlu2 %v1209_v3, %s4270_s1  ;;  %1205 = vrot.lane.b32.xlu1 %v1204_v2, %s4270_s1 }
 0x19e   :  { %v409_v4 = vpack.c.bf16 %v373_v58, %v373_v58  ;;  %2098 = vrot.lane.b32.xlu0 %v1204_v2, %s4271_s2  ;;  %v285_v5 = vpop.f32.mrf.mxu0  ;;  %v330_v6 = vpop.f32.mrf.mxu1 }
 0x19f   :  { %v402_v7 = vpack.c.bf16 %v330_v6, %v330_v6  ;;  %v394_v11 = vpack.c.bf16 %v285_v5, %v285_v5 }
 0x1a0   :  { %v1603_v8 = vunpack.c.l.b16 %v409_v4  ;;  %v750_v31 = vsel %vm748_vm12, %v409_v4, 0 }
 0x1a1   :  { %4036 = vmatmul.msk.bf16.vlgmr.msra.gmra.mxu3 %vm422_vm11, %v393_v63  ;;  %v446_v9 = vsel %vm422_vm11, %v402_v7, 0  ;;  %v1232_v17 = vunpack.c.l.b16 %v394_v11  ;;  %v1237_v22 = vunpack.c.l.b16 %v402_v7 }
 0x1a2   :  { %455 = vmatpush.bf16.xpose.msrb.mxu3 %v446_v9  ;;  %v1604_v10 = vpack.c.b16 %v1603_v8, %v1603_v8 }
 0x1a3   :  { %v1233_v19 = vpack.c.b16 %v1232_v17, %v1232_v17  ;;  %v1238_v26 = vpack.c.b16 %v1237_v22, %v1237_v22 }
 0x1a5   :  { %v375_v13 = vpop.f32.mrf.mxu2  ;;  %1605 = vrot.lane.b32.xlu2 %v1604_v10, %s4270_s1  ;;  %2100 = vrot.lane.b32.xlu1 %v1209_v3, %s4271_s2 }
 0x1a6   :  { %2922 = vrot.lane.b32.xlu0 %v1204_v2, %s4272_s29  ;;  %v288_v14 = vpop.f32.mrf.mxu0  ;;  %v333_v15 = vpop.f32.mrf.mxu1  ;;  %v410_v52 = vpack.c.bf16 %v375_v13, %v375_v13 }
 0x1a7   :  { %v4506_v16 = vpack.c.bf16 %v333_v15, %v333_v15  ;;  %v395_v33 = vpack.c.bf16 %v288_v14, %v288_v14 }
 0x1a8   :  { %v1627_v38 = vunpack.c.l.b16 %v410_v52  ;;  %v769_v46 = vsel %vm748_vm12, %v410_v52, 0 }
 0x1a9   :  { %v465_v18 = vsel %vm422_vm11, %v4506_v16, 0  ;;  %v1261_v41 = vunpack.c.l.b16 %v395_v33  ;;  %v1266_v55 = vunpack.c.l.b16 %v4506_v16 }
 0x1aa   :  { %474 = vmatpush.bf16.xpose.msra.mxu3 %v465_v18  ;;  %v1628_v48 = vpack.c.b16 %v1627_v38, %v1627_v38 }
 0x1ab   :  { %v1262_v47 = vpack.c.b16 %v1261_v41, %v1261_v41  ;;  %v1267_v57 = vpack.c.b16 %v1266_v55, %v1266_v55 }
 0x1ad   :  { %v378_v40 = vpop.f32.mrf.mxu2  ;;  %2450 = vrot.lane.b32.xlu2 %v1604_v10, %s4271_s2  ;;  %2924 = vrot.lane.b32.xlu1 %v1209_v3, %s4272_s29 }
 0x1ae   :  { %1234 = vrot.lane.b32.xlu0 %v1233_v19, %s4270_s1  ;;  %v335_v21 = vpop.f32.mrf.mxu1  ;;  %v290_v23 = vpop.f32.mrf.mxu0  ;;  %v411_v25 = vpack.c.bf16 %v378_v40, %v378_v40 }
 0x1af   :  { %v4513_v35 = vpack.c.bf16 %v335_v21, %v335_v21  ;;  %v396_v60 = vpack.c.bf16 %v290_v23, %v290_v23 }
 0x1b0   :  { %v1651_v59 = vunpack.c.l.b16 %v411_v25 }
 0x1b1   :  { %4037 = vmatmul.msk.bf16.vlgmr.msrb.gmra.mxu3 %vm422_vm11, %v394_v11  ;;  %v484_v24 = vsel %vm422_vm11, %v4513_v35, 0  ;;  %v1295_v37 = vunpack.c.l.b16 %v4513_v35  ;;  %v1290_v62 = vunpack.c.l.b16 %v396_v60  ;;  %v788_v35 = vsel %vm748_vm12, %v411_v25, 0 }
 0x1b2   :  { %493 = vmatpush.bf16.xpose.msrb.mxu3 %v484_v24  ;;  %v1652_v61 = vpack.c.b16 %v1651_v59, %v1651_v59 }
 0x1b3   :  { %v1296_v50 = vpack.c.b16 %v1295_v37, %v1295_v37  ;;  %v1291_v63 = vpack.c.b16 %v1290_v62, %v1290_v62 }
 0x1b5   :  { %v4518_v27 = vpop.f32.mrf.mxu2  ;;  %3274 = vrot.lane.b32.xlu1 %v1604_v10, %s4272_s29  ;;  %2121 = vrot.lane.b32.xlu2 %v1233_v19, %s4271_s2 }
 0x1b6   :  { %2123 = vrot.lane.b32.xlu0 %v1238_v26, %s4271_s2  ;;  %v338_v28 = vpop.f32.mrf.mxu1  ;;  %v293_v32 = vpop.f32.mrf.mxu0  ;;  %v4567_v0 = vpack.c.bf16 %v4518_v27, %v4518_v27 }
 0x1b7   :  { %v4523_v29 = vpack.c.bf16 %v338_v28, %v338_v28  ;;  %v397_v42 = vpack.c.bf16 %v293_v32, %v293_v32  ;;  %v417_v32 = vlaneseq }
 0x1b8   :  { %v1675_v49 = vunpack.c.l.b16 %v4567_v0 }
 0x1b9   :  { %v503_v30 = vsel %vm422_vm11, %v4523_v29, 0  ;;  %v1319_v12 = vunpack.c.l.b16 %v397_v42  ;;  %v1324_v3 = vunpack.c.l.b16 %v4523_v29  ;;  %v418_v38 = vshrl.u32 %v417_v32, 7 }
 0x1ba   :  { %512 = vmatpush.bf16.xpose.msrb.mxu0 %v503_v30  ;;  %v1676_v2 = vpack.c.b16 %v1675_v49, %v1675_v49  ;;  %v420_v41 = vand.u32 127, %v417_v32 }
 0x1bb   :  { %v1320_v1 = vpack.c.b16 %v1319_v12, %v1319_v12  ;;  %v1325_v5 = vpack.c.b16 %v1324_v3, %v1324_v3 }
 0x1bc   :  { %vm4640_vm13 = vcmp.le.s32.totalorder %v418_v38, %v420_v41 }
 0x1bd   :  { %v383_v39 = vpop.f32.mrf.mxu2  ;;  %1239 = vrot.lane.b32.xlu1 %v1238_v26, %s4270_s1  ;;  %2945 = vrot.lane.b32.xlu2 %v1233_v19, %s4272_s29 }
 0x1be   :  { %v4530_v34 = vpack.c.bf16 %v383_v39, %v383_v39  ;;  %2947 = vrot.lane.b32.xlu0 %v1238_v26, %s4272_s29  ;;  %v340_v36 = vpop.f32.mrf.mxu1  ;;  %v295_v51 = vpop.f32.mrf.mxu0 }
 0x1bf   :  { %v4533_v43 = vpack.c.bf16 %v340_v36, %v340_v36  ;;  %v4546_v56 = vpack.c.bf16 %v295_v51, %v295_v51 }
 0x1c0   :  { %v826_v44 = vsel %vm748_vm12, %v4530_v34, 0  ;;  %v1699_v4 = vunpack.c.l.b16 %v4530_v34 }
 0x1c1   :  { %4038 = vmatmul.msk.bf16.vlgmr.msra.gmra.mxu3 %vm422_vm11, %v395_v33  ;;  %4040 = vmatmul.msk.bf16.vlgmr.msrb.gmra.mxu0 %vm422_vm11, %v397_v42  ;;  %v522_v45 = vsel %vm422_vm11, %v4533_v43, 0  ;;  %v1353_v8 = vunpack.c.l.b16 %v4533_v43  ;;  %v1348_v24 = vunpack.c.l.b16 %v4546_v56  ;;  %v807_v42 = vsel %vm748_vm12, %v4567_v0, 0 }
 0x1c2   :  { %759 = vmatpush.bf16.msra.mxu0 %v750_v31  ;;  %531 = vmatpush.bf16.xpose.msrb.mxu1 %v522_v45  ;;  %v1700_v6 = vpack.c.b16 %v1699_v4, %v1699_v4 }
 0x1c3   :  { %v4586_v9 = vpack.c.b16 %v1353_v8, %v1353_v8  ;;  %v1349_v52 = vpack.c.b16 %v1348_v24, %v1348_v24 }
 0x1c5   :  { %v385_v53 = vpop.f32.mrf.mxu2  ;;  %1629 = vrot.lane.b32.xlu1 %v1628_v48, %s4270_s1  ;;  %2144 = vrot.lane.b32.xlu2 %v1262_v47, %s4271_s2 }
 0x1c6   :  { %835 = vmatpush.bf16.msrb.mxu0 %v826_v44  ;;  %v414_v54 = vpack.c.bf16 %v385_v53, %v385_v53  ;;  %1263 = vrot.lane.b32.xlu0 %v1262_v47, %s4270_s1 }
 0x1c8   :  { %v845_v20 = vsel %vm748_vm12, %v414_v54, 0  ;;  %v1723_v11 = vunpack.c.l.b16 %v414_v54 }
 0x1c9   :  { %4041 = vmatmul.msk.bf16.vlgmr.msrb.gmra.mxu1 %vm422_vm11, %v4546_v56 }
 0x1ca   :  { %778 = vmatpush.bf16.msra.mxu1 %v769_v46  ;;  %v4594_v13 = vpack.c.b16 %v1723_v11, %v1723_v11 }
 0x1cd   :  { %2471 = vrot.lane.b32.xlu1 %v1628_v48, %s4271_s2  ;;  %2970 = vrot.lane.b32.xlu2 %v1267_v57, %s4272_s29 }
 0x1ce   :  { %854 = vmatpush.bf16.msrb.mxu1 %v845_v20  ;;  %2146 = vrot.lane.b32.xlu0 %v1267_v57, %s4271_s2 }
 0x1d1   :  { %4039 = vmatmul.msk.bf16.vlgmr.msrb.gmra.mxu3 %vm422_vm11, %v396_v60 }
 0x1d5   :  { %3295 = vrot.lane.b32.xlu1 %v1628_v48, %s4272_s29  ;;  %1653 = vrot.lane.b32.xlu2 %v1652_v61, %s4270_s1 }
 0x1d6   :  { %2492 = vrot.lane.b32.xlu0 %v1652_v61, %s4271_s2 }
 0x1dd   :  { %1268 = vrot.lane.b32.xlu1 %v1267_v57, %s4270_s1  ;;  %1297 = vrot.lane.b32.xlu2 %v1296_v50, %s4270_s1 }
 0x1de   :  { %3316 = vrot.lane.b32.xlu0 %v1652_v61, %s4272_s29 }
 0x1e5   :  { %2968 = vrot.lane.b32.xlu1 %v1262_v47, %s4272_s29  ;;  %1292 = vrot.lane.b32.xlu2 %v1291_v63, %s4270_s1 }
 0x1e6   :  { %2993 = vrot.lane.b32.xlu0 %v1296_v50, %s4272_s29 }
 0x1ed   :  { %2167 = vrot.lane.b32.xlu1 %v1291_v63, %s4271_s2  ;;  %2169 = vrot.lane.b32.xlu2 %v1296_v50, %s4271_s2 }
 0x1ee   :  { %1321 = vrot.lane.b32.xlu0 %v1320_v1, %s4270_s1 }
 0x1f5   :  { %1677 = vrot.lane.b32.xlu1 %v1676_v2, %s4270_s1  ;;  %2991 = vrot.lane.b32.xlu2 %v1291_v63, %s4272_s29 }
 0x1f6   :  { %3014 = vrot.lane.b32.xlu0 %v1320_v1, %s4272_s29 }
 0x1f7   :  { %v4577_v58 = vpop.permute.xlu2 %1210 }
 0x1fd   :  { %2513 = vrot.lane.b32.xlu2 %v1676_v2, %s4271_s2  ;;  %2192 = vrot.lane.b32.xlu1 %v1325_v5, %s4271_s2 }
 0x1fe   :  { %3358 = vrot.lane.b32.xlu0 %v1700_v6, %s4272_s29 }
 0x1ff   :  { %v4583_v7 = vpop.permute.xlu2 %1605 }
 0x205   :  { %3337 = vrot.lane.b32.xlu2 %v1676_v2, %s4272_s29  ;;  %1701 = vrot.lane.b32.xlu1 %v1700_v6, %s4270_s1 }
 0x206   :  { %2215 = vrot.lane.b32.xlu0 %v4586_v9, %s4271_s2 }
 0x207   :  { %v4592_v10 = vpop.permute.xlu2 %2450 }
 0x20d   :  { %2534 = vrot.lane.b32.xlu1 %v1700_v6, %s4271_s2  ;;  %1326 = vrot.lane.b32.xlu2 %v1325_v5, %s4270_s1 }
 0x20e   :  { %1725 = vrot.lane.b32.xlu0 %v4594_v13, %s4270_s1 }
 0x20f   :  { %v4600_v14 = vpop.permute.xlu1 %1205  ;;  %v4602_v15 = vpop.permute.xlu2 %2121 }
 0x210   :  { %v4604_v16 = vpop.permute.xlu0 %2098 }
 0x211   :  { %v343_v17 = vpop.f32.mrf.mxu1  ;;  %v298_v18 = vpop.f32.mrf.mxu0 }
 0x212   :  { %v407_v19 = vpack.c.bf16 %v343_v17, %v343_v17  ;;  %v399_v21 = vpack.c.bf16 %v298_v18, %v298_v18 }
 0x214   :  { %v541_v40 = vsel %vm422_vm11, %v407_v19, 0  ;;  %v1377_v28 = vunpack.c.l.b16 %v399_v21  ;;  %v1382_v47 = vunpack.c.l.b16 %v407_v19 }
 0x215   :  { %1355 = vrot.lane.b32.xlu1 %v4586_v9, %s4270_s1  ;;  %2190 = vrot.lane.b32.xlu2 %v1320_v1, %s4271_s2 }
 0x216   :  { %2555 = vrot.lane.b32.xlu0 %v4594_v13, %s4271_s2  ;;  %550 = vmatpush.bf16.xpose.msrb.mxu2 %v541_v40  ;;  %v4623_v39 = vpack.c.b16 %v1377_v28, %v1377_v28  ;;  %v4644_v55 = vpack.c.b16 %v1382_v47, %v1382_v47 }
 0x217   :  { %v4613_v22 = vpop.permute.xlu1 %2100  ;;  %v4615_v23 = vpop.permute.xlu2 %2945 }
 0x218   :  { %v388_v26 = vpop.f32.mrf.mxu2  ;;  %v4618_v27 = vpop.permute.xlu0 %2922 }
 0x219   :  { %v345_v29 = vpop.f32.mrf.mxu1  ;;  %v4620_v30 = vpack.c.bf16 %v388_v26, %v388_v26  ;;  %v300_v36 = vpop.f32.mrf.mxu0 }
 0x21a   :  { %v408_v31 = vpack.c.bf16 %v345_v29, %v345_v29  ;;  %v400_v53 = vpack.c.bf16 %v300_v36, %v300_v36 }
 0x21b   :  { %v864_v34 = vsel %vm748_vm12, %v4620_v30, 0 }
 0x21c   :  { %v560_v33 = vsel %vm422_vm11, %v408_v31, 0  ;;  %v1411_v37 = vunpack.c.l.b16 %v408_v31  ;;  %v1406_v3 = vunpack.c.l.b16 %v400_v53 }
 0x21d   :  { %4042 = vmatmul.msk.bf16.vlgmr.msrb.gmra.mxu2 %vm422_vm11, %v399_v21  ;;  %3016 = vrot.lane.b32.xlu2 %v1325_v5, %s4272_s29 }
 0x21e   :  { %797 = vmatpush.bf16.msra.mxu2 %v788_v35  ;;  %2213 = vrot.lane.b32.xlu1 %v1349_v52, %s4271_s2  ;;  %v4663_v0 = vpack.c.b16 %v1411_v37, %v1411_v37  ;;  %v4679_v17 = vpack.c.b16 %v1406_v3, %v1406_v3  ;;  %v1747_v35 = vunpack.c.l.b16 %v4620_v30 }
 0x21f   :  { %569 = vmatpush.bf16.xpose.msra.mxu3 %v560_v33  ;;  %1379 = vrot.lane.b32.xlu0 %v4623_v39, %s4270_s1  ;;  %v4634_v43 = vpop.permute.xlu1 %2924  ;;  %v4636_v44 = vpop.permute.xlu2 %2144 }
 0x220   :  { %v390_v45 = vpop.f32.mrf.mxu2  ;;  %v4638_v46 = vpop.permute.xlu0 %1234  ;;  %v1748_v29 = vpack.c.b16 %v1747_v35, %v1747_v35 }
 0x221   :  { %v416_v48 = vpack.c.bf16 %v390_v45, %v390_v45 }
 0x222   :  { %873 = vmatpush.bf16.msrb.mxu2 %v864_v34 }
 0x223   :  { %v883_v20 = vsel %vm748_vm12, %v416_v48, 0  ;;  %v1771_v24 = vunpack.c.l.b16 %v416_v48 }
 0x224   :  { %v438_v54 = vpop.f32.mrf.mxu3 }
 0x225   :  { %v577_v56 = vsel %vm4640_vm13, %v438_v54, -inf  ;;  %1350 = vrot.lane.b32.xlu2 %v1349_v52, %s4270_s1  ;;  %v4697_v33 = vpack.c.b16 %v1771_v24, %v1771_v24 }
 0x226   :  { %4043 = vmatmul.msk.bf16.vlgmr.msra.gmra.mxu3 %vm422_vm11, %v400_v53  ;;  %v585_v57 = vsel %vm422_vm11, %v577_v56, -inf  ;;  %3039 = vrot.lane.b32.xlu1 %v4586_v9, %s4272_s29 }
 0x227   :  { %816 = vmatpush.bf16.msrb.mxu3 %v807_v42  ;;  %v586_v25 = vrot.slane %v585_v57, 4  ;;  %2238 = vrot.lane.b32.xlu0 %v4644_v55, %s4271_s2  ;;  %v4656_v59 = vpop.permute.xlu1 %3274  ;;  %v4658_v60 = vpop.permute.xlu2 %2970 }
 0x228   :  { %v4660_v61 = vpop.permute.xlu0 %2123 }
 0x229   :  { %v587_v50 = vmax.f32 %v585_v57, %v586_v25 }
 0x22b   :  { %892 = vmatpush.bf16.msra.mxu3 %v883_v20  ;;  %v588_v62 = vrot.slane %v587_v50, 2 }
 0x22c   :  { %v440_v63 = vpop.f32.mrf.mxu3 }
 0x22d   :  { %v589_v12 = vmax.f32 %v587_v50, %v588_v62  ;;  %3037 = vrot.lane.b32.xlu2 %v1349_v52, %s4272_s29 }
 0x22e   :  { %1384 = vrot.lane.b32.xlu1 %v4644_v55, %s4270_s1 }
 0x22f   :  { %v590_v1 = vrot.slane %v589_v12, 1  ;;  %1413 = vrot.lane.b32.xlu0 %v4663_v0, %s4270_s1  ;;  %v4669_v49 = vpop.permute.xlu1 %1239  ;;  %v4671_v2 = vpop.permute.xlu2 %1653 }
 0x230   :  { %v4673_v5 = vpop.permute.xlu0 %2947 }
 0x231   :  { %v591_v4 = vmax.f32 %v589_v12, %v590_v1 }
 0x233   :  { %v641_v6 = vsub.f32 %v577_v56, %v591_v4 }
 0x234   :  { %v457_v8 = vpop.f32.mrf.mxu3 }
 0x235   :  { %v649_v9 = vmul.f32 1.442695, %v641_v6  ;;  %v578_v11 = vsel %vm4640_vm13, %v457_v8, -inf  ;;  %3379 = vrot.lane.b32.xlu2 %v4594_v13, %s4272_s29 }
 0x236   :  { %v592_v18 = vsel %vm422_vm11, %v578_v11, -inf  ;;  %3060 = vrot.lane.b32.xlu1 %v4623_v39, %s4272_s29 }
 0x237   :  { %4141 = vpow2.f32 %v649_v9  ;;  %v593_v19 = vrot.slane %v592_v18, 4  ;;  %3083 = vrot.lane.b32.xlu0 %v4679_v17, %s4272_s29  ;;  %v4686_v40 = vpop.permute.xlu1 %1629  ;;  %v4688_v21 = vpop.permute.xlu2 %1297 }
 0x238   :  { %v4691_v28 = vpop.permute.xlu0 %1263 }
 0x239   :  { %v594_v13 = vmax.f32 %v592_v18, %v593_v19 }
 0x23b   :  { %v595_v26 = vrot.slane %v594_v13, 2 }
 0x23c   :  { %v459_v31 = vpop.f32.mrf.mxu3 }
 0x23d   :  { %v4693_v32 = vpop.eup %4141  ;;  %v596_v52 = vmax.f32 %v594_v13, %v595_v26  ;;  %2236 = vrot.lane.b32.xlu2 %v4623_v39, %s4271_s2 }
 0x23e   :  { %v665_v34 = vsel %vm422_vm11, %v4693_v32, 0.0  ;;  %1749 = vrot.lane.b32.xlu1 %v1748_v29, %s4270_s1  ;;  %v514_v30 = vpop.f32.mrf.mxu0 }
 0x23f   :  { %v666_v36 = vrot.slane %v665_v34, 4  ;;  %v597_v38 = vrot.slane %v596_v52, 1  ;;  %1773 = vrot.lane.b32.xlu0 %v4697_v33, %s4270_s1  ;;  %v581_v41 = vsel %vm4640_vm13, %v514_v30, -inf  ;;  %v4706_v42 = vpop.permute.xlu1 %2471  ;;  %v4708_v45 = vpop.permute.xlu2 %1292 }
 0x240   :  { %v613_v39 = vsel %vm422_vm11, %v581_v41, -inf  ;;  %v4711_v62 = vpop.permute.xlu0 %2146 }
 0x241   :  { %v667_v47 = vadd.f32 %v666_v36, %v665_v34  ;;  %v598_v48 = vmax.f32 %v596_v52, %v597_v38  ;;  %v614_v53 = vrot.slane %v613_v39, 4 }
 0x243   :  { %v668_v54 = vrot.slane %v667_v47, 2  ;;  %v642_v56 = vsub.f32 %v578_v11, %v598_v48  ;;  %v615_v20 = vmax.f32 %v613_v39, %v614_v53 }
 0x244   :  { %v476_v57 = vpop.f32.mrf.mxu3 }
 0x245   :  { %v669_v25 = vadd.f32 %v668_v54, %v667_v47  ;;  %v651_v37 = vmul.f32 1.442695, %v642_v56  ;;  %v616_v50 = vrot.slane %v615_v20, 2  ;;  %v579_v63 = vsel %vm4640_vm13, %v476_v57, -inf  ;;  %3062 = vrot.lane.b32.xlu2 %v4644_v55, %s4272_s29 }
 0x246   :  { %v599_v12 = vsel %vm422_vm11, %v579_v63, -inf  ;;  %3400 = vrot.lane.b32.xlu1 %v1748_v29, %s4272_s29  ;;  %v516_v1 = vpop.f32.mrf.mxu0  ;;  %v533_v3 = vpop.f32.mrf.mxu1 }
 0x247   :  { %v670_v4 = vrot.slane %v669_v25, 1  ;;  %4143 = vpow2.f32 %v651_v37  ;;  %v617_v6 = vmax.f32 %v615_v20, %v616_v50  ;;  %v600_v8 = vrot.slane %v599_v12, 4  ;;  %3421 = vrot.lane.b32.xlu0 %v4697_v33, %s4272_s29  ;;  %v4721_v9 = vpop.permute.xlu1 %3295  ;;  %v4723_v11 = vpop.permute.xlu2 %2169 }
 0x248   :  { %v582_v55 = vsel %vm4640_vm13, %v533_v3, -inf }
 0x249   :  { %v4727_v18 = vadd.f32 %v670_v4, %v669_v25  ;;  %v618_v19 = vrot.slane %v617_v6, 1  ;;  %v601_v35 = vmax.f32 %v599_v12, %v600_v8  ;;  %v620_v24 = vsel %vm422_vm11, %v582_v55, -inf }
 0x24a   :  { %v621_v13 = vrot.slane %v620_v24, 4 }
 0x24b   :  { %4145 = vrcp.f32 %v4727_v18  ;;  %v619_v26 = vmax.f32 %v617_v6, %v618_v19  ;;  %v602_v31 = vrot.slane %v601_v35, 2 }
 0x24c   :  { %v622_v52 = vmax.f32 %v620_v24, %v621_v13  ;;  %v478_v34 = vpop.f32.mrf.mxu3 }
 0x24d   :  { %v4731_v30 = vpop.eup %4143  ;;  %v645_v36 = vsub.f32 %v581_v41, %v619_v26  ;;  %v603_v38 = vmax.f32 %v601_v35, %v602_v31  ;;  %2576 = vrot.lane.b32.xlu2 %v1748_v29, %s4271_s2  ;;  %v4742_v41 = vpop.permute.xlu0 %2492  ;;  %v1216_v26 = vsel %vm422_vm11, %v4577_v58, 0 }
 0x24e   :  { %v672_v39 = vsel %vm422_vm11, %v4731_v30, 0.0  ;;  %v623_v47 = vrot.slane %v622_v52, 2  ;;  %2259 = vrot.lane.b32.xlu1 %v4679_v17, %s4271_s2  ;;  %v535_v48 = vpop.f32.mrf.mxu1 }
 0x24f   :  { %v673_v53 = vrot.slane %v672_v39, 4  ;;  %v657_v54 = vmul.f32 1.442695, %v645_v36  ;;  %v604_v56 = vrot.slane %v603_v38, 1  ;;  %v4738_v20 = vpop.permute.xlu1 %1268  ;;  %v4740_v57 = vpop.permute.xlu2 %2991 }
 0x250   :  { %5604 = vst [vmem:[#allocation2_spill] sm:$0xff] %v4740_v57  ;;  %v624_v25 = vmax.f32 %v622_v52, %v623_v47 }
 0x251   :  { %v4146_v37 = vpop.eup %4145  ;;  %v674_v29 = vadd.f32 %v673_v53, %v672_v39  ;;  %4147 = vpow2.f32 %v657_v54  ;;  %v605_v50 = vmax.f32 %v603_v38, %v604_v56 }
 0x252   :  { %v729_v12 = vmul.f32 %v4146_v37, %v4693_v32  ;;  %v625_v1 = vrot.slane %v624_v25, 1 }
 0x253   :  { %v675_v3 = vrot.slane %v674_v29, 2  ;;  %v643_v4 = vsub.f32 %v579_v63, %v605_v50 }
 0x254   :  { %v737_v6 = vpack.c.bf16 %v729_v12, %v729_v12  ;;  %v626_v8 = vmax.f32 %v624_v25, %v625_v1  ;;  %v495_v19 = vpop.f32.mrf.mxu3 }
 0x255   :  { %v676_v35 = vadd.f32 %v675_v3, %v674_v29  ;;  %v653_v24 = vmul.f32 1.442695, %v643_v4  ;;  %v580_v13 = vsel %vm4640_vm13, %v495_v19, -inf  ;;  %1408 = vrot.lane.b32.xlu2 %v4679_v17, %s4270_s1  ;;  %v4760_v48 = vpop.permute.xlu0 %3316 }
 0x256   :  { %v646_v31 = vsub.f32 %v582_v55, %v626_v8  ;;  %v606_v32 = vsel %vm422_vm11, %v580_v13, -inf  ;;  %3085 = vrot.lane.b32.xlu1 %v4663_v0, %s4272_s29  ;;  %4044 = vmatmul.msk.bf16.vlgmr.msra.gmra.mxu0 %vm422_vm11, %v737_v6 }
 0x257   :  { %v4148_v63 = vpop.eup %4147  ;;  %v677_v52 = vrot.slane %v676_v35, 1  ;;  %4149 = vpow2.f32 %v653_v24  ;;  %v607_v34 = vrot.slane %v606_v32, 4  ;;  %1225 = vmatpush.bf16.xpose.msra.mxu0 %v1216_v26  ;;  %v4755_v36 = vpop.permute.xlu1 %2968 }
 0x258   :  { %5605 = vst [vmem:[#allocation3_spill] sm:$0xff] %v4755_v36  ;;  %v659_v38 = vmul.f32 1.442695, %v646_v31  ;;  %v693_v17 = vsel %vm422_vm11, %v4148_v63, 0.0  ;;  %v4758_v55 = vpop.permute.xlu2 %2513 }
 0x259   :  { %v678_v39 = vadd.f32 %v677_v52, %v676_v35  ;;  %v608_v58 = vmax.f32 %v606_v32, %v607_v34  ;;  %v694_v47 = vrot.slane %v693_v17, 4 }
 0x25a   :  { %4151 = vpow2.f32 %v659_v38 }
 0x25b   :  { %4153 = vrcp.f32 %v678_v39  ;;  %v609_v53 = vrot.slane %v608_v58, 2  ;;  %v695_v54 = vadd.f32 %v694_v47, %v693_v17 }
 0x25c   :  { %v497_v56 = vpop.f32.mrf.mxu3 }
 0x25d   :  { %v4150_v25 = vpop.eup %4149  ;;  %v610_v37 = vmax.f32 %v608_v58, %v609_v53  ;;  %2261 = vrot.lane.b32.xlu2 %v4663_v0, %s4271_s2  ;;  %v696_v29 = vrot.slane %v695_v54, 2  ;;  %v4773_v58 = vpop.permute.xlu0 %2993 }
 0x25e   :  { %v679_v50 = vsel %vm422_vm11, %v4150_v25, 0.0  ;;  %2597 = vrot.lane.b32.xlu1 %v4697_v33, %s4271_s2 }
 0x25f   :  { %v680_v12 = vrot.slane %v679_v50, 4  ;;  %v611_v1 = vrot.slane %v610_v37, 1  ;;  %v4767_v3 = vpop.permute.xlu1 %2167  ;;  %v697_v4 = vadd.f32 %v696_v29, %v695_v54  ;;  %v1245_v54 = vsel %vm422_vm11, %v4669_v49, 0 }
 0x260   :  { %v4152_v6 = vpop.eup %4151  ;;  %v4771_v34 = vpop.permute.xlu2 %3337 }
 0x261   :  { %v4154_v8 = vpop.eup %4153  ;;  %v681_v19 = vadd.f32 %v680_v12, %v679_v50  ;;  %v700_v35 = vsel %vm422_vm11, %v4152_v6, 0.0  ;;  %v612_v24 = vmax.f32 %v610_v37, %v611_v1  ;;  %v698_v26 = vrot.slane %v697_v4, 1  ;;  %5606 = vst [vmem:[#allocation4_spill] sm:$0xff] %v4771_v34 }
 0x262   :  { %v730_v0 = vmul.f32 %v4154_v8, %v4731_v30  ;;  %v701_v31 = vrot.slane %v700_v35, 4 }
 0x263   :  { %v682_v32 = vrot.slane %v681_v19, 2  ;;  %v644_v52 = vsub.f32 %v580_v13, %v612_v24  ;;  %v699_v33 = vadd.f32 %v698_v26, %v697_v4 }
 0x264   :  { %v738_v38 = vpack.c.bf16 %v730_v0, %v730_v0  ;;  %v702_v17 = vadd.f32 %v701_v31, %v700_v35 }
 0x265   :  { %v683_v47 = vadd.f32 %v682_v32, %v681_v19  ;;  %v655_v53 = vmul.f32 1.442695, %v644_v52  ;;  %4155 = vrcp.f32 %v699_v33  ;;  %v1322_v49 = vpop.permute.xlu0 %1321 }
 0x266   :  { %v703_v56 = vrot.slane %v702_v17, 2  ;;  %4045 = vmatmul.msk.bf16.vlgmr.msra.gmra.mxu1 %vm422_vm11, %v738_v38 }
 0x267   :  { %v684_v30 = vrot.slane %v683_v47, 1  ;;  %4157 = vpow2.f32 %v655_v53  ;;  %1254 = vmatpush.bf16.xpose.msra.mxu1 %v1245_v54  ;;  %v4778_v13 = vpop.permute.xlu1 %1677  ;;  %v1274_v54 = vsel %vm422_vm11, %v4738_v20, 0 }
 0x268   :  { %v704_v37 = vadd.f32 %v703_v56, %v702_v17  ;;  %v1327_v19 = vpop.permute.xlu2 %1326 }
 0x269   :  { %v685_v29 = vadd.f32 %v684_v30, %v683_v47  ;;  %930 = vxpose.xlu0.b32.start.end [1/1] (short) (narrow) %v678_v39, 8  ;;  %v1332_v31 = vsel %vm422_vm11, %v1327_v19, 0 }
 0x26a   :  { %v705_v50 = vrot.slane %v704_v37, 1 }
 0x26b   :  { %v4156_v12 = vpop.eup %4155  ;;  %4159 = vrcp.f32 %v685_v29 }
 0x26c   :  { %v706_v1 = vadd.f32 %v705_v50, %v704_v37  ;;  %v733_v4 = vmul.f32 %v4156_v12, %v4148_v63 }
 0x26d   :  { %v4158_v8 = vpop.eup %4157  ;;  %v4788_v50 = vpop.permute.xlu0 %3014 }
 0x26e   :  { %4161 = vrcp.f32 %v706_v1  ;;  %v741_v35 = vpack.c.bf16 %v733_v4, %v733_v4  ;;  %v686_v24 = vsel %vm422_vm11, %v4158_v8, 0.0 }
 0x26f   :  { %v4781_v26 = vpop.permute.xlu1 %2192  ;;  %v687_v0 = vrot.slane %v686_v24, 4 }
 0x270   :  { %4048 = vmatmul.msk.bf16.vlgmr.msrb.gmra.mxu0 %vm422_vm11, %v741_v35  ;;  %v4799_v19 = vpop.permute.xlu2 %2190 }
 0x271   :  { %v4160_v39 = vpop.eup %4159  ;;  %1026 = vxpose.xlu0.b32.start.end [1/1] (short) (narrow) %v699_v33, 8  ;;  %1341 = vmatpush.bf16.xpose.msrb.mxu0 %v1332_v31  ;;  %v688_v32 = vadd.f32 %v687_v0, %v686_v24  ;;  %v1303_v24 = vsel %vm422_vm11, %v4688_v21, 0 }
 0x272   :  { %v731_v52 = vmul.f32 %v4160_v39, %v4150_v25 }
 0x273   :  { %v689_v63 = vrot.slane %v688_v32, 2 }
 0x274   :  { %v4162_v38 = vpop.eup %4161  ;;  %v739_v17 = vpack.c.bf16 %v731_v52, %v731_v52 }
 0x275   :  { %v734_v47 = vmul.f32 %v4162_v38, %v4152_v6  ;;  %v690_v53 = vadd.f32 %v689_v63, %v688_v32  ;;  %v1611_v6 = vsel %vm748_vm12, %v4583_v7, 0  ;;  %v4797_v12 = vpop.permute.xlu0 %3358 }
 0x276   :  { %4046 = vmatmul.msk.bf16.vlgmr.msra.gmra.mxu2 %vm422_vm11, %v739_v17 }
 0x277   :  { %v742_v56 = vpack.c.bf16 %v734_v47, %v734_v47  ;;  %1283 = vmatpush.bf16.xpose.msra.mxu2 %v1274_v54  ;;  %v1702_v30 = vpop.permute.xlu1 %1701  ;;  %v691_v37 = vrot.slane %v690_v53, 1 }
 0x278   :  { %v1707_v21 = vsel %vm748_vm12, %v1702_v30, 0 }
 0x279   :  { %4049 = vmatmul.msk.bf16.vlgmr.msrb.gmra.mxu1 %vm422_vm11, %v742_v56  ;;  %v692_v33 = vadd.f32 %v691_v37, %v690_v53 }
 0x27b   :  { %4163 = vrcp.f32 %v692_v33  ;;  %994 = vxpose.xlu0.b32.start.end [1/1] (short) (narrow) %v692_v33, 8 }
 0x27f   :  { %v4791_v25 = vpop.permute.xlu1 %2534 }
 0x280   :  { %4052 = vmatmul.msk.bf16.vlgmr.msra.gmra.mxu0 %vm422_vm11, %v4600_v14  ;;  %v1635_v14 = vsel %vm748_vm12, %v4686_v40, 0 }
 0x281   :  { %v4164_v20 = vpop.eup %4163  ;;  %1620 = vmatpush.bf16.msra.mxu0 %v1611_v6 }
 0x282   :  { %v732_v4 = vmul.f32 %v4164_v20, %v4158_v8  ;;  %v4811_v8 = vpop.permute.xlu2 %3016 }
 0x283   :  { %962 = vxpose.xlu2.b32.start.end [1/1] (short) (narrow) %v685_v29, 8  ;;  %v4809_v29 = vpop.permute.xlu0 %2215 }
 0x284   :  { %v740_v35 = vpack.c.bf16 %v732_v4, %v732_v4 }
 0x286   :  { %4047 = vmatmul.msk.bf16.vlgmr.msrb.gmra.mxu3 %vm422_vm11, %v740_v35 }
 0x287   :  { %1312 = vmatpush.bf16.xpose.msrb.mxu3 %v1303_v24  ;;  %v1356_v0 = vpop.permute.xlu1 %1355 }
 0x288   :  { %v1361_v7 = vsel %vm422_vm11, %v1356_v0, 0 }
 0x289   :  { %4053 = vmatmul.msk.bf16.vlgmr.msra.gmra.mxu1 %vm422_vm11, %v4638_v46 }
 0x28a   :  { %1370 = vmatpush.bf16.xpose.msrb.mxu1 %v1361_v7  ;;  %v1351_v39 = vpop.permute.xlu2 %1350 }
 0x28b   :  { %1058 = vxpose.xlu2.b32.start.end [1/1] (short) (narrow) %v706_v1, 8  ;;  %v1726_v31 = vpop.permute.xlu0 %1725 }
 0x28c   :  { %v1731_v46 = vsel %vm748_vm12, %v1726_v31, 0 }
 0x290   :  { %4056 = vmatmul.msk.bf16.vlgmr.msrb.gmra.mxu0 %vm422_vm11, %v1322_v49 }
 0x291   :  { %1716 = vmatpush.bf16.msrb.mxu0 %v1707_v21 }
 0x292   :  { %1644 = vmatpush.bf16.msra.mxu1 %v1635_v14 }
 0x293   :  { %898 = vxpose.xlu1.b32.start.end [1/1] (short) (narrow) %v4727_v18, 8  ;;  %v4824_v21 = vpop.permute.xlu0 %2555 }
 0x299   :  { %4057 = vmatmul.msk.bf16.vlgmr.msrb.gmra.mxu1 %vm422_vm11, %v1351_v39 }
 0x29a   :  { %1740 = vmatpush.bf16.msrb.mxu1 %v1731_v46  ;;  %v4827_v46 = vpop.permute.xlu1 %2213 }
 0x2a0   :  { %v552_v40 = vpop.f32.mrf.mxu2 }
 0x2a1   :  { %v583_v1 = vsel %vm4640_vm13, %v552_v40, -inf }
 0x2a2   :  { %v627_v32 = vsel %vm422_vm11, %v583_v1, -inf }
 0x2a3   :  { %v628_v52 = vrot.slane %v627_v32, 4 }
 0x2a5   :  { %v629_v63 = vmax.f32 %v627_v32, %v628_v52 }
 0x2a7   :  { %v630_v38 = vrot.slane %v629_v63, 2 }
 0x2a8   :  { %v554_v49 = vpop.f32.mrf.mxu2 }
 0x2a9   :  { %v631_v17 = vmax.f32 %v629_v63, %v630_v38  ;;  %v571_v47 = vpop.f32.mrf.mxu3 }
 0x2aa   :  { %v584_v18 = vsel %vm4640_vm13, %v571_v47, -inf }
 0x2ab   :  { %v632_v53 = vrot.slane %v631_v17, 1  ;;  %v634_v54 = vsel %vm422_vm11, %v584_v18, -inf }
 0x2ac   :  { %v635_v56 = vrot.slane %v634_v54, 4 }
 0x2ad   :  { %v633_v30 = vmax.f32 %v631_v17, %v632_v53  ;;  %v1380_v17 = vpop.permute.xlu0 %1379 }
 0x2ae   :  { %v636_v37 = vmax.f32 %v634_v54, %v635_v56  ;;  %v4832_v56 = vpop.permute.xlu2 %3037 }
 0x2af   :  { %v647_v33 = vsub.f32 %v583_v1, %v633_v30 }
 0x2b0   :  { %v637_v6 = vrot.slane %v636_v37, 2 }
 0x2b1   :  { %v661_v20 = vmul.f32 1.442695, %v647_v33  ;;  %v573_v4 = vpop.f32.mrf.mxu3 }
 0x2b2   :  { %v638_v35 = vmax.f32 %v636_v37, %v637_v6 }
 0x2b3   :  { %4165 = vpow2.f32 %v661_v20 }
 0x2b4   :  { %v639_v24 = vrot.slane %v638_v35, 1 }
 0x2b5   :  { %v4834_v20 = vpop.permute.xlu0 %2238 }
 0x2b6   :  { %v640_v0 = vmax.f32 %v638_v35, %v639_v24 }
 0x2b8   :  { %v648_v7 = vsub.f32 %v584_v18, %v640_v0  ;;  %v4830_v18 = vpop.permute.xlu1 %3039 }
 0x2b9   :  { %v4166_v14 = vpop.eup %4165 }
 0x2ba   :  { %v663_v31 = vmul.f32 1.442695, %v648_v7  ;;  %v707_v39 = vsel %vm422_vm11, %v4166_v14, 0.0  ;;  %v4836_v7 = vpop.permute.xlu2 %3379 }
 0x2bb   :  { %v708_v40 = vrot.slane %v707_v39, 4 }
 0x2bc   :  { %4167 = vpow2.f32 %v663_v31 }
 0x2bd   :  { %v709_v32 = vadd.f32 %v708_v40, %v707_v39 }
 0x2bf   :  { %v710_v1 = vrot.slane %v709_v32, 2 }
 0x2c0   :  { %v1385_v24 = vpop.permute.xlu1 %1384 }
 0x2c1   :  { %v711_v52 = vadd.f32 %v710_v1, %v709_v32  ;;  %v1390_v31 = vsel %vm422_vm11, %v1385_v24, 0  ;;  %v1414_v1 = vpop.permute.xlu0 %1413 }
 0x2c2   :  { %v4168_v63 = vpop.eup %4167 }
 0x2c3   :  { %v712_v38 = vrot.slane %v711_v52, 1  ;;  %v714_v49 = vsel %vm422_vm11, %v4168_v63, 0.0 }
 0x2c4   :  { %v715_v47 = vrot.slane %v714_v49, 4 }
 0x2c5   :  { %v713_v53 = vadd.f32 %v712_v38, %v711_v52 }
 0x2c6   :  { %v716_v54 = vadd.f32 %v715_v47, %v714_v49  ;;  %v4844_v49 = vpop.permute.xlu2 %2236  ;;  %v1659_v47 = vsel %vm748_vm12, %v4671_v2, 0 }
 0x2c7   :  { %4169 = vrcp.f32 %v713_v53  ;;  %1090 = vxpose.xlu0.b32.start.end [1/1] (short) (narrow) %v713_v53, 8 }
 0x2c8   :  { %v717_v30 = vrot.slane %v716_v54, 2 }
 0x2c9   :  { %v4862_v2 = vpop.permute.xlu0 %3083 }
 0x2ca   :  { %v718_v37 = vadd.f32 %v717_v30, %v716_v54  ;;  %v1683_v30 = vsel %vm748_vm12, %v4778_v13, 0  ;;  %5611 = vst [vmem:[#allocation9_spill] sm:$0xff] %v4862_v2 }
 0x2cc   :  { %v719_v33 = vrot.slane %v718_v37, 1 }
 0x2cd   :  { %v4170_v6 = vpop.eup %4169 }
 0x2ce   :  { %v735_v4 = vmul.f32 %v4170_v6, %v4166_v14  ;;  %v720_v35 = vadd.f32 %v719_v33, %v718_v37  ;;  %v1419_v14 = vsel %vm422_vm11, %v1414_v1, 0  ;;  %v4854_v54 = vpop.permute.xlu2 %3062 }
 0x2d0   :  { %v743_v0 = vpack.c.bf16 %v735_v4, %v735_v4  ;;  %1122 = vxpose.xlu1.b32.start.end [1/1] (short) (narrow) %v720_v35, 8  ;;  %4171 = vrcp.f32 %v720_v35 }
 0x2d1   :  { %v1774_v13 = vpop.permute.xlu0 %1773 }
 0x2d2   :  { %4050 = vmatmul.msk.bf16.vlgmr.msrb.gmra.mxu2 %vm422_vm11, %v743_v0 }
 0x2d3   :  { %1399 = vmatpush.bf16.xpose.msrb.mxu2 %v1390_v31  ;;  %v4840_v39 = vpop.f32.mrf.mxu0  ;;  %v1779_v31 = vsel %vm748_vm12, %v1774_v13, 0 }
 0x2d4   :  { %5607 = vst [vmem:[#allocation5_spill] sm:$0xff] %v4840_v39 }
 0x2d6   :  { %v4172_v40 = vpop.eup %4171  ;;  %v4864_v6 = vpop.permute.xlu2 %2576 }
 0x2d7   :  { %v736_v32 = vmul.f32 %v4172_v40, %v4168_v63  ;;  %v4852_v63 = vpop.permute.xlu1 %3060 }
 0x2d8   :  { %5609 = vst [vmem:[#allocation7_spill] sm:$0xff] %v4852_v63 }
 0x2d9   :  { %v744_v52 = vpack.c.bf16 %v736_v32, %v736_v32 }
 0x2db   :  { %4051 = vmatmul.msk.bf16.vlgmr.msra.gmra.mxu3 %vm422_vm11, %v744_v52  ;;  %v763_v38 = vpop.f32.mrf.mxu0 }
 0x2dc   :  { %1428 = vmatpush.bf16.xpose.msra.mxu3 %v1419_v14 }
 0x2e2   :  { %4054 = vmatmul.msk.bf16.vlgmr.msra.gmra.mxu2 %vm422_vm11, %v4691_v28  ;;  %v1750_v28 = vpop.permute.xlu1 %1749 }
 0x2e3   :  { %1668 = vmatpush.bf16.msra.mxu2 %v1659_v47  ;;  %v4850_v53 = vpop.f32.mrf.mxu1  ;;  %v1755_v4 = vsel %vm748_vm12, %v1750_v28, 0 }
 0x2e4   :  { %5608 = vst [vmem:[#allocation6_spill] sm:$0xff] %v4850_v53 }
 0x2ea   :  { %v4886_v39 = vpop.permute.xlu1 %3400 }
 0x2eb   :  { %4055 = vmatmul.msk.bf16.vlgmr.msrb.gmra.mxu3 %vm422_vm11, %v4708_v45  ;;  %v782_v37 = vpop.f32.mrf.mxu1  ;;  %v1409_v45 = vpop.permute.xlu2 %1408  ;;  %5615 = vst [vmem:[#allocation13_spill] sm:$0xff] %v4886_v39 }
 0x2ec   :  { %1692 = vmatpush.bf16.msrb.mxu3 %v1683_v30 }
 0x2ed   :  { %v4860_v33 = vpop.f32.mrf.mxu0 }
 0x2ee   :  { %5610 = vst [vmem:[#allocation8_spill] sm:$0xff] %v4860_v33 }
 0x2f2   :  { %4058 = vmatmul.msk.bf16.vlgmr.msrb.gmra.mxu2 %vm422_vm11, %v1380_v17 }
 0x2f3   :  { %1764 = vmatpush.bf16.msrb.mxu2 %v1755_v4 }
 0x2f5   :  { %v839_v35 = vpop.f32.mrf.mxu0 }
 0x2f6   :  { %v4868_v24 = vpop.f32.mrf.mxu1 }
 0x2f7   :  { %5612 = vst [vmem:[#allocation10_spill] sm:$0xff] %v4868_v24 }
 0x2f9   :  { %v4870_v0 = vpop.f32.mrf.mxu2 }
 0x2fa   :  { %5613 = vst [vmem:[#allocation11_spill] sm:$0xff] %v4870_v0 }
 0x2fb   :  { %4059 = vmatmul.msk.bf16.vlgmr.msra.gmra.mxu3 %vm422_vm11, %v1409_v45 }
 0x2fc   :  { %1788 = vmatpush.bf16.msra.mxu3 %v1779_v31 }
 0x2fd   :  { %v1227_v40 = vpop.f32.mrf.mxu0 }
 0x2fe   :  { %v858_v32 = vpop.f32.mrf.mxu1  ;;  %v1434_v1 = vsel %vm4640_vm13, %v1227_v40, -inf  ;;  %v5593_v40 = vmov 0  }
 0x2ff   :  { %v1442_v17 = vsel %vm422_vm11, %v1434_v1, -inf  ;;  %4118 = vset.pattern.permute.xlu2 %v5593_v40 }
 0x300   :  { %v1443_v52 = vrot.slane %v1442_v17, 4 }
 0x301   :  { %v801_v14 = vpop.f32.mrf.mxu2 }
 0x302   :  { %v1444_v38 = vmax.f32 %v1442_v17, %v1443_v52 }
 0x304   :  { %v1445_v47 = vrot.slane %v1444_v38, 2 }
 0x305   :  { %v1229_v30 = vpop.f32.mrf.mxu0 }
 0x306   :  { %v1446_v37 = vmax.f32 %v1444_v38, %v1445_v47  ;;  %v1256_v28 = vpop.f32.mrf.mxu1 }
 0x307   :  { %v1435_v4 = vsel %vm4640_vm13, %v1256_v28, -inf }
 0x308   :  { %v1447_v35 = vrot.slane %v1446_v37, 1  ;;  %v1449_v13 = vsel %vm422_vm11, %v1435_v4, -inf }
 0x309   :  { %v1450_v45 = vrot.slane %v1449_v13, 4  ;;  %v4880_v31 = vpop.f32.mrf.mxu3 }
 0x30a   :  { %5614 = vst [vmem:[#allocation12_spill] sm:$0xff] %v4880_v31  ;;  %v1448_v32 = vmax.f32 %v1446_v37, %v1447_v35 }
 0x30b   :  { %v1451_v33 = vmax.f32 %v1449_v13, %v1450_v45 }
 0x30c   :  { %v1498_v14 = vsub.f32 %v1434_v1, %v1448_v32 }
 0x30d   :  { %v1452_v17 = vrot.slane %v1451_v33, 2  ;;  %v1343_v52 = vpop.f32.mrf.mxu0 }
 0x30e   :  { %v1506_v30 = vmul.f32 1.442695, %v1498_v14  ;;  %v1258_v38 = vpop.f32.mrf.mxu1  ;;  %v1438_v47 = vsel %vm4640_vm13, %v1343_v52, -inf }
 0x30f   :  { %v1453_v28 = vmax.f32 %v1451_v33, %v1452_v17  ;;  %v1470_v0 = vsel %vm422_vm11, %v1438_v47, -inf }
 0x310   :  { %4173 = vpow2.f32 %v1506_v30  ;;  %v1471_v24 = vrot.slane %v1470_v0, 4 }
 0x311   :  { %v1454_v37 = vrot.slane %v1453_v28, 1  ;;  %v820_v35 = vpop.f32.mrf.mxu3 }
 0x312   :  { %v1472_v31 = vmax.f32 %v1470_v0, %v1471_v24 }
 0x313   :  { %v1455_v40 = vmax.f32 %v1453_v28, %v1454_v37  ;;  %v4892_v28 = vpop.permute.xlu0 %3421 }
 0x314   :  { %v1473_v13 = vrot.slane %v1472_v31, 2  ;;  %5616 = vst [vmem:[#allocation14_spill] sm:$0xff] %v4892_v28 }
 0x315   :  { %v1499_v1 = vsub.f32 %v1435_v4, %v1455_v40  ;;  %v1345_v45 = vpop.f32.mrf.mxu0  ;;  %v4894_v4 = vpop.permute.xlu1 %2259 }
 0x316   :  { %v4174_v32 = vpop.eup %4173  ;;  %v1474_v14 = vmax.f32 %v1472_v31, %v1473_v13  ;;  %v1372_v38 = vpop.f32.mrf.mxu1 }
 0x317   :  { %v1522_v53 = vsel %vm422_vm11, %v4174_v32, 0.0  ;;  %v1508_v52 = vmul.f32 1.442695, %v1499_v1  ;;  %v1439_v33 = vsel %vm4640_vm13, %v1372_v38, -inf  ;;  %v4896_v13 = vpop.permute.xlu2 %2261 }
 0x318   :  { %v1523_v17 = vrot.slane %v1522_v53, 4  ;;  %v1475_v30 = vrot.slane %v1474_v14, 1  ;;  %v1477_v2 = vsel %vm422_vm11, %v1439_v33, -inf }
 0x319   :  { %4175 = vpow2.f32 %v1508_v52  ;;  %v1478_v35 = vrot.slane %v1477_v2, 4 }
 0x31a   :  { %v1524_v24 = vadd.f32 %v1523_v17, %v1522_v53  ;;  %v1476_v0 = vmax.f32 %v1474_v14, %v1475_v30 }
 0x31b   :  { %v1479_v31 = vmax.f32 %v1477_v2, %v1478_v35  ;;  %v5617_v35 = vmov 0  }
 0x31c   :  { %v1525_v40 = vrot.slane %v1524_v24, 2  ;;  %v1502_v37 = vsub.f32 %v1438_v47, %v1476_v0  ;;  %v4902_v47 = vpop.trf.xlu0 }
 0x31d   :  { %v1480_v1 = vrot.slane %v1479_v31, 2  ;;  %5618 = vst [vmem:[#allocation15_spill] sm:$0xff] %v4902_v47 }
 0x31e   :  { %v1526_v45 = vadd.f32 %v1525_v40, %v1524_v24  ;;  %v1514_v38 = vmul.f32 1.442695, %v1502_v37  ;;  %v1374_v63 = vpop.f32.mrf.mxu1  ;;  %v4905_v24 = vpop.permute.xlu1 %3085 }
 0x31f   :  { %v4176_v39 = vpop.eup %4175  ;;  %v1481_v57 = vmax.f32 %v1479_v31, %v1480_v1  ;;  %v4907_v31 = vpop.trf.xlu2 }
 0x320   :  { %v1527_v34 = vrot.slane %v1526_v45, 1  ;;  %v1529_v52 = vsel %vm422_vm11, %v4176_v39, 0.0  ;;  %4177 = vpow2.f32 %v1514_v38  ;;  %5619 = vst [vmem:[#allocation16_spill] sm:$0xff] %v4907_v31 }
 0x321   :  { %v1530_v53 = vrot.slane %v1529_v52, 4  ;;  %v1482_v14 = vrot.slane %v1481_v57, 1 }
 0x322   :  { %v4899_v17 = vadd.f32 %v1527_v34, %v1526_v45 }
 0x323   :  { %v1531_v30 = vadd.f32 %v1530_v53, %v1529_v52  ;;  %v1483_v2 = vmax.f32 %v1481_v57, %v1482_v14  ;;  %4120 = vset.pattern.permute.xlu1 %v5617_v35 }
 0x324   :  { %4179 = vrcp.f32 %v4899_v17 }
 0x325   :  { %v1532_v63 = vrot.slane %v1531_v30, 2  ;;  %v1503_v0 = vsub.f32 %v1439_v33, %v1483_v2  ;;  %v4914_v33 = vpop.trf.xlu0 }
 0x326   :  { %v4178_v40 = vpop.eup %4177  ;;  %5620 = vst [vmem:[#allocation17_spill] sm:$0xff] %v4914_v33 }
 0x327   :  { %v1533_v37 = vadd.f32 %v1532_v63, %v1531_v30  ;;  %v1550_v1 = vsel %vm422_vm11, %v4178_v40, 0.0  ;;  %v1516_v34 = vmul.f32 1.442695, %v1503_v0  ;;  %v2106_v63 = vsel %vm422_vm11, %v4613_v22, 0  ;;  %v4919_v0 = vpop.permute.xlu1 %2597 }
 0x328   :  { %v1551_v45 = vrot.slane %v1550_v1, 4 }
 0x329   :  { %v1534_v38 = vrot.slane %v1533_v37, 1  ;;  %4181 = vpow2.f32 %v1516_v34 }
 0x32a   :  { %v4180_v57 = vpop.eup %4179  ;;  %v1552_v52 = vadd.f32 %v1551_v45, %v1550_v1  ;;  %1166 = vperm.xlu1 %4120, %v4907_v31   ;;  %v4921_v1 = vpop.trf.xlu2 }
 0x32b   :  { %v1586_v53 = vmul.f32 %v4180_v57, %v4174_v32  ;;  %v4911_v14 = vadd.f32 %v1534_v38, %v1533_v37 }
 0x32c   :  { %v1553_v28 = vrot.slane %v1552_v52, 2 }
 0x32d   :  { %v1594_v36 = vpack.c.bf16 %v1586_v53, %v1586_v53  ;;  %4183 = vrcp.f32 %v4911_v14  ;;  %v4932_v53 = vpop.trf.xlu0 }
 0x32e   :  { %v1554_v30 = vadd.f32 %v1553_v28, %v1552_v52  ;;  %4119 = vset.pattern.permute.xlu0 %v5617_v35 }
 0x32f   :  { %v4182_v2 = vpop.eup %4181  ;;  %4060 = vmatmul.msk.bf16.vlgmr.msra.gmra.mxu0 %vm422_vm11, %v1594_v36 }
 0x330   :  { %v1555_v32 = vrot.slane %v1554_v30, 1  ;;  %v1557_v37 = vsel %vm422_vm11, %v4182_v2, 0.0  ;;  %2115 = vmatpush.bf16.xpose.msra.mxu0 %v2106_v63 }
 0x331   :  { %v1558_v34 = vrot.slane %v1557_v37, 4 }
 0x332   :  { %v4925_v45 = vadd.f32 %v1555_v32, %v1554_v30  ;;  %1181 = vperm.xlu1 %4120, %v4921_v1   ;;  %v2129_v30 = vsel %vm422_vm11, %v4660_v61, 0 }
 0x333   :  { %v4184_v28 = vpop.eup %4183  ;;  %v1559_v35 = vadd.f32 %v1558_v34, %v1557_v37 }
 0x334   :  { %v1587_v38 = vmul.f32 %v4184_v28, %v4176_v39  ;;  %4185 = vrcp.f32 %v4925_v45  ;;  %v2198_v28 = vsel %vm422_vm11, %v4781_v26, 0 }
 0x335   :  { %v1560_v22 = vrot.slane %v1559_v35, 2  ;;  %1161 = vperm.xlu0 %4119, %v4902_v47  }
 0x336   :  { %v1595_v57 = vpack.c.bf16 %v1587_v38, %v1587_v38 }
 0x337   :  { %v1561_v52 = vadd.f32 %v1560_v22, %v1559_v35  ;;  %v4930_v36 = vpop.trf.xlu1  ;;  %v2221_v22 = vsel %vm422_vm11, %v4809_v29, 0 }
 0x338   :  { %1156 = vperm.xlu2 %4118, %v4930_v36   ;;  %4061 = vmatmul.msk.bf16.vlgmr.msra.gmra.mxu1 %vm422_vm11, %v1595_v57  ;;  %v2477_v57 = vsel %vm748_vm12, %v4706_v42, 0 }
 0x339   :  { %v1562_v63 = vrot.slane %v1561_v52, 1  ;;  %2138 = vmatpush.bf16.xpose.msra.mxu1 %v2129_v30 }
 0x33a   :  { %v4186_v39 = vpop.eup %4185  ;;  %1171 = vperm.xlu1 %4120, %v4932_v53  }
 0x33b   :  { %v1590_v32 = vmul.f32 %v4186_v39, %v4178_v40  ;;  %v4939_v37 = vadd.f32 %v1562_v63, %v1561_v52  ;;  %v2456_v40 = vsel %vm748_vm12, %v4592_v10, 0  ;;  %v2540_v52 = vsel %vm748_vm12, %v4791_v25, 0 }
 0x33d   :  { %v1598_v34 = vpack.c.bf16 %v1590_v32, %v1590_v32  ;;  %4187 = vrcp.f32 %v4939_v37 }
 0x33f   :  { %4064 = vmatmul.msk.bf16.vlgmr.msrb.gmra.mxu0 %vm422_vm11, %v1598_v34 }
 0x340   :  { %2207 = vmatpush.bf16.xpose.msrb.mxu0 %v2198_v28  ;;  %1176 = vperm.xlu2 %4118, %v4914_v33  }
 0x343   :  { %v4188_v61 = vpop.eup %4187 }
 0x344   :  { %v1591_v35 = vmul.f32 %v4188_v61, %v4182_v2 }
 0x346   :  { %v1599_v38 = vpack.c.bf16 %v1591_v35, %v1591_v35 }
 0x348   :  { %4065 = vmatmul.msk.bf16.vlgmr.msrb.gmra.mxu1 %vm422_vm11, %v1599_v38 }
 0x349   :  { %2230 = vmatpush.bf16.xpose.msrb.mxu1 %v2221_v22 }
 0x34f   :  { %4068 = vmatmul.msk.bf16.vlgmr.msra.gmra.mxu0 %vm422_vm11, %v4604_v16 }
 0x350   :  { %2465 = vmatpush.bf16.msra.mxu0 %v2456_v40 }
 0x355   :  { %v4953_v26 = vpop.f32.mrf.mxu2 }
 0x356   :  { %5621 = vst [vmem:[#allocation18_spill] sm:$0xff] %v4953_v26 }
 0x358   :  { %4069 = vmatmul.msk.bf16.vlgmr.msra.gmra.mxu1 %vm422_vm11, %v4602_v15  ;;  %v2561_v15 = vsel %vm748_vm12, %v4824_v21, 0 }
 0x359   :  { %2486 = vmatpush.bf16.msra.mxu1 %v2477_v57 }
 0x35d   :  { %v877_v29 = vpop.f32.mrf.mxu2 }
 0x35e   :  { %v4959_v2 = vpop.f32.mrf.mxu3 }
 0x35f   :  { %5622 = vst [vmem:[#allocation19_spill] sm:$0xff] %v4959_v2  ;;  %4072 = vmatmul.msk.bf16.vlgmr.msrb.gmra.mxu0 %vm422_vm11, %v4799_v19 }
 0x360   :  { %2549 = vmatpush.bf16.msrb.mxu0 %v2540_v52 }
 0x365   :  { %v1285_v10 = vpop.f32.mrf.mxu2 }
 0x366   :  { %v896_v16 = vpop.f32.mrf.mxu3  ;;  %v1436_v30 = vsel %vm4640_vm13, %v1285_v10, -inf }
 0x367   :  { %v1456_v42 = vsel %vm422_vm11, %v1436_v30, -inf }
 0x368   :  { %v1457_v63 = vrot.slane %v1456_v42, 4  ;;  %4073 = vmatmul.msk.bf16.vlgmr.msrb.gmra.mxu1 %vm422_vm11, %v4827_v46 }
 0x369   :  { %2570 = vmatpush.bf16.msrb.mxu1 %v2561_v15 }
 0x36a   :  { %v1458_v25 = vmax.f32 %v1456_v42, %v1457_v63 }
 0x36b   :  { %v4972_v39 = vpop.trf.xlu0 }
 0x36c   :  { %5623 = vst [vmem:[#allocation20_spill] sm:$0xff] %v4972_v39  ;;  %v1459_v19 = vrot.slane %v1458_v25, 2  ;;  %1186 = vperm.xlu0 %4119, %v4972_v39  }
 0x36d   :  { %v1287_v32 = vpop.f32.mrf.mxu2 }
 0x36e   :  { %v1460_v34 = vmax.f32 %v1458_v25, %v1459_v19  ;;  %v1314_v28 = vpop.f32.mrf.mxu3 }
 0x36f   :  { %v1437_v61 = vsel %vm4640_vm13, %v1314_v28, -inf }
 0x370   :  { %v1461_v35 = vrot.slane %v1460_v34, 1  ;;  %v1463_v21 = vsel %vm422_vm11, %v1437_v61, -inf }
 0x371   :  { %v1464_v38 = vrot.slane %v1463_v21, 4 }
 0x372   :  { %v1462_v22 = vmax.f32 %v1460_v34, %v1461_v35 }
 0x373   :  { %v1465_v40 = vmax.f32 %v1463_v21, %v1464_v38 }
 0x374   :  { %v1500_v46 = vsub.f32 %v1436_v30, %v1462_v22  ;;  %v4978_v57 = vpop.trf.xlu1 }
 0x375   :  { %5624 = vst [vmem:[#allocation21_spill] sm:$0xff] %v4978_v57  ;;  %v1466_v29 = vrot.slane %v1465_v40, 2  ;;  %1191 = vperm.xlu2 %4118, %v4978_v57   ;;  %v1401_v52 = vpop.f32.mrf.mxu2 }
 0x376   :  { %v1510_v10 = vmul.f32 1.442695, %v1500_v46  ;;  %v1316_v16 = vpop.f32.mrf.mxu3  ;;  %v1440_v42 = vsel %vm4640_vm13, %v1401_v52, -inf }
 0x377   :  { %v1467_v15 = vmax.f32 %v1465_v40, %v1466_v29  ;;  %v1484_v63 = vsel %vm422_vm11, %v1440_v42, -inf }
 0x378   :  { %4189 = vpow2.f32 %v1510_v10  ;;  %v1485_v25 = vrot.slane %v1484_v63, 4 }
 0x379   :  { %v1468_v19 = vrot.slane %v1467_v15, 1 }
 0x37a   :  { %v1486_v32 = vmax.f32 %v1484_v63, %v1485_v25 }
 0x37b   :  { %v1469_v34 = vmax.f32 %v1467_v15, %v1468_v19 }
 0x37c   :  { %v1487_v30 = vrot.slane %v1486_v32, 2 }
 0x37d   :  { %v1501_v28 = vsub.f32 %v1437_v61, %v1469_v34  ;;  %v1403_v35 = vpop.f32.mrf.mxu2 }
 0x37e   :  { %v4190_v21 = vpop.eup %4189  ;;  %v1488_v38 = vmax.f32 %v1486_v32, %v1487_v30  ;;  %v1430_v22 = vpop.f32.mrf.mxu3 }
 0x37f   :  { %v1536_v46 = vsel %vm422_vm11, %v4190_v21, 0.0  ;;  %v1512_v16 = vmul.f32 1.442695, %v1501_v28  ;;  %v1441_v52 = vsel %vm4640_vm13, %v1430_v22, -inf }
 0x380   :  { %v1537_v40 = vrot.slane %v1536_v46, 4  ;;  %v1489_v29 = vrot.slane %v1488_v38, 1  ;;  %v1491_v10 = vsel %vm422_vm11, %v1441_v52, -inf }
 0x381   :  { %4191 = vpow2.f32 %v1512_v16  ;;  %v1492_v2 = vrot.slane %v1491_v10, 4 }
 0x382   :  { %v1538_v63 = vadd.f32 %v1537_v40, %v1536_v46  ;;  %v1490_v15 = vmax.f32 %v1488_v38, %v1489_v29 }
 0x383   :  { %v1493_v25 = vmax.f32 %v1491_v10, %v1492_v2 }
 0x384   :  { %v1504_v61 = vsub.f32 %v1440_v42, %v1490_v15  ;;  %v1539_v19 = vrot.slane %v1538_v63, 2 }
 0x385   :  { %v1494_v34 = vrot.slane %v1493_v25, 2 }
 0x386   :  { %v1518_v32 = vmul.f32 1.442695, %v1504_v61  ;;  %v1432_v30 = vpop.f32.mrf.mxu3  ;;  %v1540_v35 = vadd.f32 %v1539_v19, %v1538_v63 }
 0x387   :  { %v4192_v26 = vpop.eup %4191  ;;  %v1495_v28 = vmax.f32 %v1493_v25, %v1494_v34 }
 0x388   :  { %4193 = vpow2.f32 %v1518_v32  ;;  %v1541_v39 = vrot.slane %v1540_v35, 1  ;;  %v1543_v22 = vsel %vm422_vm11, %v4192_v26, 0.0 }
 0x389   :  { %v1496_v31 = vrot.slane %v1495_v28, 1  ;;  %v1544_v57 = vrot.slane %v1543_v22, 4 }
 0x38a   :  { %v1542_v47 = vadd.f32 %v1541_v39, %v1540_v35 }
 0x38b   :  { %v1497_v16 = vmax.f32 %v1495_v28, %v1496_v31  ;;  %v1545_v33 = vadd.f32 %v1544_v57, %v1543_v22 }
 0x38c   :  { %4195 = vrcp.f32 %v1542_v47  ;;  %1858 = vxpose.xlu1.b32.start.end [1/1] (short) (narrow) %v1542_v47, 8 }
 0x38d   :  { %v1505_v2 = vsub.f32 %v1441_v52, %v1497_v16  ;;  %v1546_v42 = vrot.slane %v1545_v33, 2 }
 0x38e   :  { %v4194_v38 = vpop.eup %4193  ;;  %1794 = vxpose.xlu0.b32.start.end [1/1] (short) (narrow) %v4899_v17, 8  ;;  %v2152_v17 = vsel %vm422_vm11, %v4711_v62, 0  ;;  %v2175_v62 = vsel %vm422_vm11, %v4723_v11, 0 }
 0x38f   :  { %v1564_v46 = vsel %vm422_vm11, %v4194_v38, 0.0  ;;  %v1520_v40 = vmul.f32 1.442695, %v1505_v2  ;;  %v1547_v29 = vadd.f32 %v1546_v42, %v1545_v33 }
 0x390   :  { %v1565_v10 = vrot.slane %v1564_v46, 4 }
 0x391   :  { %4197 = vpow2.f32 %v1520_v40  ;;  %v1548_v63 = vrot.slane %v1547_v29, 1 }
 0x392   :  { %v4196_v15 = vpop.eup %4195  ;;  %v1566_v25 = vadd.f32 %v1565_v10, %v1564_v46 }
 0x393   :  { %v1588_v61 = vmul.f32 %v4196_v15, %v4190_v21  ;;  %v1549_v39 = vadd.f32 %v1548_v63, %v1547_v29 }
 0x394   :  { %v1567_v31 = vrot.slane %v1566_v25, 2 }
 0x395   :  { %v1596_v57 = vpack.c.bf16 %v1588_v61, %v1588_v61  ;;  %4199 = vrcp.f32 %v1549_v39  ;;  %v2519_v61 = vsel %vm748_vm12, %v4758_v55, 0 }
 0x396   :  { %v1568_v47 = vadd.f32 %v1567_v31, %v1566_v25  ;;  %1954 = vxpose.xlu0.b32.start.end [1/1] (short) (narrow) %v4939_v37, 8 }
 0x397   :  { %v4198_v52 = vpop.eup %4197  ;;  %4062 = vmatmul.msk.bf16.vlgmr.msra.gmra.mxu2 %vm422_vm11, %v1596_v57 }
 0x398   :  { %v1569_v33 = vrot.slane %v1568_v47, 1  ;;  %v1571_v19 = vsel %vm422_vm11, %v4198_v52, 0.0  ;;  %2161 = vmatpush.bf16.xpose.msra.mxu2 %v2152_v17 }
 0x399   :  { %v1572_v34 = vrot.slane %v1571_v19, 4 }
 0x39a   :  { %v1570_v32 = vadd.f32 %v1569_v33, %v1568_v47 }
 0x39b   :  { %v4200_v21 = vpop.eup %4199  ;;  %v1573_v30 = vadd.f32 %v1572_v34, %v1571_v19  ;;  %1826 = vxpose.xlu2.b32.start.end [1/1] (short) (narrow) %v4911_v14, 8 }
 0x39c   :  { %4201 = vrcp.f32 %v1570_v32  ;;  %v1589_v35 = vmul.f32 %v4200_v21, %v4192_v26  ;;  %v2244_v26 = vsel %vm422_vm11, %v4834_v20, 0  ;;  %v2498_v20 = vsel %vm748_vm12, %v4742_v41, 0 }
 0x39d   :  { %v1574_v28 = vrot.slane %v1573_v30, 2  ;;  %v2582_v41 = vsel %vm748_vm12, %v4864_v6, 0 }
 0x39e   :  { %1890 = vxpose.xlu0.b32.start.end [1/1] (short) (narrow) %v1549_v39, 8  ;;  %v1597_v37 = vpack.c.bf16 %v1589_v35, %v1589_v35 }
 0x39f   :  { %v1575_v22 = vadd.f32 %v1574_v28, %v1573_v30 }
 0x3a0   :  { %4063 = vmatmul.msk.bf16.vlgmr.msrb.gmra.mxu3 %vm422_vm11, %v1597_v37 }
 0x3a1   :  { %v1576_v16 = vrot.slane %v1575_v22, 1  ;;  %2184 = vmatpush.bf16.xpose.msrb.mxu3 %v2175_v62 }
 0x3a2   :  { %v4202_v2 = vpop.eup %4201 }
 0x3a3   :  { %v1592_v42 = vmul.f32 %v4202_v2, %v4194_v38  ;;  %v5000_v46 = vadd.f32 %v1576_v16, %v1575_v22  ;;  %1922 = vxpose.xlu2.b32.start.end [1/1] (short) (narrow) %v4925_v45, 8  ;;  %v2267_v38 = vsel %vm422_vm11, %v4896_v13, 0 }
 0x3a5   :  { %v1600_v14 = vpack.c.bf16 %v1592_v42, %v1592_v42  ;;  %4203 = vrcp.f32 %v5000_v46 }
 0x3a7   :  { %4066 = vmatmul.msk.bf16.vlgmr.msrb.gmra.mxu2 %vm422_vm11, %v1600_v14 }
 0x3a8   :  { %2253 = vmatpush.bf16.xpose.msrb.mxu2 %v2244_v26 }
 0x3ab   :  { %v4204_v11 = vpop.eup %4203  ;;  %1986 = vxpose.xlu2.b32.start.end [1/1] (short) (narrow) %v1570_v32, 8 }
 0x3ac   :  { %v1593_v40 = vmul.f32 %v4204_v11, %v4198_v52  ;;  %v5007_v29 = vpop.f32.mrf.mxu0 }
 0x3ae   :  { %v1601_v10 = vpack.c.bf16 %v1593_v40, %v1593_v40 }
 0x3b0   :  { %4067 = vmatmul.msk.bf16.vlgmr.msra.gmra.mxu3 %vm422_vm11, %v1601_v10 }
 0x3b1   :  { %2276 = vmatpush.bf16.xpose.msra.mxu3 %v2267_v38 }
 0x3b4   :  { %v1624_v45 = vpop.f32.mrf.mxu0 }
 0x3b5   :  { %v5012_v63 = vpop.f32.mrf.mxu1 }
 0x3b7   :  { %4070 = vmatmul.msk.bf16.vlgmr.msra.gmra.mxu2 %vm422_vm11, %v4636_v44 }
 0x3b8   :  { %2507 = vmatpush.bf16.msra.mxu2 %v2498_v20 }
 0x3bc   :  { %v5018_v15 = vpop.f32.mrf.mxu0 }
 0x3bd   :  { %v1648_v25 = vpop.f32.mrf.mxu1 }
 0x3c0   :  { %4071 = vmatmul.msk.bf16.vlgmr.msrb.gmra.mxu3 %vm422_vm11, %v4767_v3  ;;  %v2603_v3 = vsel %vm748_vm12, %v4919_v0, 0 }
 0x3c1   :  { %2528 = vmatpush.bf16.msrb.mxu3 %v2519_v61 }
 0x3c4   :  { %v1720_v13 = vpop.f32.mrf.mxu0 }
 0x3c5   :  { %v5024_v39 = vpop.f32.mrf.mxu1 }
 0x3c7   :  { %4074 = vmatmul.msk.bf16.vlgmr.msrb.gmra.mxu2 %vm422_vm11, %v4844_v49 }
 0x3c8   :  { %2591 = vmatpush.bf16.msrb.mxu2 %v2582_v41 }
 0x3cc   :  { %v2117_v44 = vpop.f32.mrf.mxu0 }
 0x3cd   :  { %v1744_v31 = vpop.f32.mrf.mxu1  ;;  %v2282_v57 = vsel %vm4640_vm13, %v2117_v44, -inf }
 0x3ce   :  { %v2290_v55 = vsel %vm422_vm11, %v2282_v57, -inf }
 0x3cf   :  { %v2291_v47 = vrot.slane %v2290_v55, 4 }
 0x3d0   :  { %4075 = vmatmul.msk.bf16.vlgmr.msra.gmra.mxu3 %vm422_vm11, %v4894_v4 }
 0x3d1   :  { %v2292_v52 = vmax.f32 %v2290_v55, %v2291_v47  ;;  %2612 = vmatpush.bf16.msra.mxu3 %v2603_v3 }
 0x3d3   :  { %v2293_v6 = vrot.slane %v2292_v52, 2 }
 0x3d4   :  { %v2119_v17 = vpop.f32.mrf.mxu0 }
 0x3d5   :  { %v2294_v49 = vmax.f32 %v2292_v52, %v2293_v6  ;;  %v2140_v33 = vpop.f32.mrf.mxu1 }
 0x3d6   :  { %v2283_v19 = vsel %vm4640_vm13, %v2140_v33, -inf }
 0x3d7   :  { %v2295_v34 = vrot.slane %v2294_v49, 1  ;;  %v2297_v32 = vsel %vm422_vm11, %v2283_v19, -inf }
 0x3d8   :  { %v2298_v21 = vrot.slane %v2297_v32, 4 }
 0x3d9   :  { %v2296_v30 = vmax.f32 %v2294_v49, %v2295_v34 }
 0x3da   :  { %v2299_v35 = vmax.f32 %v2297_v32, %v2298_v21 }
 0x3db   :  { %v2346_v28 = vsub.f32 %v2282_v57, %v2296_v30 }
 0x3dc   :  { %v2300_v0 = vrot.slane %v2299_v35, 2  ;;  %v2209_v37 = vpop.f32.mrf.mxu0 }
 0x3dd   :  { %v2354_v22 = vmul.f32 1.442695, %v2346_v28  ;;  %v2142_v4 = vpop.f32.mrf.mxu1  ;;  %v2286_v62 = vsel %vm4640_vm13, %v2209_v37, -inf }
 0x3de   :  { %v2301_v16 = vmax.f32 %v2299_v35, %v2300_v0  ;;  %v2318_v2 = vsel %vm422_vm11, %v2286_v62, -inf }
 0x3df   :  { %4205 = vpow2.f32 %v2354_v22  ;;  %v2319_v42 = vrot.slane %v2318_v2, 4 }
 0x3e0   :  { %v2302_v14 = vrot.slane %v2301_v16, 1 }
 0x3e1   :  { %v2320_v26 = vmax.f32 %v2318_v2, %v2319_v42 }
 0x3e2   :  { %v2303_v11 = vmax.f32 %v2301_v16, %v2302_v14 }
 0x3e3   :  { %v2321_v40 = vrot.slane %v2320_v26, 2 }
 0x3e4   :  { %v2347_v10 = vsub.f32 %v2283_v19, %v2303_v11  ;;  %v2211_v38 = vpop.f32.mrf.mxu0 }
 0x3e5   :  { %v4206_v45 = vpop.eup %4205  ;;  %v2322_v20 = vmax.f32 %v2320_v26, %v2321_v40  ;;  %v2232_v25 = vpop.f32.mrf.mxu1 }
 0x3e6   :  { %v2370_v61 = vsel %vm422_vm11, %v4206_v45, 0.0  ;;  %v2356_v13 = vmul.f32 1.442695, %v2347_v10  ;;  %v2287_v41 = vsel %vm4640_vm13, %v2232_v25, -inf }
 0x3e7   :  { %v2371_v44 = vrot.slane %v2370_v61, 4  ;;  %v2323_v31 = vrot.slane %v2322_v20, 1  ;;  %v2325_v57 = vsel %vm422_vm11, %v2287_v41, -inf }
 0x3e8   :  { %4207 = vpow2.f32 %v2356_v13  ;;  %v2326_v55 = vrot.slane %v2325_v57, 4 }
 0x3e9   :  { %v2372_v47 = vadd.f32 %v2371_v44, %v2370_v61  ;;  %v2324_v3 = vmax.f32 %v2322_v20, %v2323_v31 }
 0x3ea   :  { %v2327_v52 = vmax.f32 %v2325_v57, %v2326_v55 }
 0x3eb   :  { %v2373_v6 = vrot.slane %v2372_v47, 2  ;;  %v2350_v17 = vsub.f32 %v2286_v62, %v2324_v3 }
 0x3ec   :  { %v2328_v49 = vrot.slane %v2327_v52, 2 }
 0x3ed   :  { %v2374_v33 = vadd.f32 %v2373_v6, %v2372_v47  ;;  %v2362_v19 = vmul.f32 1.442695, %v2350_v17  ;;  %v2234_v34 = vpop.f32.mrf.mxu1 }
 0x3ee   :  { %v4208_v32 = vpop.eup %4207  ;;  %v2329_v21 = vmax.f32 %v2327_v52, %v2328_v49 }
 0x3ef   :  { %v2375_v30 = vrot.slane %v2374_v33, 1  ;;  %v2377_v35 = vsel %vm422_vm11, %v4208_v32, 0.0  ;;  %4209 = vpow2.f32 %v2362_v19 }
 0x3f0   :  { %v2378_v28 = vrot.slane %v2377_v35, 4  ;;  %v2330_v0 = vrot.slane %v2329_v21, 1 }
 0x3f1   :  { %v5048_v37 = vadd.f32 %v2375_v30, %v2374_v33 }
 0x3f2   :  { %v2379_v22 = vadd.f32 %v2378_v28, %v2377_v35  ;;  %v2331_v4 = vmax.f32 %v2329_v21, %v2330_v0 }
 0x3f3   :  { %4211 = vrcp.f32 %v5048_v37 }
 0x3f4   :  { %v2380_v16 = vrot.slane %v2379_v22, 2  ;;  %v2351_v62 = vsub.f32 %v2287_v41, %v2331_v4  ;;  %v2930_v41 = vsel %vm422_vm11, %v4634_v43, 0  ;;  %v2953_v43 = vsel %vm422_vm11, %v4673_v5, 0  ;;  %v5074_v4 = vpop.permute.xlu2 %1156 }
 0x3f5   :  { %v4210_v2 = vpop.eup %4209 }
 0x3f6   :  { %v2381_v42 = vadd.f32 %v2380_v16, %v2379_v22  ;;  %v2398_v14 = vsel %vm422_vm11, %v4210_v2, 0.0  ;;  %v2364_v26 = vmul.f32 1.442695, %v2351_v62  ;;  %v3045_v22 = vsel %vm422_vm11, %v4830_v18, 0 }
 0x3f7   :  { %v2399_v11 = vrot.slane %v2398_v14, 4  ;;  %v3280_v62 = vsel %vm748_vm12, %v4656_v59, 0 }
 0x3f8   :  { %v2382_v40 = vrot.slane %v2381_v42, 1  ;;  %4213 = vpow2.f32 %v2364_v26 }
 0x3f9   :  { %v4212_v10 = vpop.eup %4211  ;;  %v2400_v38 = vadd.f32 %v2399_v11, %v2398_v14  ;;  %v3301_v14 = vsel %vm748_vm12, %v4721_v9, 0 }
 0x3fa   :  { %v2434_v20 = vmul.f32 %v4212_v10, %v4206_v45  ;;  %v5052_v25 = vadd.f32 %v2382_v40, %v2381_v42  ;;  %v3364_v40 = vsel %vm748_vm12, %v4797_v12, 0  ;;  %v5100_v10 = vpop.permute.xlu1 %1166  ;;  %v3385_v12 = vsel %vm748_vm12, %v4836_v7, 0 }
 0x3fb   :  { %v2401_v61 = vrot.slane %v2400_v38, 2 }
 0x3fc   :  { %v2442_v13 = vpack.c.bf16 %v2434_v20, %v2434_v20  ;;  %4215 = vrcp.f32 %v5052_v25  ;;  %v5086_v18 = vpop.permute.xlu2 %1176 }
 0x3fd   :  { %v2402_v44 = vadd.f32 %v2401_v61, %v2400_v38 }
 0x3fe   :  { %v4214_v31 = vpop.eup %4213  ;;  %4076 = vmatmul.msk.bf16.vlgmr.msra.gmra.mxu0 %vm422_vm11, %v2442_v13 }
 0x3ff   :  { %v2403_v57 = vrot.slane %v2402_v44, 1  ;;  %v2405_v55 = vsel %vm422_vm11, %v4214_v31, 0.0  ;;  %2939 = vmatpush.bf16.xpose.msra.mxu0 %v2930_v41 }
 0x400   :  { %v2406_v47 = vrot.slane %v2405_v55, 4 }
 0x401   :  { %v5059_v3 = vadd.f32 %v2403_v57, %v2402_v44 }
 0x402   :  { %v4216_v45 = vpop.eup %4215  ;;  %v2407_v52 = vadd.f32 %v2406_v47, %v2405_v55  ;;  %v5112_v61 = vpop.permute.xlu1 %1181 }
 0x403   :  { %v2435_v6 = vmul.f32 %v4216_v45, %v4208_v32  ;;  %4217 = vrcp.f32 %v5059_v3  ;;  %v3022_v32 = vsel %vm422_vm11, %v4811_v8, 0  ;;  %v5082_v8 = vpop.permute.xlu0 %1161 }
 0x404   :  { %v2408_v17 = vrot.slane %v2407_v52, 2  ;;  %v5096_v11 = vpop.permute.xlu2 %1191 }
 0x405   :  { %v2443_v49 = vpack.c.bf16 %v2435_v6, %v2435_v6 }
 0x406   :  { %v2409_v33 = vadd.f32 %v2408_v17, %v2407_v52 }
 0x407   :  { %4077 = vmatmul.msk.bf16.vlgmr.msra.gmra.mxu1 %vm422_vm11, %v2443_v49 }
 0x408   :  { %v2410_v19 = vrot.slane %v2409_v33, 1  ;;  %2962 = vmatpush.bf16.xpose.msra.mxu1 %v2953_v43 }
 0x409   :  { %v4218_v34 = vpop.eup %4217 }
 0x40a   :  { %v2438_v21 = vmul.f32 %v4218_v34, %v4210_v2  ;;  %v5065_v30 = vadd.f32 %v2410_v19, %v2409_v33 }
 0x40b   :  { %v5092_v26 = vpop.permute.xlu0 %1186 }
 0x40c   :  { %v2446_v35 = vpack.c.bf16 %v2438_v21, %v2438_v21  ;;  %4219 = vrcp.f32 %v5065_v30 }
 0x40e   :  { %4080 = vmatmul.msk.bf16.vlgmr.msrb.gmra.mxu0 %vm422_vm11, %v2446_v35 }
 0x40f   :  { %3031 = vmatpush.bf16.xpose.msrb.mxu0 %v3022_v32 }
 0x412   :  { %v4220_v28 = vpop.eup %4219 }
 0x413   :  { %v2439_v0 = vmul.f32 %v4220_v28, %v4214_v31 }
 0x415   :  { %v2447_v5 = vpack.c.bf16 %v2439_v0, %v2439_v0 }
 0x417   :  { %4081 = vmatmul.msk.bf16.vlgmr.msrb.gmra.mxu1 %vm422_vm11, %v2447_v5 }
 0x418   :  { %3054 = vmatpush.bf16.xpose.msrb.mxu1 %v3045_v22 }
 0x41a   :  { %v5076_v16 = vpop.f32.mrf.mxu2 }
 0x41e   :  { %4084 = vmatmul.msk.bf16.vlgmr.msra.gmra.mxu0 %vm422_vm11, %v4618_v27 }
 0x41f   :  { %3289 = vmatpush.bf16.msra.mxu0 %v3280_v62 }
 0x422   :  { %v1672_v2 = vpop.f32.mrf.mxu2 }
 0x423   :  { %v5084_v42 = vpop.f32.mrf.mxu3 }
 0x427   :  { %4085 = vmatmul.msk.bf16.vlgmr.msra.gmra.mxu1 %vm422_vm11, %v4615_v23 }
 0x428   :  { %3310 = vmatpush.bf16.msra.mxu1 %v3301_v14 }
 0x42a   :  { %v5094_v59 = vpop.f32.mrf.mxu2 }
 0x42b   :  { %v1696_v27 = vpop.f32.mrf.mxu3 }
 0x42e   :  { %4088 = vmatmul.msk.bf16.vlgmr.msrb.gmra.mxu0 %vm422_vm11, %v4788_v50 }
 0x42f   :  { %3373 = vmatpush.bf16.msrb.mxu0 %v3364_v40 }
 0x432   :  { %v1768_v9 = vpop.f32.mrf.mxu2  ;;  %v1810_v38 = vpop.trf.xlu0 }
 0x433   :  { %v5104_v23 = vpop.f32.mrf.mxu3  ;;  %3876 = vrot.lane.b32.xlu2 %v1810_v38, %s4274_s30  ;;  %2052 = vperm.xlu1 %4120, %v1810_v38  }
 0x434   :  { %v1842_v20 = vpop.trf.xlu2 }
 0x435   :  { %3878 = vrot.lane.b32.xlu0 %v1842_v20, %s4274_s30 }
 0x437   :  { %4089 = vmatmul.msk.bf16.vlgmr.msrb.gmra.mxu1 %vm422_vm11, %v4832_v56  ;;  %v5120_v56 = vpop.permute.xlu1 %1171 }
 0x438   :  { %3394 = vmatpush.bf16.msrb.mxu1 %v3385_v12 }
 0x43a   :  { %v2163_v50 = vpop.f32.mrf.mxu2  ;;  %v1970_v7 = vpop.trf.xlu0 }
 0x43b   :  { %v1792_v13 = vpop.f32.mrf.mxu3  ;;  %v2284_v44 = vsel %vm4640_vm13, %v2163_v50, -inf  ;;  %2057 = vperm.xlu2 %4118, %v1842_v20  }
 0x43c   :  { %v2304_v31 = vsel %vm422_vm11, %v2284_v44, -inf  ;;  %v5117_v41 = vpop.trf.xlu2 }
 0x43d   :  { %v2305_v57 = vrot.slane %v2304_v31, 4  ;;  %2072 = vperm.xlu1 %4120, %v5117_v41  }
 0x43f   :  { %v2306_v55 = vmax.f32 %v2304_v31, %v2305_v57  ;;  %v5126_v0 = vpop.trf.xlu1 }
 0x441   :  { %v2307_v47 = vrot.slane %v2306_v55, 2 }
 0x442   :  { %v2165_v45 = vpop.f32.mrf.mxu2  ;;  %v1906_v21 = vpop.trf.xlu0 }
 0x443   :  { %v2308_v52 = vmax.f32 %v2306_v55, %v2307_v47  ;;  %v2186_v6 = vpop.f32.mrf.mxu3  ;;  %2077 = vperm.xlu2 %4118, %v1970_v7  }
 0x444   :  { %v2285_v17 = vsel %vm4640_vm13, %v2186_v6, -inf  ;;  %v2002_v20 = vpop.trf.xlu2 }
 0x445   :  { %v2309_v49 = vrot.slane %v2308_v52, 1  ;;  %v2311_v33 = vsel %vm422_vm11, %v2285_v17, -inf  ;;  %3886 = vrot.lane.b32.xlu1 %v1970_v7, %s4274_s30 }
 0x446   :  { %v2312_v43 = vrot.slane %v2311_v33, 4 }
 0x447   :  { %v2310_v19 = vmax.f32 %v2308_v52, %v2309_v49 }
 0x448   :  { %v2313_v34 = vmax.f32 %v2311_v33, %v2312_v43 }
 0x449   :  { %v2348_v35 = vsub.f32 %v2284_v44, %v2310_v19 }
 0x44a   :  { %v2314_v32 = vrot.slane %v2313_v34, 2  ;;  %v2255_v28 = vpop.f32.mrf.mxu2 }
 0x44b   :  { %v2358_v5 = vmul.f32 1.442695, %v2348_v35  ;;  %v2188_v22 = vpop.f32.mrf.mxu3  ;;  %v2288_v62 = vsel %vm4640_vm13, %v2255_v28, -inf  ;;  %3882 = vrot.lane.b32.xlu2 %v1906_v21, %s4274_s30 }
 0x44c   :  { %v2315_v2 = vmax.f32 %v2313_v34, %v2314_v32  ;;  %v2332_v14 = vsel %vm422_vm11, %v2288_v62, -inf }
 0x44d   :  { %4221 = vpow2.f32 %v2358_v5  ;;  %v2333_v27 = vrot.slane %v2332_v14, 4  ;;  %3880 = vrot.lane.b32.xlu1 %v5126_v0, %s4274_s30 }
 0x44e   :  { %v2316_v40 = vrot.slane %v2315_v2, 1 }
 0x44f   :  { %v2334_v9 = vmax.f32 %v2332_v14, %v2333_v27 }
 0x450   :  { %v2317_v38 = vmax.f32 %v2315_v2, %v2316_v40 }
 0x451   :  { %v2335_v12 = vrot.slane %v2334_v9, 2 }
 0x452   :  { %v2349_v50 = vsub.f32 %v2285_v17, %v2317_v38  ;;  %v2257_v13 = vpop.f32.mrf.mxu2 }
 0x453   :  { %v4222_v44 = vpop.eup %4221  ;;  %v2336_v31 = vmax.f32 %v2334_v9, %v2335_v12  ;;  %v2278_v57 = vpop.f32.mrf.mxu3  ;;  %3888 = vrot.lane.b32.xlu2 %v2002_v20, %s4274_s30 }
 0x454   :  { %v2384_v7 = vsel %vm422_vm11, %v4222_v44, 0.0  ;;  %v2360_v55 = vmul.f32 1.442695, %v2349_v50  ;;  %v2289_v47 = vsel %vm4640_vm13, %v2278_v57, -inf }
 0x455   :  { %v2385_v45 = vrot.slane %v2384_v7, 4  ;;  %v2337_v52 = vrot.slane %v2336_v31, 1  ;;  %v2339_v6 = vsel %vm422_vm11, %v2289_v47, -inf  ;;  %2067 = vperm.xlu1 %4120, %v1906_v21  }
 0x456   :  { %4223 = vpow2.f32 %v2360_v55  ;;  %v2340_v49 = vrot.slane %v2339_v6, 4 }
 0x457   :  { %v2386_v17 = vadd.f32 %v2385_v45, %v2384_v7  ;;  %v2338_v33 = vmax.f32 %v2336_v31, %v2337_v52  ;;  %2018 = vxpose.xlu0.b32.start.end [1/1] (short) (narrow) %v5000_v46, 8 }
 0x458   :  { %v2341_v43 = vmax.f32 %v2339_v6, %v2340_v49 }
 0x459   :  { %v2387_v19 = vrot.slane %v2386_v17, 2  ;;  %v2352_v34 = vsub.f32 %v2288_v62, %v2338_v33 }
 0x45a   :  { %v2342_v35 = vrot.slane %v2341_v43, 2 }
 0x45b   :  { %v2388_v32 = vadd.f32 %v2387_v19, %v2386_v17  ;;  %v2366_v28 = vmul.f32 1.442695, %v2352_v34  ;;  %v2280_v5 = vpop.f32.mrf.mxu3 }
 0x45c   :  { %v4224_v22 = vpop.eup %4223  ;;  %v2343_v2 = vmax.f32 %v2341_v43, %v2342_v35 }
 0x45d   :  { %v2389_v14 = vrot.slane %v2388_v32, 1  ;;  %v2391_v27 = vsel %vm422_vm11, %v4224_v22, 0.0  ;;  %4225 = vpow2.f32 %v2366_v28  ;;  %2082 = vperm.xlu1 %4120, %v2002_v20  }
 0x45e   :  { %v2392_v21 = vrot.slane %v2391_v27, 4  ;;  %v2344_v40 = vrot.slane %v2343_v2, 1 }
 0x45f   :  { %v5141_v9 = vadd.f32 %v2389_v14, %v2388_v32 }
 0x460   :  { %v2393_v38 = vadd.f32 %v2392_v21, %v2391_v27  ;;  %v2345_v46 = vmax.f32 %v2343_v2, %v2344_v40 }
 0x461   :  { %4227 = vrcp.f32 %v5141_v9 }
 0x462   :  { %v2394_v62 = vrot.slane %v2393_v38, 2  ;;  %v2353_v12 = vsub.f32 %v2289_v47, %v2345_v46  ;;  %v2976_v47 = vsel %vm422_vm11, %v4658_v60, 0  ;;  %v2999_v60 = vsel %vm422_vm11, %v4773_v58, 0 }
 0x463   :  { %v4226_v50 = vpop.eup %4225 }
 0x464   :  { %v2395_v13 = vadd.f32 %v2394_v62, %v2393_v38  ;;  %v2412_v31 = vsel %vm422_vm11, %v4226_v50, 0.0  ;;  %v2368_v57 = vmul.f32 1.442695, %v2353_v12  ;;  %v3068_v12 = vsel %vm422_vm11, %v4854_v54, 0 }
 0x465   :  { %v2413_v7 = vrot.slane %v2412_v31, 4  ;;  %v3322_v54 = vsel %vm748_vm12, %v4760_v48, 0 }
 0x466   :  { %v2396_v55 = vrot.slane %v2395_v13, 1  ;;  %4229 = vpow2.f32 %v2368_v57 }
 0x467   :  { %v4228_v45 = vpop.eup %4227  ;;  %v2414_v20 = vadd.f32 %v2413_v7, %v2412_v31 }
 0x468   :  { %v2436_v52 = vmul.f32 %v4228_v45, %v4222_v44  ;;  %v5145_v6 = vadd.f32 %v2396_v55, %v2395_v13 }
 0x469   :  { %v2415_v49 = vrot.slane %v2414_v20, 2 }
 0x46a   :  { %v2444_v17 = vpack.c.bf16 %v2436_v52, %v2436_v52  ;;  %4231 = vrcp.f32 %v5145_v6 }
 0x46b   :  { %v2416_v33 = vadd.f32 %v2415_v49, %v2414_v20  ;;  %v5625_v20 = vld [vmem:[#allocation3_spill] sm:$0xff] }
 0x46c   :  { %v4230_v43 = vpop.eup %4229  ;;  %4078 = vmatmul.msk.bf16.vlgmr.msra.gmra.mxu2 %vm422_vm11, %v2444_v17 }
 0x46d   :  { %v2417_v19 = vrot.slane %v2416_v33, 1  ;;  %v2419_v34 = vsel %vm422_vm11, %v4230_v43, 0.0  ;;  %2985 = vmatpush.bf16.xpose.msra.mxu2 %v2976_v47 }
 0x46e   :  { %v2420_v35 = vrot.slane %v2419_v34, 4 }
 0x46f   :  { %v5152_v32 = vadd.f32 %v2417_v19, %v2416_v33  ;;  %v5626_v33 = vld [vmem:[#allocation4_spill] sm:$0xff] }
 0x470   :  { %v4232_v44 = vpop.eup %4231  ;;  %v2421_v28 = vadd.f32 %v2420_v35, %v2419_v34  ;;  %v5628_v34 = vld [vmem:[#allocation13_spill] sm:$0xff] }
 0x471   :  { %v2437_v5 = vmul.f32 %v4232_v44, %v4224_v22  ;;  %4233 = vrcp.f32 %v5152_v32  ;;  %v3406_v35 = vsel %vm748_vm12, %v5628_v34, 0 }
 0x472   :  { %v2422_v2 = vrot.slane %v2421_v28, 2 }
 0x473   :  { %v2445_v14 = vpack.c.bf16 %v2437_v5, %v2437_v5  ;;  %v5629_v5 = vld [vmem:[#allocation7_spill] sm:$0xff] }
 0x474   :  { %v2423_v27 = vadd.f32 %v2422_v2, %v2421_v28 }
 0x475   :  { %4079 = vmatmul.msk.bf16.vlgmr.msrb.gmra.mxu3 %vm422_vm11, %v2445_v14 }
 0x476   :  { %v2424_v21 = vrot.slane %v2423_v27, 1  ;;  %3008 = vmatpush.bf16.xpose.msrb.mxu3 %v2999_v60 }
 0x477   :  { %v4234_v40 = vpop.eup %4233 }
 0x478   :  { %v2440_v38 = vmul.f32 %v4234_v40, %v4226_v50  ;;  %v5158_v46 = vadd.f32 %v2424_v21, %v2423_v27  ;;  %v3091_v50 = vsel %vm422_vm11, %v4905_v24, 0  ;;  %v3343_v24 = vsel %vm748_vm12, %v5626_v33, 0 }
 0x47a   :  { %v2448_v62 = vpack.c.bf16 %v2440_v38, %v2440_v38  ;;  %4235 = vrcp.f32 %v5158_v46  ;;  %v5630_v38 = vld [vmem:[#allocation14_spill] sm:$0xff] }
 0x47b   :  { %v5161_v22 = vpop.f32.mrf.mxu0 }
 0x47c   :  { %4082 = vmatmul.msk.bf16.vlgmr.msrb.gmra.mxu2 %vm422_vm11, %v2448_v62  ;;  %v3427_v62 = vsel %vm748_vm12, %v5630_v38, 0 }
 0x47d   :  { %3077 = vmatpush.bf16.xpose.msrb.mxu2 %v3068_v12 }
 0x480   :  { %v4236_v58 = vpop.eup %4235 }
 0x481   :  { %v2441_v13 = vmul.f32 %v4236_v58, %v4230_v43  ;;  %v5627_v43 = vld [vmem:[#allocation2_spill] sm:$0xff]  ;;  %v5631_v58 = vld [vmem:[#allocation9_spill] sm:$0xff] }
 0x483   :  { %v2449_v31 = vpack.c.bf16 %v2441_v13, %v2441_v13  ;;  %v2469_v57 = vpop.f32.mrf.mxu0 }
 0x484   :  { %v5166_v7 = vpop.f32.mrf.mxu1 }
 0x485   :  { %4083 = vmatmul.msk.bf16.vlgmr.msra.gmra.mxu3 %vm422_vm11, %v2449_v31 }
 0x486   :  { %3100 = vmatpush.bf16.xpose.msra.mxu3 %v3091_v50 }
 0x48b   :  { %v5171_v55 = vpop.f32.mrf.mxu0 }
 0x48c   :  { %v2490_v45 = vpop.f32.mrf.mxu1  ;;  %4086 = vmatmul.msk.bf16.vlgmr.msra.gmra.mxu2 %vm422_vm11, %v5625_v20 }
 0x48d   :  { %3331 = vmatpush.bf16.msra.mxu2 %v3322_v54  ;;  %v5177_v52 = vpop.permute.xlu2 %3876 }
 0x493   :  { %v2553_v49 = vpop.f32.mrf.mxu0 }
 0x494   :  { %v5179_v17 = vpop.f32.mrf.mxu1 }
 0x495   :  { %4087 = vmatmul.msk.bf16.vlgmr.msrb.gmra.mxu3 %vm422_vm11, %v5627_v43  ;;  %v2058_v47 = vpop.permute.xlu2 %2057 }
 0x496   :  { %3352 = vmatpush.bf16.msrb.mxu3 %v3343_v24  ;;  %v2091_v48 = vmul.f32 %v2058_v47, %v5012_v63 }
 0x498   :  { %3756 = vrot.lane.b32.xlu2 %v2091_v48, %s4275_s8 }
 0x49b   :  { %v2941_v19 = vpop.f32.mrf.mxu0 }
 0x49c   :  { %v2574_v44 = vpop.f32.mrf.mxu1  ;;  %v3106_v28 = vsel %vm4640_vm13, %v2941_v19, -inf  ;;  %4090 = vmatmul.msk.bf16.vlgmr.msrb.gmra.mxu2 %vm422_vm11, %v5629_v5 }
 0x49d   :  { %v3114_v2 = vsel %vm422_vm11, %v3106_v28, -inf  ;;  %3415 = vmatpush.bf16.msrb.mxu2 %v3406_v35 }
 0x49e   :  { %v3115_v14 = vrot.slane %v3114_v2, 4 }
 0x4a0   :  { %v3116_v27 = vmax.f32 %v3114_v2, %v3115_v14 }
 0x4a2   :  { %v3117_v63 = vrot.slane %v3116_v27, 2 }
 0x4a3   :  { %v2943_v60 = vpop.f32.mrf.mxu0 }
 0x4a4   :  { %v3118_v21 = vmax.f32 %v3116_v27, %v3117_v63  ;;  %v2964_v40 = vpop.f32.mrf.mxu1 }
 0x4a5   :  { %v3107_v12 = vsel %vm4640_vm13, %v2964_v40, -inf  ;;  %4091 = vmatmul.msk.bf16.vlgmr.msra.gmra.mxu3 %vm422_vm11, %v5631_v58  ;;  %v2053_v13 = vpop.permute.xlu1 %2052 }
 0x4a6   :  { %v3119_v31 = vrot.slane %v3118_v21, 1  ;;  %v3121_v57 = vsel %vm422_vm11, %v3107_v12, -inf  ;;  %3436 = vmatpush.bf16.msra.mxu3 %v3427_v62  ;;  %v2090_v50 = vmul.f32 %v2053_v13, %v5007_v29 }
 0x4a7   :  { %v3122_v54 = vrot.slane %v3121_v57, 4 }
 0x4a8   :  { %v3120_v45 = vmax.f32 %v3118_v21, %v3119_v31  ;;  %3754 = vrot.lane.b32.xlu1 %v2090_v50, %s4275_s8 }
 0x4a9   :  { %v3123_v20 = vmax.f32 %v3121_v57, %v3122_v54 }
 0x4aa   :  { %v3170_v49 = vsub.f32 %v3106_v28, %v3120_v45 }
 0x4ab   :  { %v3124_v33 = vrot.slane %v3123_v20, 2  ;;  %v3033_v24 = vpop.f32.mrf.mxu0 }
 0x4ac   :  { %v3178_v43 = vmul.f32 1.442695, %v3170_v49  ;;  %v2966_v47 = vpop.f32.mrf.mxu1  ;;  %v3110_v48 = vsel %vm4640_vm13, %v3033_v24, -inf }
 0x4ad   :  { %v3125_v19 = vmax.f32 %v3123_v20, %v3124_v33  ;;  %v3142_v34 = vsel %vm422_vm11, %v3110_v48, -inf }
 0x4ae   :  { %4237 = vpow2.f32 %v3178_v43  ;;  %v3143_v35 = vrot.slane %v3142_v34, 4 }
 0x4af   :  { %v3126_v44 = vrot.slane %v3125_v19, 1  ;;  %v2073_v29 = vpop.permute.xlu1 %2072 }
 0x4b0   :  { %v3144_v5 = vmax.f32 %v3142_v34, %v3143_v35  ;;  %v2094_v2 = vmul.f32 %v2073_v29, %v5018_v15 }
 0x4b1   :  { %v3127_v14 = vmax.f32 %v3125_v19, %v3126_v44 }
 0x4b2   :  { %v3145_v27 = vrot.slane %v3144_v5, 2  ;;  %3762 = vrot.lane.b32.xlu2 %v2094_v2, %s4275_s8 }
 0x4b3   :  { %v3171_v28 = vsub.f32 %v3107_v12, %v3127_v14  ;;  %v3035_v63 = vpop.f32.mrf.mxu0 }
 0x4b4   :  { %v4238_v60 = vpop.eup %4237  ;;  %v3146_v21 = vmax.f32 %v3144_v5, %v3145_v27  ;;  %v3056_v40 = vpop.f32.mrf.mxu1 }
 0x4b5   :  { %v3194_v38 = vsel %vm422_vm11, %v4238_v60, 0.0  ;;  %v3180_v62 = vmul.f32 1.442695, %v3171_v28  ;;  %v3111_v58 = vsel %vm4640_vm13, %v3056_v40, -inf }
 0x4b6   :  { %v3195_v13 = vrot.slane %v3194_v38, 4  ;;  %v3147_v31 = vrot.slane %v3146_v21, 1  ;;  %v3149_v57 = vsel %vm422_vm11, %v3111_v58, -inf }
 0x4b7   :  { %4239 = vpow2.f32 %v3180_v62  ;;  %v3150_v15 = vrot.slane %v3149_v57, 4  ;;  %v5212_v50 = vpop.permute.xlu1 %3886 }
 0x4b8   :  { %v3196_v54 = vadd.f32 %v3195_v13, %v3194_v38  ;;  %v3148_v12 = vmax.f32 %v3146_v21, %v3147_v31 }
 0x4b9   :  { %v3151_v45 = vmax.f32 %v3149_v57, %v3150_v15 }
 0x4ba   :  { %v3197_v20 = vrot.slane %v3196_v54, 2  ;;  %v3174_v49 = vsub.f32 %v3110_v48, %v3148_v12 }
 0x4bb   :  { %v3152_v33 = vrot.slane %v3151_v45, 2 }
 0x4bc   :  { %v3198_v24 = vadd.f32 %v3197_v20, %v3196_v54  ;;  %v3186_v43 = vmul.f32 1.442695, %v3174_v49  ;;  %v3058_v47 = vpop.f32.mrf.mxu1 }
 0x4bd   :  { %v4240_v19 = vpop.eup %4239  ;;  %v3153_v34 = vmax.f32 %v3151_v45, %v3152_v33 }
 0x4be   :  { %v3199_v35 = vrot.slane %v3198_v24, 1  ;;  %v3201_v44 = vsel %vm422_vm11, %v4240_v19, 0.0  ;;  %4241 = vpow2.f32 %v3186_v43 }
 0x4bf   :  { %v3202_v29 = vrot.slane %v3201_v44, 4  ;;  %v3154_v5 = vrot.slane %v3153_v34, 1  ;;  %v5215_v2 = vpop.permute.xlu1 %3880 }
 0x4c0   :  { %v5217_v14 = vadd.f32 %v3199_v35, %v3198_v24 }
 0x4c1   :  { %v3203_v27 = vadd.f32 %v3202_v29, %v3201_v44  ;;  %v3155_v28 = vmax.f32 %v3153_v34, %v3154_v5 }
 0x4c2   :  { %4243 = vrcp.f32 %v5217_v14 }
 0x4c3   :  { %v3204_v48 = vrot.slane %v3203_v27, 2  ;;  %v3175_v63 = vsub.f32 %v3111_v58, %v3155_v28  ;;  %v2078_v28 = vpop.permute.xlu2 %2077 }
 0x4c4   :  { %v4242_v21 = vpop.eup %4241 }
 0x4c5   :  { %v3205_v40 = vadd.f32 %v3204_v48, %v3203_v27  ;;  %v3222_v38 = vsel %vm422_vm11, %v4242_v21, 0.0  ;;  %v3188_v62 = vmul.f32 1.442695, %v3175_v63  ;;  %3884 = vrot.lane.b32.xlu0 %v5117_v41, %s4274_s30 }
 0x4c6   :  { %v3223_v13 = vrot.slane %v3222_v38, 4 }
 0x4c7   :  { %v3206_v31 = vrot.slane %v3205_v40, 1  ;;  %4245 = vpow2.f32 %v3188_v62  ;;  %v2068_v57 = vpop.permute.xlu1 %2067 }
 0x4c8   :  { %v4244_v15 = vpop.eup %4243  ;;  %v3224_v54 = vadd.f32 %v3223_v13, %v3222_v38  ;;  %v2093_v12 = vmul.f32 %v2068_v57, %v5084_v42 }
 0x4c9   :  { %v3258_v45 = vmul.f32 %v4244_v15, %v4238_v60  ;;  %v5224_v20 = vadd.f32 %v3206_v31, %v3205_v40 }
 0x4ca   :  { %v3225_v58 = vrot.slane %v3224_v54, 2  ;;  %3760 = vrot.lane.b32.xlu1 %v2093_v12, %s4275_s8  ;;  %v5251_v12 = vpop.permute.xlu0 %3878 }
 0x4cb   :  { %v3266_v49 = vpack.c.bf16 %v3258_v45, %v3258_v45  ;;  %4247 = vrcp.f32 %v5224_v20 }
 0x4cc   :  { %v3226_v33 = vadd.f32 %v3225_v58, %v3224_v54 }
 0x4cd   :  { %v4246_v24 = vpop.eup %4245  ;;  %2062 = vperm.xlu0 %4119, %v5126_v0   ;;  %4092 = vmatmul.msk.bf16.vlgmr.msra.gmra.mxu0 %vm422_vm11, %v3266_v49 }
 0x4ce   :  { %v3227_v41 = vrot.slane %v3226_v33, 1  ;;  %v3229_v43 = vsel %vm422_vm11, %v4246_v24, 0.0 }
 0x4cf   :  { %v3230_v47 = vrot.slane %v3229_v43, 4  ;;  %v2083_v42 = vpop.permute.xlu1 %2082 }
 0x4d0   :  { %v5231_v60 = vadd.f32 %v3227_v41, %v3226_v33  ;;  %v2096_v34 = vmul.f32 %v2083_v42, %v5094_v59 }
 0x4d1   :  { %v4248_v35 = vpop.eup %4247  ;;  %v3231_v44 = vadd.f32 %v3230_v47, %v3229_v43  ;;  %v2095_v47 = vmul.f32 %v2078_v28, %v5024_v39 }
 0x4d2   :  { %v3259_v29 = vmul.f32 %v4248_v35, %v4240_v19  ;;  %4249 = vrcp.f32 %v5231_v60  ;;  %3766 = vrot.lane.b32.xlu1 %v2096_v34, %s4275_s8  ;;  %v5242_v19 = vpop.permute.xlu2 %3882 }
 0x4d3   :  { %v3232_v5 = vrot.slane %v3231_v44, 2 }
 0x4d4   :  { %v3267_v0 = vpack.c.bf16 %v3259_v29, %v3259_v29 }
 0x4d5   :  { %v3233_v27 = vadd.f32 %v3232_v5, %v3231_v44 }
 0x4d6   :  { %4093 = vmatmul.msk.bf16.vlgmr.msra.gmra.mxu1 %vm422_vm11, %v3267_v0 }
 0x4d7   :  { %v3234_v48 = vrot.slane %v3233_v27, 1 }
 0x4d8   :  { %v4250_v63 = vpop.eup %4249  ;;  %2650 = vxpose.xlu2.b32.start.end [1/1] (short) (narrow) %v5052_v25, 8  ;;  %v5632_v25 = vld [vmem:[#allocation6_spill] sm:$0xff] }
 0x4d9   :  { %v3262_v40 = vmul.f32 %v4250_v63, %v4242_v21  ;;  %v5238_v38 = vadd.f32 %v3234_v48, %v3233_v27  ;;  %v1195_v21 = vmul.f32 %v5082_v8, %v5632_v25  ;;  %v5633_v63 = vld [vmem:[#allocation5_spill] sm:$0xff] }
 0x4da   :  { %v5245_v57 = vpop.permute.xlu2 %3888  ;;  %v1194_v39 = vmul.f32 %v5074_v4, %v5633_v63 }
 0x4db   :  { %v3270_v59 = vpack.c.bf16 %v3262_v40, %v3262_v40  ;;  %4251 = vrcp.f32 %v5238_v38 }
 0x4dd   :  { %4096 = vmatmul.msk.bf16.vlgmr.msrb.gmra.mxu0 %vm422_vm11, %v3270_v59 }
 0x4e1   :  { %v4252_v62 = vpop.eup %4251 }
 0x4e2   :  { %v3263_v13 = vmul.f32 %v4252_v62, %v4246_v24 }
 0x4e4   :  { %v3271_v31 = vpack.c.bf16 %v3263_v13, %v3263_v13 }
 0x4e6   :  { %4097 = vmatmul.msk.bf16.vlgmr.msrb.gmra.mxu1 %vm422_vm11, %v3271_v31 }
 0x4ef   :  { %v5247_v15 = vpop.f32.mrf.mxu2 }
 0x4f2   :  { %v3757_v54 = vpop.permute.xlu2 %3756 }
 0x4f3   :  { %v5254_v45 = vsel %vm422_vm11, %v1195_v21, %v3757_v54 }
 0x4f7   :  { %v2511_v58 = vpop.f32.mrf.mxu2 }
 0x4f8   :  { %v5256_v49 = vpop.f32.mrf.mxu3 }
 0x4fb   :  { %v2034_v33 = vpop.trf.xlu0 }
 0x4fc   :  { %2087 = vperm.xlu0 %4119, %v2034_v33  }
 0x4ff   :  { %v5258_v24 = vpop.f32.mrf.mxu2 }
 0x500   :  { %v2532_v41 = vpop.f32.mrf.mxu3 }
 0x504   :  { %3890 = vrot.lane.b32.xlu0 %v2034_v33, %s4274_s30 }
 0x507   :  { %2746 = vxpose.xlu1.b32.start.end [1/1] (short) (narrow) %v5059_v3, 8  ;;  %v2595_v43 = vpop.f32.mrf.mxu2 }
 0x508   :  { %v5262_v8 = vpop.f32.mrf.mxu3 }
 0x50c   :  { %3764 = vrot.lane.b32.xlu0 %v2095_v47, %s4275_s8 }
 0x50f   :  { %2682 = vxpose.xlu1.b32.start.end [1/1] (short) (narrow) %v5141_v9, 8  ;;  %v2987_v42 = vpop.f32.mrf.mxu2 }
 0x510   :  { %v2616_v34 = vpop.f32.mrf.mxu3  ;;  %v3108_v35 = vsel %vm4640_vm13, %v2987_v42, -inf }
 0x511   :  { %v3128_v44 = vsel %vm422_vm11, %v3108_v35, -inf }
 0x512   :  { %v3129_v29 = vrot.slane %v3128_v44, 4 }
 0x514   :  { %v3130_v5 = vmax.f32 %v3128_v44, %v3129_v29 }
 0x516   :  { %v3131_v0 = vrot.slane %v3130_v5, 2 }
 0x517   :  { %v2989_v3 = vpop.f32.mrf.mxu2 }
 0x518   :  { %v3132_v27 = vmax.f32 %v3130_v5, %v3131_v0  ;;  %v3010_v48 = vpop.f32.mrf.mxu3 }
 0x519   :  { %v3109_v28 = vsel %vm4640_vm13, %v3010_v48, -inf }
 0x51a   :  { %v3133_v9 = vrot.slane %v3132_v27, 1  ;;  %v3135_v40 = vsel %vm422_vm11, %v3109_v28, -inf  ;;  %v3755_v59 = vpop.permute.xlu1 %3754 }
 0x51b   :  { %v3136_v62 = vrot.slane %v3135_v40, 4  ;;  %v5276_v13 = vsel %vm422_vm11, %v1194_v39, %v3755_v59 }
 0x51c   :  { %v3134_v31 = vmax.f32 %v3132_v27, %v3133_v9 }
 0x51d   :  { %v3137_v25 = vmax.f32 %v3135_v40, %v3136_v62 }
 0x51e   :  { %v3172_v21 = vsub.f32 %v3108_v35, %v3134_v31 }
 0x51f   :  { %v3138_v54 = vrot.slane %v3137_v25, 2  ;;  %v3079_v58 = vpop.f32.mrf.mxu2 }
 0x520   :  { %v3182_v33 = vmul.f32 1.442695, %v3172_v21  ;;  %v3012_v41 = vpop.f32.mrf.mxu3  ;;  %v3112_v4 = vsel %vm4640_vm13, %v3079_v58, -inf }
 0x521   :  { %v3139_v43 = vmax.f32 %v3137_v25, %v3138_v54  ;;  %v3156_v47 = vsel %vm422_vm11, %v3112_v4, -inf }
 0x522   :  { %4253 = vpow2.f32 %v3182_v33  ;;  %v3157_v42 = vrot.slane %v3156_v47, 4 }
 0x523   :  { %v3140_v34 = vrot.slane %v3139_v43, 1 }
 0x524   :  { %v3158_v44 = vmax.f32 %v3156_v47, %v3157_v42 }
 0x525   :  { %v3141_v29 = vmax.f32 %v3139_v43, %v3140_v34 }
 0x526   :  { %v3159_v5 = vrot.slane %v3158_v44, 2 }
 0x527   :  { %v3173_v0 = vsub.f32 %v3109_v28, %v3141_v29  ;;  %v3081_v3 = vpop.f32.mrf.mxu2 }
 0x528   :  { %v4254_v27 = vpop.eup %4253  ;;  %v3160_v35 = vmax.f32 %v3158_v44, %v3159_v5  ;;  %v3102_v48 = vpop.f32.mrf.mxu3 }
 0x529   :  { %v3208_v63 = vsel %vm422_vm11, %v4254_v27, 0.0  ;;  %v3184_v39 = vmul.f32 1.442695, %v3173_v0  ;;  %v3113_v9 = vsel %vm4640_vm13, %v3102_v48, -inf }
 0x52a   :  { %v3209_v40 = vrot.slane %v3208_v63, 4  ;;  %v3161_v59 = vrot.slane %v3160_v35, 1  ;;  %v3163_v62 = vsel %vm422_vm11, %v3113_v9, -inf }
 0x52b   :  { %4255 = vpow2.f32 %v3184_v39  ;;  %v3164_v31 = vrot.slane %v3163_v62, 4 }
 0x52c   :  { %v3210_v25 = vadd.f32 %v3209_v40, %v3208_v63  ;;  %v3162_v21 = vmax.f32 %v3160_v35, %v3161_v59 }
 0x52d   :  { %v3165_v54 = vmax.f32 %v3163_v62, %v3164_v31 }
 0x52e   :  { %v3211_v28 = vrot.slane %v3210_v25, 2  ;;  %v3176_v58 = vsub.f32 %v3112_v4, %v3162_v21 }
 0x52f   :  { %v3166_v33 = vrot.slane %v3165_v54, 2 }
 0x530   :  { %v3212_v41 = vadd.f32 %v3211_v28, %v3210_v25  ;;  %v3190_v43 = vmul.f32 1.442695, %v3176_v58  ;;  %v3104_v47 = vpop.f32.mrf.mxu3 }
 0x531   :  { %v4256_v42 = vpop.eup %4255  ;;  %v3167_v34 = vmax.f32 %v3165_v54, %v3166_v33 }
 0x532   :  { %v3213_v44 = vrot.slane %v3212_v41, 1  ;;  %v3215_v51 = vsel %vm422_vm11, %v4256_v42, 0.0  ;;  %4257 = vpow2.f32 %v3190_v43 }
 0x533   :  { %v3216_v29 = vrot.slane %v3215_v51, 4  ;;  %v3168_v5 = vrot.slane %v3167_v34, 1 }
 0x534   :  { %v5286_v0 = vadd.f32 %v3213_v44, %v3212_v41 }
 0x535   :  { %v3217_v3 = vadd.f32 %v3216_v29, %v3215_v51  ;;  %v3169_v48 = vmax.f32 %v3167_v34, %v3168_v5 }
 0x536   :  { %4259 = vrcp.f32 %v5286_v0 }
 0x537   :  { %v3218_v35 = vrot.slane %v3217_v3, 2  ;;  %v3177_v4 = vsub.f32 %v3113_v9, %v3169_v48  ;;  %v5289_v63 = vpop.permute.xlu0 %3884 }
 0x538   :  { %v4258_v39 = vpop.eup %4257 }
 0x539   :  { %v3219_v40 = vadd.f32 %v3218_v35, %v3217_v3  ;;  %v3236_v59 = vsel %vm422_vm11, %v4258_v39, 0.0  ;;  %v3192_v62 = vmul.f32 1.442695, %v3177_v4 }
 0x53a   :  { %v3237_v31 = vrot.slane %v3236_v59, 4 }
 0x53b   :  { %v3220_v25 = vrot.slane %v3219_v40, 1  ;;  %4261 = vpow2.f32 %v3192_v62 }
 0x53c   :  { %v4260_v21 = vpop.eup %4259  ;;  %v3238_v54 = vadd.f32 %v3237_v31, %v3236_v59 }
 0x53d   :  { %v3260_v28 = vmul.f32 %v4260_v21, %v4254_v27  ;;  %v5292_v58 = vadd.f32 %v3220_v25, %v3219_v40 }
 0x53e   :  { %v3239_v33 = vrot.slane %v3238_v54, 2 }
 0x53f   :  { %v3268_v41 = vpack.c.bf16 %v3260_v28, %v3260_v28  ;;  %4263 = vrcp.f32 %v5292_v58  ;;  %v2063_v9 = vpop.permute.xlu0 %2062 }
 0x540   :  { %v3240_v43 = vadd.f32 %v3239_v33, %v3238_v54  ;;  %v2092_v47 = vmul.f32 %v2063_v9, %v5076_v16 }
 0x541   :  { %v4262_v34 = vpop.eup %4261  ;;  %4094 = vmatmul.msk.bf16.vlgmr.msra.gmra.mxu2 %vm422_vm11, %v3268_v41 }
 0x542   :  { %v3241_v44 = vrot.slane %v3240_v43, 1  ;;  %v3243_v51 = vsel %vm422_vm11, %v4262_v34, 0.0  ;;  %3758 = vrot.lane.b32.xlu0 %v2092_v47, %s4275_s8 }
 0x543   :  { %v3244_v29 = vrot.slane %v3243_v51, 4 }
 0x544   :  { %v5299_v27 = vadd.f32 %v3241_v44, %v3240_v43 }
 0x545   :  { %v4264_v5 = vpop.eup %4263  ;;  %v3245_v3 = vadd.f32 %v3244_v29, %v3243_v51 }
 0x546   :  { %v3261_v48 = vmul.f32 %v4264_v5, %v4256_v42  ;;  %4265 = vrcp.f32 %v5299_v27  ;;  %v5634_v5 = vld [vmem:[#allocation10_spill] sm:$0xff] }
 0x547   :  { %v3246_v35 = vrot.slane %v3245_v3, 2 }
 0x548   :  { %v3269_v4 = vpack.c.bf16 %v3261_v48, %v3261_v48 }
 0x549   :  { %v3247_v40 = vadd.f32 %v3246_v35, %v3245_v3  ;;  %v1199_v3 = vmul.f32 %v5112_v61, %v5634_v5 }
 0x54a   :  { %4095 = vmatmul.msk.bf16.vlgmr.msrb.gmra.mxu3 %vm422_vm11, %v3269_v4  ;;  %v5303_v16 = vpop.f32.mrf.mxu0 }
 0x54b   :  { %v3248_v59 = vrot.slane %v3247_v40, 1 }
 0x54c   :  { %v4266_v62 = vpop.eup %4265 }
 0x54d   :  { %v3264_v31 = vmul.f32 %v4266_v62, %v4258_v39  ;;  %v5305_v25 = vadd.f32 %v3248_v59, %v3247_v40  ;;  %v5334_v59 = vpop.permute.xlu2 %3762 }
 0x54f   :  { %v3272_v21 = vpack.c.bf16 %v3264_v31, %v3264_v31  ;;  %4267 = vrcp.f32 %v5305_v25 }
 0x551   :  { %4098 = vmatmul.msk.bf16.vlgmr.msrb.gmra.mxu2 %vm422_vm11, %v3272_v21  ;;  %v5338_v21 = vpop.permute.xlu1 %3760 }
 0x552   :  { %v3293_v42 = vpop.f32.mrf.mxu0 }
 0x553   :  { %v5309_v54 = vpop.f32.mrf.mxu1 }
 0x555   :  { %v4268_v28 = vpop.eup %4267 }
 0x556   :  { %v3265_v33 = vmul.f32 %v4268_v28, %v4262_v34 }
 0x558   :  { %v3273_v41 = vpack.c.bf16 %v3265_v33, %v3265_v33 }
 0x559   :  { %v5342_v28 = vpop.permute.xlu1 %3766 }
 0x55a   :  { %4099 = vmatmul.msk.bf16.vlgmr.msra.gmra.mxu3 %vm422_vm11, %v3273_v41  ;;  %v5312_v9 = vpop.f32.mrf.mxu0 }
 0x55b   :  { %v3314_v43 = vpop.f32.mrf.mxu1 }
 0x562   :  { %v3377_v47 = vpop.f32.mrf.mxu0 }
 0x563   :  { %v5314_v39 = vpop.f32.mrf.mxu1 }
 0x564   :  { %2618 = vxpose.xlu0.b32.start.end [1/1] (short) (narrow) %v5048_v37, 8 }
 0x56b   :  { %v3398_v44 = vpop.f32.mrf.mxu1 }
 0x56c   :  { %2778 = vxpose.xlu0.b32.start.end [1/1] (short) (narrow) %v5065_v30, 8 }
 0x56e   :  { %v2088_v51 = vpop.permute.xlu0 %2087 }
 0x56f   :  { %v2097_v29 = vmul.f32 %v2088_v51, %v5104_v23 }
 0x571   :  { %3768 = vrot.lane.b32.xlu2 %v2097_v29, %s4275_s8  ;;  %v2666_v31 = vpop.trf.xlu2 }
 0x574   :  { %2714 = vxpose.xlu0.b32.start.end [1/1] (short) (narrow) %v5145_v6, 8 }
 0x576   :  { %v5321_v34 = vpop.permute.xlu0 %3890 }
 0x57e   :  { %v3765_v48 = vpop.permute.xlu0 %3764 }
 0x57f   :  { %v5326_v35 = vsel %vm422_vm11, %v1199_v3, %v3765_v48 }
 0x5ab   :  { %v2762_v41 = vpop.trf.xlu1 }
 0x5b3   :  { %v2698_v47 = vpop.trf.xlu1 }
 0x5b4   :  { %v5340_v42 = vpop.permute.xlu0 %3758 }
 0x5c4   :  { %v5328_v37 = vpop.f32.mrf.mxu2 }
 0x5cc   :  { %v3335_v4 = vpop.f32.mrf.mxu2 }
 0x5cd   :  { %v5330_v30 = vpop.f32.mrf.mxu3  ;;  %v3952_v4 = vsel %vm3948_vm14, %v4932_v53, %v5242_v19 }
 0x5d4   :  { %v5332_v40 = vpop.f32.mrf.mxu2 }
 0x5d5   :  { %v3356_v23 = vpop.f32.mrf.mxu3 }
 0x5dc   :  { %v3419_v6 = vpop.f32.mrf.mxu2 }
 0x5dd   :  { %v5336_v62 = vpop.f32.mrf.mxu3 }
 0x5e2   :  { %2881 = vperm.xlu0 %4119, %v2666_v31  }
 0x5e5   :  { %v3440_v61 = vpop.f32.mrf.mxu3 }
 0x5e6   :  { %v5370_v61 = vpop.permute.xlu2 %3768 }
 0x604   :  { %2842 = vxpose.xlu0.b32.start.end [1/1] (short) (narrow) %v5158_v46, 8  ;;  %v3949_v46 = vsel %vm3948_vm14, %v4930_v36, %v5177_v52 }
 0x608   :  { %v2634_v33 = vpop.trf.xlu0 }
 0x609   :  { %3900 = vrot.lane.b32.xlu1 %v2634_v33, %s4276_s9  ;;  %2876 = vperm.xlu2 %4118, %v2634_v33  }
 0x610   :  { %v2794_v43 = vpop.trf.xlu0 }
 0x611   :  { %2901 = vperm.xlu1 %4120, %v2794_v43  }
 0x618   :  { %v2730_v44 = vpop.trf.xlu0 }
 0x619   :  { %2886 = vperm.xlu1 %4120, %v2698_v47  }
 0x621   :  { %2891 = vperm.xlu1 %4120, %v2730_v44  }
 0x629   :  { %3906 = vrot.lane.b32.xlu1 %v2730_v44, %s4276_s9 }
 0x62f   :  { %2810 = vxpose.xlu2.b32.start.end [1/1] (short) (narrow) %v5152_v32, 8 }
 0x654   :  { %v2882_v51 = vpop.permute.xlu0 %2881 }
 0x655   :  { %v2915_v29 = vmul.f32 %v2882_v51, %v5166_v7 }
 0x657   :  { %3788 = vrot.lane.b32.xlu1 %v2915_v29, %s4277_s10 }
 0x663   :  { %v2877_v53 = vpop.permute.xlu2 %2876 }
 0x664   :  { %v2914_v33 = vmul.f32 %v2877_v53, %v5161_v22 }
 0x672   :  { %3910 = vrot.lane.b32.xlu0 %v2794_v43, %s4276_s9 }
 0x67a   :  { %3904 = vrot.lane.b32.xlu0 %v2698_v47, %s4276_s9 }
 0x67b   :  { %v3901_v5 = vpop.permute.xlu1 %3900 }
 0x67c   :  { %v5356_v3 = vsel %vm3957_vm15, %v3949_v46, %v3901_v5 }
 0x683   :  { %v2902_v32 = vpop.permute.xlu1 %2901 }
 0x684   :  { %v2919_v52 = vmul.f32 %v2902_v32, %v5179_v17  ;;  %v3954_v17 = vsel %vm3948_vm14, %v4921_v1, %v5212_v50 }
 0x68b   :  { %v2887_v48 = vpop.permute.xlu1 %2886 }
 0x693   :  { %v2892_v7 = vpop.permute.xlu1 %2891 }
 0x698   :  { %3902 = vrot.lane.b32.xlu2 %v2666_v31, %s4276_s9  ;;  %v2916_v31 = vmul.f32 %v2887_v48, %v5247_v15 }
 0x69b   :  { %v3907_v23 = vpop.permute.xlu1 %3906 }
 0x69c   :  { %v5363_v6 = vsel %vm3957_vm15, %v3952_v4, %v3907_v23 }
 0x6a0   :  { %2896 = vperm.xlu2 %4118, %v2762_v41  }
 0x6a8   :  { %3908 = vrot.lane.b32.xlu2 %v2762_v41, %s4276_s9  ;;  %v5366_v36 = vpop.trf.xlu0  ;;  %v2917_v41 = vmul.f32 %v2892_v7, %v5256_v49  ;;  %v5635_v49 = vld [vmem:[#allocation17_spill] sm:$0xff] }
 0x6a9   :  { %v3953_v51 = vsel %vm3948_vm14, %v5635_v49, %v5289_v63 }
 0x6b0   :  { %2911 = vperm.xlu2 %4118, %v5366_v36  }
 0x6b8   :  { %3796 = vrot.lane.b32.xlu2 %v2919_v52, %s4277_s10 }
 0x6c0   :  { %3790 = vrot.lane.b32.xlu2 %v2916_v31, %s4277_s10 }
 0x6c8   :  { %v2826_v19 = vpop.trf.xlu2 }
 0x6c9   :  { %2906 = vperm.xlu0 %4119, %v2826_v19   ;;  %v5417_v7 = vpop.permute.xlu1 %3788 }
 0x6d1   :  { %3786 = vrot.lane.b32.xlu0 %v2914_v33, %s4277_s10 }
 0x6d9   :  { %3792 = vrot.lane.b32.xlu0 %v2917_v41, %s4277_s10 }
 0x6e4   :  { %v3911_v43 = vpop.permute.xlu0 %3910 }
 0x6e5   :  { %v5383_v15 = vsel %vm3957_vm15, %v3954_v17, %v3911_v43 }
 0x6e6   :  { %3442 = vxpose.xlu2.b32.start.end [1/1] (short) (narrow) %v5217_v14, 8 }
 0x6ee   :  { %3602 = vxpose.xlu2.b32.start.end [1/1] (short) (narrow) %v5238_v38, 8 }
 0x6f2   :  { %v5387_v47 = vpop.permute.xlu2 %3902 }
 0x6fa   :  { %v2897_v22 = vpop.permute.xlu2 %2896 }
 0x6fb   :  { %v2918_v44 = vmul.f32 %v2897_v22, %v5171_v55  ;;  %v5402_v55 = vpop.permute.xlu0 %3904 }
 0x6fd   :  { %3794 = vrot.lane.b32.xlu1 %v2918_v44, %s4277_s10 }
 0x702   :  { %v3909_v1 = vpop.permute.xlu2 %3908 }
 0x703   :  { %v5395_v50 = vsel %vm3957_vm15, %v3953_v51, %v3909_v1 }
 0x70a   :  { %v2912_v29 = vpop.permute.xlu2 %2911 }
 0x712   :  { %v3797_v14 = vpop.permute.xlu2 %3796 }
 0x713   :  { %v5399_v38 = vsel %vm3850_vm1, %v5326_v35, %v3797_v14 }
 0x71a   :  { %v5412_v35 = vpop.permute.xlu2 %3790 }
 0x732   :  { %3474 = vxpose.xlu1.b32.start.end [1/1] (short) (narrow) %v5224_v20, 8  ;;  %v2921_v20 = vmul.f32 %v2912_v29, %v5262_v8 }
 0x73b   :  { %v2907_v46 = vpop.permute.xlu0 %2906 }
 0x73c   :  { %v2920_v5 = vmul.f32 %v2907_v46, %v5258_v24 }
 0x73e   :  { %3798 = vrot.lane.b32.xlu0 %v2920_v5, %s4277_s10 }
 0x743   :  { %v3787_v63 = vpop.permute.xlu0 %3786 }
 0x744   :  { %v5408_v32 = vsel %vm3850_vm1, %v5276_v13, %v3787_v63 }
 0x760   :  { %3570 = vxpose.xlu0.b32.start.end [1/1] (short) (narrow) %v5231_v60, 8 }
 0x768   :  { %3506 = vxpose.xlu0.b32.start.end [1/1] (short) (narrow) %v5286_v0, 8  ;;  %v5423_v0 = vpop.permute.xlu0 %3792 }
 0x76f   :  { %v5420_v13 = vpop.permute.xlu1 %3794 }
 0x77f   :  { %v3458_v48 = vpop.trf.xlu2 }
 0x780   :  { %3700 = vperm.xlu2 %4118, %v3458_v48  }
 0x787   :  { %v3618_v24 = vpop.trf.xlu2 }
 0x78c   :  { %3800 = vrot.lane.b32.xlu1 %v2921_v20, %s4277_s10 }
 0x794   :  { %3725 = vperm.xlu1 %4120, %v3618_v24  }
 0x7a6   :  { %3538 = vxpose.xlu2.b32.start.end [1/1] (short) (narrow) %v5292_v58, 8 }
 0x7b0   :  { %v5425_v4 = vpop.permute.xlu0 %3798 }
 0x7c9   :  { %3666 = vxpose.xlu1.b32.start.end [1/1] (short) (narrow) %v5305_v25, 8 }
 0x7d6   :  { %v3490_v60 = vpop.trf.xlu1 }
 0x7d7   :  { %3705 = vperm.xlu0 %4119, %v3490_v60  }
 0x7da   :  { %v3701_v52 = vpop.permute.xlu2 %3700 }
 0x7db   :  { %v3738_v49 = vmul.f32 %v3701_v52, %v5303_v16 }
 0x7f9   :  { %3634 = vxpose.xlu0.b32.start.end [1/1] (short) (narrow) %v5299_v27, 8 }
 0x7fe   :  { %v5428_v25 = vpop.permute.xlu1 %3800 }
 0x804   :  { %v3586_v8 = vpop.trf.xlu0 }
 0x806   :  { %v3726_v31 = vpop.permute.xlu1 %3725 }
 0x80c   :  { %v3522_v23 = vpop.trf.xlu0 }
 0x80f   :  { %3720 = vperm.xlu2 %4118, %v3586_v8  }
 0x823   :  { %3710 = vperm.xlu1 %4120, %v3522_v23  }
 0x83f   :  { %v3554_v58 = vpop.trf.xlu2 }
 0x840   :  { %3715 = vperm.xlu1 %4120, %v3554_v58  }
 0x848   :  { %3912 = vrot.lane.b32.xlu1 %v2826_v19, %s4276_s9  ;;  %v3743_v19 = vmul.f32 %v3726_v31, %v5314_v39 }
 0x849   :  { %v3706_v53 = vpop.permute.xlu0 %3705 }
 0x84a   :  { %v3739_v43 = vmul.f32 %v3706_v53, %v5309_v54  ;;  %v5636_v54 = vld [vmem:[#allocation15_spill] sm:$0xff]  ;;  %v5639_v53 = vld [vmem:[#allocation16_spill] sm:$0xff] }
 0x84b   :  { %v3950_v51 = vsel %vm3948_vm14, %v5636_v54, %v5251_v12 }
 0x850   :  { %3926 = vrot.lane.b32.xlu1 %v3490_v60, %s4278_s11 }
 0x858   :  { %3932 = vrot.lane.b32.xlu1 %v3586_v8, %s4278_s11  ;;  %v5637_v8 = vld [vmem:[#allocation21_spill] sm:$0xff] }
 0x867   :  { %3924 = vrot.lane.b32.xlu0 %v3458_v48, %s4278_s11 }
 0x869   :  { %v3721_v22 = vpop.permute.xlu2 %3720 }
 0x86d   :  { %v3682_v27 = vpop.trf.xlu1 }
 0x86e   :  { %3938 = vrot.lane.b32.xlu1 %v3682_v27, %s4278_s11 }
 0x86f   :  { %3735 = vperm.xlu0 %4119, %v3682_v27   ;;  %v5638_v27 = vld [vmem:[#allocation11_spill] sm:$0xff] }
 0x877   :  { %3930 = vrot.lane.b32.xlu0 %v3554_v58, %s4278_s11 }
 0x895   :  { %v3711_v33 = vpop.permute.xlu1 %3710 }
 0x896   :  { %v3740_v41 = vmul.f32 %v3711_v33, %v5328_v37  ;;  %v3742_v37 = vmul.f32 %v3721_v22, %v5312_v9  ;;  %v3951_v33 = vsel %vm3948_vm14, %v5639_v53, %v5215_v2 }
 0x898   :  { %3822 = vrot.lane.b32.xlu1 %v3740_v41, %s4279_s12 }
 0x89d   :  { %v3650_v17 = vpop.trf.xlu0 }
 0x89e   :  { %3936 = vrot.lane.b32.xlu0 %v3650_v17, %s4278_s11  ;;  %3730 = vperm.xlu2 %4118, %v3650_v17  }
 0x8a0   :  { %3828 = vrot.lane.b32.xlu1 %v3743_v19, %s4279_s12 }
 0x8a6   :  { %3820 = vrot.lane.b32.xlu0 %v3739_v43, %s4279_s12  ;;  %3914 = vrot.lane.b32.xlu2 %v5366_v36, %s4276_s9  ;;  %v3959_v36 = vsel %vm3957_vm15, %v3950_v51, %v5387_v47 }
 0x8ae   :  { %3826 = vrot.lane.b32.xlu0 %v3742_v37, %s4279_s12  ;;  %3928 = vrot.lane.b32.xlu2 %v3522_v23, %s4278_s11 }
 0x8b2   :  { %v3716_v44 = vpop.permute.xlu1 %3715 }
 0x8b3   :  { %v3741_v29 = vmul.f32 %v3716_v44, %v5330_v30 }
 0x8b6   :  { %3934 = vrot.lane.b32.xlu2 %v3618_v24, %s4278_s11 }
 0x8ba   :  { %v3913_v39 = vpop.permute.xlu1 %3912 }
 0x8be   :  { %3818 = vrot.lane.b32.xlu2 %v3738_v49, %s4279_s12 }
 0x8c2   :  { %v3927_v9 = vpop.permute.xlu1 %3926 }
 0x8c3   :  { %v3968_v1 = vsel %vm3966_vm2, %v3959_v36, %v3927_v9 }
 0x8c4   :  { %v3977_v14 = vsel %vm3975_vm3, %v3968_v1, 0.0 }
 0x8c5   :  { %3985 = vst [vmem:[%s5591_s7 + $0x8] sm:$0xff] %v3977_v14  ;;  %v5641_v14 = vld [vmem:[#allocation8_spill] sm:$0xff] }
 0x8c6   :  { %3824 = vrot.lane.b32.xlu2 %v3741_v29, %s4279_s12 }
 0x8ca   :  { %v3933_v16 = vpop.permute.xlu1 %3932 }
 0x8cb   :  { %v3971_v12 = vsel %vm3966_vm2, %v5395_v50, %v3933_v16 }
 0x8cc   :  { %v3980_v46 = vsel %vm3975_vm3, %v3971_v12, 0.0 }
 0x8cd   :  { %3988 = vst [vmem:[%s5591_s7 + $0x20] sm:$0xff] %v3980_v46 }
 0x8d9   :  { %v3925_v47 = vpop.permute.xlu0 %3924 }
 0x8da   :  { %v3967_v30 = vsel %vm3966_vm2, %v5356_v3, %v3925_v47 }
 0x8db   :  { %v3976_v5 = vsel %vm3975_vm3, %v3967_v30, 0.0 }
 0x8dc   :  { %3984 = vst [vmem:[%s5591_s7] sm:$0xff] %v3976_v5 }
 0x8e0   :  { %v3939_v52 = vpop.permute.xlu1 %3938 }
 0x8e1   :  { %v3736_v63 = vpop.permute.xlu0 %3735 }
 0x8e2   :  { %v3745_v48 = vmul.f32 %v3736_v63, %v5336_v62  ;;  %v3956_v62 = vsel %vm3948_vm14, %v5637_v8, %v5321_v34  ;;  %v3960_v34 = vsel %vm3957_vm15, %v3951_v33, %v5402_v55 }
 0x8e4   :  { %3832 = vrot.lane.b32.xlu0 %v3745_v48, %s4279_s12 }
 0x8e9   :  { %v3931_v50 = vpop.permute.xlu0 %3930 }
 0x8ea   :  { %v3970_v20 = vsel %vm3966_vm2, %v5363_v6, %v3931_v50 }
 0x8eb   :  { %v3979_v24 = vsel %vm3975_vm3, %v3970_v20, 0.0 }
 0x8ec   :  { %3987 = vst [vmem:[%s5591_s7 + $0x18] sm:$0xff] %v3979_v24 }
 0x8f8   :  { %v3731_v3 = vpop.permute.xlu2 %3730 }
 0x8f9   :  { %v3744_v60 = vmul.f32 %v3731_v3, %v5332_v40  ;;  %v1196_v40 = vmul.f32 %v5100_v10, %v5638_v27 }
 0x8fb   :  { %3830 = vrot.lane.b32.xlu2 %v3744_v60, %s4279_s12  ;;  %v3844_v17 = vsel %vm422_vm11, %v1196_v40, %v5340_v42  ;;  %v5640_v42 = vld [vmem:[#allocation20_spill] sm:$0xff] }
 0x8fc   :  { %v3853_v43 = vsel %vm3850_vm1, %v3844_v17, %v5412_v35  ;;  %v3955_v55 = vsel %vm3948_vm14, %v5640_v42, %v5245_v57 }
 0x8fd   :  { %v3964_v35 = vsel %vm3957_vm15, %v3955_v55, %v3913_v39 }
 0x900   :  { %v3915_v23 = vpop.permute.xlu2 %3914 }
 0x901   :  { %v3965_v58 = vsel %vm3957_vm15, %v3956_v62, %v3915_v23 }
 0x902   :  { %v3974_v6 = vsel %vm3966_vm2, %v3965_v58, %v3939_v52 }
 0x903   :  { %v3983_v31 = vsel %vm3975_vm3, %v3974_v6, 0.0 }
 0x904   :  { %3991 = vst [vmem:[%s5591_s7 + $0x38] sm:$0xff] %v3983_v31 }
 0x908   :  { %v3929_v41 = vpop.permute.xlu2 %3928 }
 0x909   :  { %v3969_v19 = vsel %vm3966_vm2, %v3960_v34, %v3929_v41 }
 0x90a   :  { %v3978_v22 = vsel %vm3975_vm3, %v3969_v19, 0.0  ;;  %v3823_v10 = vpop.permute.xlu1 %3822 }
 0x90b   :  { %3986 = vst [vmem:[%s5591_s7 + $0x10] sm:$0xff] %v3978_v22  ;;  %v3862_v2 = vsel %vm3859_vm4, %v3853_v43, %v3823_v10 }
 0x90c   :  { %3870 = vst.msk [vmem:[%s5592_s6 + $0x10] sm:$0xff] %vm34_vm0, %v3862_v2 }
 0x910   :  { %v3937_v37 = vpop.permute.xlu0 %3936  ;;  %v3935_v44 = vpop.permute.xlu2 %3934 }
 0x911   :  { %v3973_v49 = vsel %vm3966_vm2, %v3964_v35, %v3937_v37  ;;  %v3972_v54 = vsel %vm3966_vm2, %v5383_v15, %v3935_v44  ;;  %v3852_v15 = vsel %vm3850_vm1, %v5254_v45, %v5417_v7  ;;  %v1198_v45 = vmul.f32 %v5086_v18, %v5641_v14  ;;  %v5642_v7 = vld [vmem:[#allocation12_spill] sm:$0xff] }
 0x912   :  { %v3982_v51 = vsel %vm3975_vm3, %v3973_v49, 0.0  ;;  %v3981_v36 = vsel %vm3975_vm3, %v3972_v54, 0.0  ;;  %v3829_v9 = vpop.permute.xlu1 %3828  ;;  %v1197_v16 = vmul.f32 %v5120_v56, %v5642_v7  ;;  %v5643_v56 = vld [vmem:[#allocation18_spill] sm:$0xff] }
 0x913   :  { %3990 = vst [vmem:[%s5591_s7 + $0x30] sm:$0xff] %v3982_v51  ;;  %v3865_v57 = vsel %vm3859_vm4, %v5399_v38, %v3829_v9  ;;  %v3846_v12 = vsel %vm422_vm11, %v1198_v45, %v5334_v59  ;;  %v1200_v59 = vmul.f32 %v5092_v26, %v5643_v56 }
 0x914   :  { %3989 = vst [vmem:[%s5591_s7 + $0x28] sm:$0xff] %v3981_v36  ;;  %v3855_v47 = vsel %vm3850_vm1, %v3846_v12, %v5420_v13 }
 0x915   :  { %3873 = vst.msk [vmem:[%s5592_s6 + $0x28] sm:$0xff] %vm34_vm0, %v3865_v57 }
 0x918   :  { %v3821_v39 = vpop.permute.xlu0 %3820  ;;  %v3819_v1 = vpop.permute.xlu2 %3818 }
 0x919   :  { %v3861_v29 = vsel %vm3859_vm4, %v3852_v15, %v3821_v39  ;;  %v3860_v38 = vsel %vm3859_vm4, %v5408_v32, %v3819_v1  ;;  %v3845_v32 = vsel %vm422_vm11, %v1197_v16, %v5338_v21  ;;  %v5644_v21 = vld [vmem:[#allocation19_spill] sm:$0xff] }
 0x91a   :  { %3869 = vst.msk [vmem:[%s5592_s6 + $0x8] sm:$0xff] %vm34_vm0, %v3861_v29  ;;  %v3854_v46 = vsel %vm3850_vm1, %v3845_v32, %v5423_v0  ;;  %v1201_v13 = vmul.f32 %v5096_v11, %v5644_v21  ;;  %v3848_v0 = vsel %vm422_vm11, %v1200_v59, %v5342_v28 }
 0x91b   :  { %3868 = vst.msk [vmem:[%s5592_s6] sm:$0xff] %vm34_vm0, %v3860_v38  ;;  %v3857_v50 = vsel %vm3850_vm1, %v3848_v0, %v5425_v4 }
 0x91c   :  { %v3849_v48 = vsel %vm422_vm11, %v1201_v13, %v5370_v61 }
 0x91d   :  { %v3858_v24 = vsel %vm3850_vm1, %v3849_v48, %v5428_v25 }
 0x920   :  { %v3827_v30 = vpop.permute.xlu0 %3826  ;;  %v3825_v5 = vpop.permute.xlu2 %3824 }
 0x921   :  { %v3864_v63 = vsel %vm3859_vm4, %v3855_v47, %v3827_v30  ;;  %v3863_v18 = vsel %vm3859_vm4, %v3854_v46, %v3825_v5 }
 0x922   :  { %3872 = vst.msk [vmem:[%s5592_s6 + $0x20] sm:$0xff] %vm34_vm0, %v3864_v63 }
 0x923   :  { %3871 = vst.msk [vmem:[%s5592_s6 + $0x18] sm:$0xff] %vm34_vm0, %v3863_v18 }
 0x955   :  { %v3831_v20 = vpop.permute.xlu2 %3830 }
 0x956   :  { %v3866_v3 = vsel %vm3859_vm4, %v3857_v50, %v3831_v20  ;;  %v3833_v60 = vpop.permute.xlu0 %3832 }
 0x957   :  { %3874 = vst.msk [vmem:[%s5592_s6 + $0x30] sm:$0xff] %vm34_vm0, %v3866_v3  ;;  %v3867_v26 = vsel %vm3859_vm4, %v3858_v24, %v3833_v60 }
 0x958   :  { %3875 = vst.msk [vmem:[%s5592_s6 + $0x38] sm:$0xff] %vm34_vm0, %v3867_v26 }

// kernel: dilated_transformer_block_forward.5
= control target key start
LH: loop header
LB: loop body
LE: loop exit
PB: predicated region body
PF: predicated region fallthrough
CT: control target
= control target key end

     0   :  { %s910_s0 = inlined_call_operand.vmem [shape: f32[64,32], index: 0, kind: input, shape index: {}]   ;;  %s911_s1 = inlined_call_operand.vmem [shape: f32[64,32], index: 1, kind: input, shape index: {}]   ;;  %s912_s2 = inlined_call_operand.vmem [shape: bf16[32,32], index: 2, kind: input, shape index: {}]   ;;  %s913_s3 = inlined_call_operand.vmem [shape: f32[1,32], index: 3, kind: input, shape index: {}]   ;;  %s914_s4 = inlined_call_operand.vmem [shape: f32[1,32], index: 4, kind: input, shape index: {}]   ;;  %s915_s5 = inlined_call_operand.vmem [shape: bf16[32,128], index: 5, kind: input, shape index: {}]   ;;  %s916_s6 = inlined_call_operand.vmem [shape: f32[1,128], index: 6, kind: input, shape index: {}]   ;;  %s917_s7 = inlined_call_operand.vmem [shape: bf16[128,32], index: 7, kind: input, shape index: {}]   ;;  %s918_s8 = inlined_call_operand.vmem [shape: f32[1,32], index: 8, kind: input, shape index: {}]   ;;  %s919_s9 = inlined_call_operand.hbm [shape: f32[64,32], index: 9, kind: output, shape index: {}]  }
   0x1   :  { %v576_v0 = vld [vmem:[%s912_s2 + $0x8] sm:$0xff]  ;;  %v575_v1 = vld [vmem:[%s912_s2] sm:$0xff] }
   0x2   :  { %89 = vmatpush.bf16.msra.mxu0 %v576_v0  ;;  %v34_v2 = vld [vmem:[%s910_s0] sm:$0xff]  ;;  %v35_v3 = vld [vmem:[%s910_s0 + $0x8] sm:$0xff] }
   0x3   :  { %14 = vsyncpa [#allocation3], 0  ;;  %v42_v4 = vpack.c.bf16 %v35_v3, %v34_v2  ;;  %vm70_vm0 = vcmask 261120   ;;  %v36_v5 = vld [vmem:[%s910_s0 + $0x10] sm:$0xff]  ;;  %v37_v6 = vld [vmem:[%s910_s0 + $0x18] sm:$0xff]  ;;  %v647_v42 = vmov 32.0  }
   0x4   :  { %v43_v7 = vpack.c.bf16 %v37_v6, %v36_v5  ;;  %v38_v8 = vld [vmem:[%s910_s0 + $0x20] sm:$0xff]  ;;  %v39_v9 = vld [vmem:[%s910_s0 + $0x28] sm:$0xff]  ;;  %v40_v11 = vld [vmem:[%s910_s0 + $0x30] sm:$0xff]  ;;  %603 = vrcp.f32 %v647_v42  ;;  %s507_s22 = sshll.u32 %s919_s9, 4  ;;  %s649_s23 = smov 128   ;;  %s508_s22 = int_to_ptr.hbm [resolvable:$true] %s507_s22 }
   0x5   :  { %v44_v10 = vpack.c.bf16 %v39_v9, %v38_v8  ;;  %v41_v12 = vld [vmem:[%s910_s0 + $0x38] sm:$0xff]  ;;  %v50_v14 = vld [vmem:[%s911_s1] sm:$0xff]  ;;  %v51_v18 = vld [vmem:[%s911_s1 + $0x8] sm:$0xff] }
   0x6   :  { %90 = vmatpush.bf16.msra.mxu0 %v575_v1  ;;  %v45_v13 = vpack.c.bf16 %v41_v12, %v40_v11  ;;  %v52_v22 = vld [vmem:[%s911_s1 + $0x10] sm:$0xff]  ;;  %v53_v26 = vld [vmem:[%s911_s1 + $0x18] sm:$0xff]  ;;  %v54_v30 = vld [vmem:[%s911_s1 + $0x20] sm:$0xff] }
   0x7   :  { %v55_v34 = vld [vmem:[%s911_s1 + $0x28] sm:$0xff]  ;;  %v56_v38 = vld [vmem:[%s911_s1 + $0x30] sm:$0xff]  ;;  %v57_v54 = vld [vmem:[%s911_s1 + $0x38] sm:$0xff] }
   0x9   :  { %527 = vmatmul.msk.bf16.vlgmr.msra.gmra.mxu0 %vm70_vm0, %v42_v4 }
   0xa   :  { %v604_v43 = vpop.eup %603 }
   0xb   :  { %v137_v44 = vmul.f32 32.0, %v604_v43  ;;  %vm141_vm1 = vweird.f32 %v604_v43 }
   0xd   :  { %v138_v45 = vsub.f32 1.0, %v137_v44 }
   0xf   :  { %v139_v46 = vmul.f32 %v604_v43, %v138_v45 }
  0x11   :  { %v140_v47 = vadd.f32 %v604_v43, %v139_v46 }
  0x13   :  { %v763_v48 = vsel %vm141_vm1, %v604_v43, %v140_v47 }
  0x19   :  { %528 = vmatmul.msk.bf16.gmra.mxu0 %vm70_vm0, %v43_v7 }
  0x29   :  { %529 = vmatmul.msk.bf16.gmra.mxu0 %vm70_vm0, %v44_v10 }
  0x39   :  { %530 = vmatmul.msk.bf16.gmra.mxu0 %vm70_vm0, %v45_v13 }
  0x86   :  { %v92_v15 = vpop.f32.mrf.mxu0 }
  0x87   :  { %v93_v16 = vadd.f32 %v92_v15, %v50_v14 }
  0x89   :  { %v112_v17 = vsel %vm70_vm0, %v93_v16, 0.0 }
  0x8a   :  { %113 = vadd.xlane.f32.xlu0 %v112_v17 }
  0x8e   :  { %v94_v19 = vpop.f32.mrf.mxu0 }
  0x8f   :  { %v95_v20 = vadd.f32 %v94_v19, %v51_v18 }
  0x91   :  { %v115_v21 = vsel %vm70_vm0, %v95_v20, 0.0 }
  0x92   :  { %116 = vadd.xlane.f32.xlu0 %v115_v21 }
  0x96   :  { %v97_v23 = vpop.f32.mrf.mxu0 }
  0x97   :  { %v98_v24 = vadd.f32 %v97_v23, %v52_v22 }
  0x99   :  { %v118_v25 = vsel %vm70_vm0, %v98_v24, 0.0 }
  0x9a   :  { %119 = vadd.xlane.f32.xlu1 %v118_v25 }
  0x9e   :  { %v99_v27 = vpop.f32.mrf.mxu0 }
  0x9f   :  { %v100_v28 = vadd.f32 %v99_v27, %v53_v26  ;;  %v577_v27 = vld [vmem:[%s915_s5] sm:$0xff] }
  0xa1   :  { %v121_v29 = vsel %vm70_vm0, %v100_v28, 0.0 }
  0xa2   :  { %122 = vadd.xlane.f32.xlu1 %v121_v29 }
  0xa6   :  { %v102_v31 = vpop.f32.mrf.mxu0 }
  0xa7   :  { %v103_v32 = vadd.f32 %v102_v31, %v54_v30 }
  0xa9   :  { %v124_v33 = vsel %vm70_vm0, %v103_v32, 0.0 }
  0xaa   :  { %125 = vadd.xlane.f32.xlu2 %v124_v33 }
  0xae   :  { %v104_v35 = vpop.f32.mrf.mxu0 }
  0xaf   :  { %v105_v36 = vadd.f32 %v104_v35, %v55_v34 }
  0xb1   :  { %v127_v37 = vsel %vm70_vm0, %v105_v36, 0.0 }
  0xb2   :  { %128 = vadd.xlane.f32.xlu2 %v127_v37 }
  0xb6   :  { %v107_v39 = vpop.f32.mrf.mxu0 }
  0xb7   :  { %v108_v40 = vadd.f32 %v107_v39, %v56_v38 }
  0xb9   :  { %v130_v41 = vsel %vm70_vm0, %v108_v40, 0.0 }
  0xba   :  { %131 = vadd.xlane.f32.xlu2 %v130_v41 }
  0xbe   :  { %v109_v55 = vpop.f32.mrf.mxu0 }
  0xbf   :  { %v110_v58 = vadd.f32 %v109_v55, %v57_v54 }
  0xc1   :  { %v133_v61 = vsel %vm70_vm0, %v110_v58, 0.0 }
  0xfd   :  { %v114_v49 = vpop.xlane.xlu0 %113 }
  0xfe   :  { %v143_v50 = vmul.f32 %v763_v48, %v114_v49 }
 0x100   :  { %v766_v51 = vsub.f32 %v93_v16, %v143_v50 }
 0x102   :  { %v159_v52 = vmul.f32 %v766_v51, %v766_v51 }
 0x104   :  { %v167_v53 = vsel %vm70_vm0, %v159_v52, 0.0 }
 0x105   :  { %168 = vadd.xlane.f32.xlu0 %v167_v53  ;;  %v117_v56 = vpop.xlane.xlu0 %116 }
 0x106   :  { %v144_v57 = vmul.f32 %v763_v48, %v117_v56 }
 0x108   :  { %v775_v59 = vsub.f32 %v95_v20, %v144_v57 }
 0x10a   :  { %v160_v60 = vmul.f32 %v775_v59, %v775_v59 }
 0x10c   :  { %v170_v62 = vsel %vm70_vm0, %v160_v60, 0.0  ;;  %v831_v60 = vld [vmem:[%s913_s3] ss:$0 sm:$0xff] }
 0x10d   :  { %v120_v63 = vpop.xlane.xlu1 %119  ;;  %134 = vadd.xlane.f32.xlu0 %v133_v61  ;;  %171 = vadd.xlane.f32.xlu1 %v170_v62 }
 0x10e   :  { %v145_v0 = vmul.f32 %v763_v48, %v120_v63 }
 0x110   :  { %v782_v1 = vsub.f32 %v98_v24, %v145_v0  ;;  %v578_v24 = vld [vmem:[%s915_s5 + $0x8] sm:$0xff]  ;;  %s650_s5 = smov 8  }
 0x111   :  { %361 = vmatpush.bf16.msra.mxu1 %v578_v24 }
 0x112   :  { %v161_v2 = vmul.f32 %v782_v1, %v782_v1 }
 0x114   :  { %v173_v3 = vsel %vm70_vm0, %v161_v2, 0.0 }
 0x115   :  { %v123_v4 = vpop.xlane.xlu1 %122  ;;  %174 = vadd.xlane.f32.xlu1 %v173_v3  ;;  %362 = vmatpush.bf16.msra.mxu1 %v577_v27 }
 0x116   :  { %v146_v5 = vmul.f32 %v763_v48, %v123_v4 }
 0x118   :  { %v788_v6 = vsub.f32 %v100_v28, %v146_v5 }
 0x11a   :  { %v162_v7 = vmul.f32 %v788_v6, %v788_v6 }
 0x11c   :  { %v176_v8 = vsel %vm70_vm0, %v162_v7, 0.0 }
 0x11d   :  { %v126_v9 = vpop.xlane.xlu2 %125  ;;  %177 = vadd.xlane.f32.xlu2 %v176_v8 }
 0x11e   :  { %v147_v10 = vmul.f32 %v763_v48, %v126_v9 }
 0x120   :  { %v794_v11 = vsub.f32 %v103_v32, %v147_v10 }
 0x122   :  { %v163_v12 = vmul.f32 %v794_v11, %v794_v11 }
 0x124   :  { %v179_v13 = vsel %vm70_vm0, %v163_v12, 0.0 }
 0x125   :  { %v129_v14 = vpop.xlane.xlu2 %128  ;;  %180 = vadd.xlane.f32.xlu0 %v179_v13 }
 0x126   :  { %v148_v15 = vmul.f32 %v763_v48, %v129_v14 }
 0x128   :  { %v800_v16 = vsub.f32 %v105_v36, %v148_v15 }
 0x12a   :  { %v164_v17 = vmul.f32 %v800_v16, %v800_v16 }
 0x12c   :  { %v182_v18 = vsel %vm70_vm0, %v164_v17, 0.0 }
 0x12d   :  { %v132_v19 = vpop.xlane.xlu2 %131  ;;  %183 = vadd.xlane.f32.xlu1 %v182_v18 }
 0x12e   :  { %v149_v20 = vmul.f32 %v763_v48, %v132_v19 }
 0x130   :  { %v806_v21 = vsub.f32 %v108_v40, %v149_v20 }
 0x132   :  { %v165_v22 = vmul.f32 %v806_v21, %v806_v21 }
 0x134   :  { %v185_v23 = vsel %vm70_vm0, %v165_v22, 0.0 }
 0x135   :  { %186 = vadd.xlane.f32.xlu2 %v185_v23 }
 0x178   :  { %v169_v25 = vpop.xlane.xlu0 %168 }
 0x179   :  { %v191_v26 = vmul.f32 %v169_v25, %v763_v48 }
 0x17b   :  { %v199_v28 = vadd.f32 1e-05, %v191_v26 }
 0x17d   :  { %605 = vrsqrt.f32 %v199_v28  ;;  %vm213_vm3 = vweird.f32 %v199_v28 }
 0x180   :  { %v172_v29 = vpop.xlane.xlu1 %171  ;;  %v135_v30 = vpop.xlane.xlu0 %134 }
 0x181   :  { %v192_v31 = vmul.f32 %v172_v29, %v763_v48  ;;  %v150_v32 = vmul.f32 %v763_v48, %v135_v30 }
 0x183   :  { %v606_v33 = vpop.eup %605  ;;  %v200_v34 = vadd.f32 1e-05, %v192_v31  ;;  %v820_v35 = vsub.f32 %v110_v58, %v150_v32 }
 0x184   :  { %v208_v36 = vmul.f32 %v606_v33, %v199_v28  ;;  %vm214_vm2 = vweird.f32 %v606_v33 }
 0x185   :  { %607 = vrsqrt.f32 %v200_v34  ;;  %v166_v37 = vmul.f32 %v820_v35, %v820_v35  ;;  %vm215_vm4 = vmor %vm213_vm3, %vm214_vm2  ;;  %vm223_vm6 = vweird.f32 %v200_v34 }
 0x186   :  { %v209_v38 = vmul.f32 %v606_v33, %v208_v36 }
 0x187   :  { %v188_v39 = vsel %vm70_vm0, %v166_v37, 0.0 }
 0x188   :  { %v210_v40 = vmul.f32 0.5, %v209_v38  ;;  %v175_v41 = vpop.xlane.xlu1 %174  ;;  %189 = vadd.xlane.f32.xlu0 %v188_v39 }
 0x189   :  { %v193_v42 = vmul.f32 %v175_v41, %v763_v48 }
 0x18a   :  { %v211_v43 = vsub.f32 1.5, %v210_v40 }
 0x18b   :  { %v608_v44 = vpop.eup %607  ;;  %v201_v45 = vadd.f32 1e-05, %v193_v42 }
 0x18c   :  { %v212_v46 = vmul.f32 %v606_v33, %v211_v43  ;;  %v218_v47 = vmul.f32 %v608_v44, %v200_v34  ;;  %vm224_vm5 = vweird.f32 %v608_v44 }
 0x18d   :  { %609 = vrsqrt.f32 %v201_v45  ;;  %vm225_vm7 = vmor %vm223_vm6, %vm224_vm5  ;;  %vm233_vm9 = vweird.f32 %v201_v45 }
 0x18e   :  { %v219_v49 = vmul.f32 %v608_v44, %v218_v47  ;;  %v216_v50 = vsel %vm215_vm4, %v606_v33, %v212_v46 }
 0x18f   :  { %v287_v57 = vmul.f32 %v216_v50, %v766_v51  ;;  %v838_v51 = vld [vmem:[%s914_s4] ss:$0 sm:$0xff] }
 0x190   :  { %v220_v52 = vmul.f32 0.5, %v219_v49  ;;  %v178_v53 = vpop.xlane.xlu2 %177 }
 0x191   :  { %v194_v54 = vmul.f32 %v178_v53, %v763_v48  ;;  %v299_v3 = vmul.f32 %v831_v60, %v287_v57 }
 0x192   :  { %v221_v55 = vsub.f32 1.5, %v220_v52 }
 0x193   :  { %v610_v56 = vpop.eup %609  ;;  %v202_v58 = vadd.f32 1e-05, %v194_v54  ;;  %v311_v13 = vadd.f32 %v838_v51, %v299_v3  ;;  %v582_v3 = vld [vmem:[%s917_s7 + $0x18] sm:$0xff] }
 0x194   :  { %v222_v61 = vmul.f32 %v608_v44, %v221_v55  ;;  %v228_v62 = vmul.f32 %v610_v56, %v201_v45  ;;  %vm234_vm8 = vweird.f32 %v610_v56 }
 0x195   :  { %611 = vrsqrt.f32 %v202_v58  ;;  %vm235_vm10 = vmor %vm233_vm9, %vm234_vm8  ;;  %vm243_vm12 = vweird.f32 %v202_v58 }
 0x196   :  { %v226_v63 = vsel %vm225_vm7, %v608_v44, %v222_v61  ;;  %v229_v0 = vmul.f32 %v610_v56, %v228_v62  ;;  %v586_v61 = vld [vmem:[%s917_s7 + $0x38] sm:$0xff]  ;;  %v584_v62 = vld [vmem:[%s917_s7 + $0x28] sm:$0xff] }
 0x197   :  { %v288_v2 = vmul.f32 %v226_v63, %v775_v59  ;;  %464 = vmatpush.bf16.msra.mxu2 %v586_v61  ;;  %587 = vmatpush.bf16.msra.mxu3 %v586_v61 }
 0x198   :  { %v230_v4 = vmul.f32 0.5, %v229_v0  ;;  %v181_v5 = vpop.xlane.xlu0 %180  ;;  %v583_v0 = vld [vmem:[%s917_s7 + $0x20] sm:$0xff] }
 0x199   :  { %v195_v7 = vmul.f32 %v181_v5, %v763_v48  ;;  %v300_v8 = vmul.f32 %v831_v60, %v288_v2 }
 0x19a   :  { %v231_v9 = vsub.f32 1.5, %v230_v4 }
 0x19b   :  { %v612_v10 = vpop.eup %611  ;;  %v203_v12 = vadd.f32 1e-05, %v195_v7  ;;  %v312_v59 = vadd.f32 %v838_v51, %v300_v8 }
 0x19c   :  { %v232_v14 = vmul.f32 %v610_v56, %v231_v9  ;;  %v238_v15 = vmul.f32 %v612_v10, %v202_v58  ;;  %vm244_vm11 = vweird.f32 %v612_v10  ;;  %v581_v9 = vld [vmem:[%s917_s7 + $0x10] sm:$0xff] }
 0x19d   :  { %613 = vrsqrt.f32 %v203_v12  ;;  %v319_v17 = vpack.c.bf16 %v312_v59, %v311_v13  ;;  %vm245_vm13 = vmor %vm243_vm12, %vm244_vm11  ;;  %vm253_vm15 = vweird.f32 %v203_v12 }
 0x19e   :  { %v239_v18 = vmul.f32 %v612_v10, %v238_v15  ;;  %v236_v19 = vsel %vm235_vm10, %v610_v56, %v232_v14 }
 0x19f   :  { %539 = vmatmul.msk.bf16.vlgmr.msra.gmra.mxu1 %vm70_vm0, %v319_v17  ;;  %v289_v26 = vmul.f32 %v236_v19, %v782_v1 }
 0x1a0   :  { %v240_v20 = vmul.f32 0.5, %v239_v18  ;;  %v184_v22 = vpop.xlane.xlu1 %183 }
 0x1a1   :  { %v196_v23 = vmul.f32 %v184_v22, %v763_v48  ;;  %v301_v33 = vmul.f32 %v831_v60, %v289_v26 }
 0x1a2   :  { %v241_v24 = vsub.f32 1.5, %v240_v20 }
 0x1a3   :  { %v614_v25 = vpop.eup %613  ;;  %v204_v27 = vadd.f32 1e-05, %v196_v23  ;;  %v313_v39 = vadd.f32 %v838_v51, %v301_v33 }
 0x1a4   :  { %v242_v28 = vmul.f32 %v612_v10, %v241_v24  ;;  %v248_v29 = vmul.f32 %v614_v25, %v203_v12  ;;  %vm254_vm14 = vweird.f32 %v614_v25  ;;  %v580_v12 = vld [vmem:[%s917_s7 + $0x8] sm:$0xff] }
 0x1a5   :  { %615 = vrsqrt.f32 %v204_v27  ;;  %vm255_vm1 = vmor %vm253_vm15, %vm254_vm14  ;;  %vm263_vm3 = vweird.f32 %v204_v27 }
 0x1a6   :  { %v246_v30 = vsel %vm245_vm13, %v612_v10, %v242_v28  ;;  %v249_v31 = vmul.f32 %v614_v25, %v248_v29 }
 0x1a7   :  { %v290_v32 = vmul.f32 %v246_v30, %v788_v6 }
 0x1a8   :  { %v250_v34 = vmul.f32 0.5, %v249_v31  ;;  %v187_v57 = vpop.xlane.xlu2 %186 }
 0x1a9   :  { %v302_v36 = vmul.f32 %v831_v60, %v290_v32 }
 0x1aa   :  { %v251_v37 = vsub.f32 1.5, %v250_v34 }
 0x1ab   :  { %v616_v38 = vpop.eup %615  ;;  %v314_v1 = vadd.f32 %v838_v51, %v302_v36 }
 0x1ac   :  { %v252_v40 = vmul.f32 %v614_v25, %v251_v37  ;;  %v258_v41 = vmul.f32 %v616_v38, %v204_v27  ;;  %vm264_vm2 = vweird.f32 %v616_v38 }
 0x1ad   :  { %v320_v42 = vpack.c.bf16 %v314_v1, %v313_v39  ;;  %vm265_vm4 = vmor %vm263_vm3, %vm264_vm2 }
 0x1ae   :  { %v259_v43 = vmul.f32 %v616_v38, %v258_v41  ;;  %v256_v6 = vsel %vm255_vm1, %v614_v25, %v252_v40 }
 0x1af   :  { %540 = vmatmul.msk.bf16.gmra.mxu1 %vm70_vm0, %v320_v42  ;;  %v291_v46 = vmul.f32 %v256_v6, %v794_v11  ;;  %v197_v11 = vmul.f32 %v187_v57, %v763_v48  ;;  %v602_v57 = vld [vmem:[%s918_s8] ss:$0 sm:$0xff]  ;;  %s648_s8 = smov [#allocation2]  }
 0x1b0   :  { %v260_v44 = vmul.f32 0.5, %v259_v43  ;;  %s505_s20 = sshll.u32 %s648_s8, 4  ;;  %s506_s20 = int_to_ptr.vmem [resolvable:$true] %s505_s20 }
 0x1b1   :  { %v303_v52 = vmul.f32 %v831_v60, %v291_v46  ;;  %v205_v58 = vadd.f32 1e-05, %v197_v11 }
 0x1b2   :  { %v261_v45 = vsub.f32 1.5, %v260_v44 }
 0x1b3   :  { %v315_v54 = vadd.f32 %v838_v51, %v303_v52  ;;  %617 = vrsqrt.f32 %v205_v58  ;;  %vm273_vm6 = vweird.f32 %v205_v58 }
 0x1b4   :  { %v262_v47 = vmul.f32 %v616_v38, %v261_v45 }
 0x1b6   :  { %v266_v49 = vsel %vm265_vm4, %v616_v38, %v262_v47 }
 0x1b7   :  { %v292_v50 = vmul.f32 %v266_v49, %v800_v16  ;;  %v585_v16 = vld [vmem:[%s917_s7 + $0x30] sm:$0xff] }
 0x1b8   :  { %465 = vmatpush.bf16.msra.mxu2 %v585_v16  ;;  %588 = vmatpush.bf16.msra.mxu3 %v585_v16 }
 0x1b9   :  { %v304_v53 = vmul.f32 %v831_v60, %v292_v50  ;;  %v618_v63 = vpop.eup %617 }
 0x1ba   :  { %v268_v2 = vmul.f32 %v618_v63, %v205_v58  ;;  %vm274_vm5 = vweird.f32 %v618_v63 }
 0x1bb   :  { %v316_v55 = vadd.f32 %v838_v51, %v304_v53  ;;  %vm275_vm7 = vmor %vm273_vm6, %vm274_vm5 }
 0x1bc   :  { %466 = vmatpush.bf16.msra.mxu2 %v584_v62  ;;  %589 = vmatpush.bf16.msra.mxu3 %v584_v62  ;;  %v269_v4 = vmul.f32 %v618_v63, %v268_v2 }
 0x1bd   :  { %v321_v56 = vpack.c.bf16 %v316_v55, %v315_v54 }
 0x1be   :  { %v270_v10 = vmul.f32 0.5, %v269_v4 }
 0x1bf   :  { %541 = vmatmul.msk.bf16.gmra.mxu1 %vm70_vm0, %v321_v56 }
 0x1c0   :  { %467 = vmatpush.bf16.msra.mxu2 %v583_v0  ;;  %590 = vmatpush.bf16.msra.mxu3 %v583_v0  ;;  %v271_v13 = vsub.f32 1.5, %v270_v10 }
 0x1c2   :  { %v272_v14 = vmul.f32 %v618_v63, %v271_v13 }
 0x1c4   :  { %468 = vmatpush.bf16.msra.mxu2 %v582_v3  ;;  %591 = vmatpush.bf16.msra.mxu3 %v582_v3  ;;  %v276_v18 = vsel %vm275_vm7, %v618_v63, %v272_v14 }
 0x1c5   :  { %v293_v22 = vmul.f32 %v276_v18, %v806_v21  ;;  %v601_v21 = vld [vmem:[%s916_s6] ss:$0 sm:$0xff] }
 0x1c7   :  { %v305_v26 = vmul.f32 %v831_v60, %v293_v22 }
 0x1c8   :  { %469 = vmatpush.bf16.msra.mxu2 %v581_v9  ;;  %592 = vmatpush.bf16.msra.mxu3 %v581_v9 }
 0x1c9   :  { %v317_v28 = vadd.f32 %v838_v51, %v305_v26 }
 0x1cc   :  { %470 = vmatpush.bf16.msra.mxu2 %v580_v12  ;;  %593 = vmatpush.bf16.msra.mxu3 %v580_v12 }
 0x1fb   :  { %v190_v5 = vpop.xlane.xlu0 %189 }
 0x1fc   :  { %v198_v7 = vmul.f32 %v190_v5, %v763_v48  ;;  %v579_v48 = vld [vmem:[%s917_s7] sm:$0xff] }
 0x1fd   :  { %471 = vmatpush.bf16.msra.mxu2 %v579_v48  ;;  %594 = vmatpush.bf16.msra.mxu3 %v579_v48 }
 0x1fe   :  { %v206_v8 = vadd.f32 1e-05, %v198_v7 }
 0x200   :  { %619 = vrsqrt.f32 %v206_v8  ;;  %vm283_vm9 = vweird.f32 %v206_v8 }
 0x206   :  { %v620_v59 = vpop.eup %619 }
 0x207   :  { %v278_v15 = vmul.f32 %v620_v59, %v206_v8  ;;  %vm284_vm8 = vweird.f32 %v620_v59 }
 0x208   :  { %vm285_vm10 = vmor %vm283_vm9, %vm284_vm8 }
 0x209   :  { %v279_v17 = vmul.f32 %v620_v59, %v278_v15 }
 0x20b   :  { %v280_v19 = vmul.f32 0.5, %v279_v17 }
 0x20d   :  { %v281_v20 = vsub.f32 1.5, %v280_v19 }
 0x20f   :  { %v282_v23 = vmul.f32 %v620_v59, %v281_v20 }
 0x211   :  { %v286_v24 = vsel %vm285_vm10, %v620_v59, %v282_v23 }
 0x212   :  { %v294_v25 = vmul.f32 %v286_v24, %v820_v35 }
 0x214   :  { %v306_v27 = vmul.f32 %v831_v60, %v294_v25 }
 0x216   :  { %v318_v29 = vadd.f32 %v838_v51, %v306_v27 }
 0x218   :  { %v322_v30 = vpack.c.bf16 %v318_v29, %v317_v28 }
 0x21a   :  { %542 = vmatmul.msk.bf16.gmra.mxu1 %vm70_vm0, %v322_v30 }
 0x21c   :  { %v364_v31 = vpop.f32.mrf.mxu1 }
 0x21d   :  { %v365_v32 = vadd.f32 %v601_v21, %v364_v31 }
 0x21f   :  { %v384_v35 = vmax.f32 %v365_v32, 0.0 }
 0x224   :  { %v366_v33 = vpop.f32.mrf.mxu1 }
 0x225   :  { %v367_v34 = vadd.f32 %v601_v21, %v366_v33 }
 0x227   :  { %v385_v36 = vmax.f32 %v367_v34, 0.0 }
 0x229   :  { %v392_v37 = vpack.c.bf16 %v385_v36, %v384_v35 }
 0x22b   :  { %472 = vmatmul.bf16.vlgmr.msra.gmra.mxu2 %v392_v37 }
 0x22c   :  { %v369_v60 = vpop.f32.mrf.mxu1 }
 0x22d   :  { %v370_v38 = vadd.f32 %v601_v21, %v369_v60 }
 0x22f   :  { %v386_v51 = vmax.f32 %v370_v38, 0.0 }
 0x234   :  { %v371_v39 = vpop.f32.mrf.mxu1 }
 0x235   :  { %v372_v1 = vadd.f32 %v601_v21, %v371_v39 }
 0x237   :  { %v387_v40 = vmax.f32 %v372_v1, 0.0 }
 0x239   :  { %v393_v41 = vpack.c.bf16 %v387_v40, %v386_v51 }
 0x23b   :  { %477 = vmatmul.bf16.vlgmr.msra.gmra.mxu3 %v393_v41 }
 0x23c   :  { %v374_v42 = vpop.f32.mrf.mxu1 }
 0x23d   :  { %v375_v43 = vadd.f32 %v601_v21, %v374_v42 }
 0x23f   :  { %v388_v45 = vmax.f32 %v375_v43, 0.0 }
 0x244   :  { %v376_v6 = vpop.f32.mrf.mxu1 }
 0x245   :  { %v377_v44 = vadd.f32 %v601_v21, %v376_v6 }
 0x247   :  { %v389_v46 = vmax.f32 %v377_v44, 0.0 }
 0x249   :  { %v394_v47 = vpack.c.bf16 %v389_v46, %v388_v45 }
 0x24b   :  { %482 = vmatmul.bf16.gmra.mxu3 %v394_v47 }
 0x297   :  { %v379_v49 = vpop.f32.mrf.mxu1 }
 0x298   :  { %v380_v50 = vadd.f32 %v601_v21, %v379_v49 }
 0x29a   :  { %v390_v54 = vmax.f32 %v380_v50, 0.0 }
 0x29f   :  { %v381_v52 = vpop.f32.mrf.mxu1 }
 0x2a0   :  { %v382_v53 = vadd.f32 %v601_v21, %v381_v52 }
 0x2a2   :  { %v391_v55 = vmax.f32 %v382_v53, 0.0 }
 0x2a4   :  { %v395_v56 = vpack.c.bf16 %v391_v55, %v390_v54 }
 0x2a6   :  { %487 = vmatmul.bf16.gmra.mxu3 %v395_v56 }
 0x2ae   :  { %v473_v11 = vpop.f32.mrf.mxu2 }
 0x2af   :  { %v474_v58 = vadd.f32 %v602_v57, %v473_v11 }
 0x2b1   :  { %493 = vst.msk [vmem:[#allocation2] sm:$0xff] %vm70_vm0, %v474_v58 }
 0x2b6   :  { %v475_v61 = vpop.f32.mrf.mxu2 }
 0x2b7   :  { %v476_v16 = vadd.f32 %v602_v57, %v475_v61 }
 0x2b9   :  { %494 = vst.msk [vmem:[#allocation2 + $0x8] sm:$0xff] %vm70_vm0, %v476_v16 }
 0x2be   :  { %v478_v62 = vpop.f32.mrf.mxu3 }
 0x2bf   :  { %v479_v63 = vadd.f32 %v602_v57, %v478_v62 }
 0x2c1   :  { %495 = vst.msk [vmem:[#allocation2 + $0x10] sm:$0xff] %vm70_vm0, %v479_v63 }
 0x2c6   :  { %v480_v0 = vpop.f32.mrf.mxu3 }
 0x2c7   :  { %v481_v2 = vadd.f32 %v602_v57, %v480_v0 }
 0x2c9   :  { %496 = vst.msk [vmem:[#allocation2 + $0x18] sm:$0xff] %vm70_vm0, %v481_v2 }
 0x2ce   :  { %v483_v3 = vpop.f32.mrf.mxu3 }
 0x2cf   :  { %v484_v4 = vadd.f32 %v602_v57, %v483_v3 }
 0x2d1   :  { %497 = vst.msk [vmem:[#allocation2 + $0x20] sm:$0xff] %vm70_vm0, %v484_v4 }
 0x2d6   :  { %v485_v5 = vpop.f32.mrf.mxu3 }
 0x2d7   :  { %v486_v7 = vadd.f32 %v602_v57, %v485_v5 }
 0x2d9   :  { %498 = vst.msk [vmem:[#allocation2 + $0x28] sm:$0xff] %vm70_vm0, %v486_v7 }
 0x329   :  { %v488_v8 = vpop.f32.mrf.mxu3 }
 0x32a   :  { %v489_v9 = vadd.f32 %v602_v57, %v488_v8 }
 0x32c   :  { %499 = vst.msk [vmem:[#allocation2 + $0x30] sm:$0xff] %vm70_vm0, %v489_v9 }
 0x331   :  { %v490_v10 = vpop.f32.mrf.mxu3 }
 0x332   :  { %v491_v12 = vadd.f32 %v602_v57, %v490_v10 }
 0x334   :  { %500 = vst.msk [vmem:[#allocation2 + $0x38] sm:$0xff] %vm70_vm0, %v491_v12 }
 0x335   :  { %513 = dma.vmem_to_hbm [thread:$0]  %s506_s20, 1024, %s508_s22, [#allocation3], %s649_s23, %s649_s23, %s650_s5  }
 0x336   :  { %645 = dma.done.wait [#allocation3], 1024  }
 0x337   :  { %646 = vsyncadd [#allocation3], 4294966272 }
 0x338   :  { %518 = vsyncpa [#allocation3], 1 }

</bundles_post_ra>
